<compile_context>
chip_gen: v6e
topology: v6e:2x2x1
jax: 0.10.0
libtpu: 0.0.40
codegen_flags: <defaults>
</compile_context>

<pallas_src>
import functools

import jax
import jax.numpy as jnp
from jax.experimental import pallas as pl
from jax.experimental.pallas import tpu as pltpu

K_PAD = 256          # layer0 GEMM depth: 7*7*3 = 147 zero-padded to a clean 2x128
C_OUT = 64           # channel width of layer0 / layer1
N_BLOCKS = 3         # resnet34 layer1 has 3 BasicBlocks
VMEM_LIMIT = 32 * 1024 * 1024  # safe on v5e/v6e/v7x


# ----------------------------- Pallas kernels -------------------------------

def _layer0_kernel(p_ref, w_ref, s_ref, o_ref, *, Ho, Wo, Hp, Wp):
    """Fused conv7x7(as GEMM) + BN shift + ReLU + 3x3/s2/p1 max-pool for one image.

    p_ref: (1, Ho*Wo, Kpad) bf16 im2col patches (BN scale already folded into w_ref)
    w_ref: (Kpad, C)        bf16
    s_ref: (1, C)           f32  BN shift
    o_ref: (1, (Hp+2)*(Wp+2), C) f32  pooled output in zero-ring padded-flat layout
    """
    acc = jnp.dot(p_ref[0], w_ref[...], preferred_element_type=jnp.float32)
    y = jnp.maximum(acc + s_ref[...], 0.0)            # (Ho*Wo, C); row = h*Wo + w; y >= 0

    # Zero the whole padded output once (the ring rows must stay zero for kernel B).
    o_ref[...] = jnp.zeros(o_ref.shape, o_ref.dtype)

    # 3x3 stride-2 pad-1 max pool, fully in VMEM.  Because y >= 0 (post-ReLU), clamping
    # the window indices at the border is exactly equivalent to zero padding.
    Wq = Wp + 2
    for ph in range(Hp):
        r0 = max(2 * ph - 1, 0)
        r1 = 2 * ph
        r2 = min(2 * ph + 1, Ho - 1)
        rows = jnp.maximum(
            jnp.maximum(y[r0 * Wo:(r0 + 1) * Wo], y[r1 * Wo:(r1 + 1) * Wo]),
            y[r2 * Wo:(r2 + 1) * Wo])                 # (Wo, C) row-direction max
        for pw in range(Wp):
            c0 = max(2 * pw - 1, 0)
            c1 = 2 * pw
            c2 = min(2 * pw + 1, Wo - 1)
            v = jnp.maximum(jnp.maximum(rows[c0:c0 + 1], rows[c1:c1 + 1]),
                            rows[c2:c2 + 1])          # (1, C)
            o_ref[0, pl.ds((ph + 1) * Wq + (pw + 1), 1), :] = v


def _layer1_kernel(x_ref, w_ref, s_ref, m_ref, o_ref, cur_scr, tmp_scr, *,
                   H, W, C, n_blocks):
    """All three layer1 BasicBlocks, fused, for one image.

    x_ref: (1, P, C) f32, P=(H+2)*(W+2), zero-ring padded-flat activation
    w_ref: (n_blocks, 2, 9, C, C) bf16   per-tap 3x3 weights, BN scale folded in
    s_ref: (n_blocks, 2, 1, C)    f32    BN shifts
    m_ref: (span, C)              f32    1.0 on interior rows, 0.0 on ring rows
    o_ref: (1, P, C) f32
    cur_scr, tmp_scr: (P, C) f32 VMEM scratch
    """
    Wq = W + 2
    P = (H + 2) * Wq
    span = (H - 1) * Wq + W          # contiguous row range covering every interior row
    start = Wq + 1                   # flat index of interior position (1, 1)

    cur_scr[...] = x_ref[0]                              # block input (zero ring)
    tmp_scr[...] = jnp.zeros((P, C), jnp.float32)        # y1 buffer, ring stays zero
    mask = m_ref[...]

    def conv3x3(src, blk, cv):
        # 3x3 / stride 1 / pad 1 conv as nine shifted contiguous row-slices -> MXU.
        acc = jnp.zeros((span, C), jnp.float32)
        for di in range(3):
            for dj in range(3):
                off = di * Wq + dj
                sl = src[off:off + span, :].astype(jnp.bfloat16)
                acc = acc + jnp.dot(sl, w_ref[blk, cv, di * 3 + dj],
                                    preferred_element_type=jnp.float32)
        return acc + s_ref[blk, cv]

    for blk in range(n_blocks):
        cur = cur_scr[...]                                       # (P, C)
        # conv1 -> BN -> ReLU  (mask re-zeroes the ring rows that fall inside the span)
        y1 = jnp.maximum(conv3x3(cur, blk, 0), 0.0) * mask
        tmp_scr[pl.ds(start, span), :] = y1
        # conv2 -> BN -> +identity -> ReLU
        y1_full = tmp_scr[...]
        res = cur[start:start + span, :]
        out = jnp.maximum(conv3x3(y1_full, blk, 1) + res, 0.0) * mask
        cur_scr[pl.ds(start, span), :] = out

    o_ref[0] = cur_scr[...]


# ----------------------------- pallas_call wrappers --------------------------

def layer0_fused(patches, w0_mat, shift0, *, N, Ho, Wo, C):
    assert Ho % 2 == 0 and Wo % 2 == 0  # clamp-as-zero-pad pooling trick needs even maps
    Hp = (Ho + 2 - 3) // 2 + 1
    Wp = (Wo + 2 - 3) // 2 + 1
    P1 = (Hp + 2) * (Wp + 2)
    M0, Kp = Ho * Wo, patches.shape[-1]

    kern = functools.partial(_layer0_kernel, Ho=Ho, Wo=Wo, Hp=Hp, Wp=Wp)
    flops = 2 * N * M0 * Kp * C
    bytes_accessed = (patches.size * 2 + w0_mat.size * 2 + shift0.size * 4
                      + N * P1 * C * 4)

    out = pl.pallas_call(
        kern,
        grid=(N,),
        in_specs=[
            pl.BlockSpec((1, M0, Kp), lambda n: (n, 0, 0)),
            pl.BlockSpec((Kp, C), lambda n: (0, 0)),
            pl.BlockSpec((1, C), lambda n: (0, 0)),
        ],
        out_specs=pl.BlockSpec((1, P1, C), lambda n: (n, 0, 0)),
        out_shape=jax.ShapeDtypeStruct((N, P1, C), jnp.float32),
        compiler_params=pltpu.CompilerParams(
            dimension_semantics=("parallel",),
            vmem_limit_bytes=VMEM_LIMIT),
        cost_estimate=pl.CostEstimate(flops=flops, transcendentals=0,
                                      bytes_accessed=bytes_accessed),
    )(patches, w0_mat, shift0)
    return out, Hp, Wp


def layer1_fused(x_pad, w_all, s_all, mask, *, N, H, W, C, n_blocks):
    P = (H + 2) * (W + 2)
    span = (H - 1) * (W + 2) + W

    kern = functools.partial(_layer1_kernel, H=H, W=W, C=C, n_blocks=n_blocks)
    flops = 2 * N * n_blocks * 2 * 9 * span * C * C
    bytes_accessed = (x_pad.size * 4 + w_all.size * 2 + s_all.size * 4
                      + mask.size * 4 + N * P * C * 4)

    return pl.pallas_call(
        kern,
        grid=(N,),
        in_specs=[
            pl.BlockSpec((1, P, C), lambda n: (n, 0, 0)),
            pl.BlockSpec((n_blocks, 2, 9, C, C), lambda n: (0, 0, 0, 0, 0)),
            pl.BlockSpec((n_blocks, 2, 1, C), lambda n: (0, 0, 0, 0)),
            pl.BlockSpec((span, C), lambda n: (0, 0)),
        ],
        out_specs=pl.BlockSpec((1, P, C), lambda n: (n, 0, 0)),
        out_shape=jax.ShapeDtypeStruct((N, P, C), jnp.float32),
        scratch_shapes=[pltpu.VMEM((P, C), jnp.float32),
                        pltpu.VMEM((P, C), jnp.float32)],
        compiler_params=pltpu.CompilerParams(
            dimension_semantics=("parallel",),
            vmem_limit_bytes=VMEM_LIMIT),
        cost_estimate=pl.CostEstimate(flops=flops, transcendentals=0,
                                      bytes_accessed=bytes_accessed),
    )(x_pad, w_all, s_all, mask)


# ------------------------------- host glue -----------------------------------

def im2col(x_nhwc, kh, kw, stride, pad):
    """Conv patches, returned as (N, Ho*Wo, kh*kw*C) with K ordered (tap, cin)."""
    N, H, W, C = x_nhwc.shape
    xp = jnp.pad(x_nhwc, ((0, 0), (pad, pad), (pad, pad), (0, 0)))
    Ho = (H + 2 * pad - kh) // stride + 1
    Wo = (W + 2 * pad - kw) // stride + 1
    cols = []
    for i in range(kh):
        for j in range(kw):
            cols.append(xp[:, i:i + stride * Ho:stride, j:j + stride * Wo:stride, :])
    patches = jnp.stack(cols, axis=3)                    # (N, Ho, Wo, kh*kw, C)
    return patches.reshape(N, Ho * Wo, kh * kw * C), Ho, Wo


def kaiming_conv(key, cout, cin, kh, kw):
    # kaiming_normal_(nonlinearity='relu'), fan_in mode: std = sqrt(2 / fan_in)
    fan_in = cin * kh * kw
    std = (2.0 / fan_in) ** 0.5
    return jax.random.normal(key, (cout, cin, kh, kw), jnp.float32) * std


def bn_affine(c, eps=1e-5):
    gamma = jnp.ones((c,), jnp.float32)
    beta = jnp.full((c,), 1e-4, jnp.float32)
    mean = jnp.zeros((c,), jnp.float32)
    var = jnp.ones((c,), jnp.float32)
    scale = gamma / jnp.sqrt(var + eps)
    shift = beta - mean * scale
    return scale, shift


def conv_w_to_mat(w):
    # PyTorch (Cout, Cin, kh, kw) -> (kh*kw*Cin, Cout), matching im2col ordering.
    cout, cin, kh, kw = w.shape
    return jnp.transpose(w, (2, 3, 1, 0)).reshape(kh * kw * cin, cout)


def conv_w_to_taps(w):
    # PyTorch (Cout, Cin, 3, 3) -> (9, Cin, Cout): per-tap GEMM matrices, tap = di*3+dj.
    cout, cin, kh, kw = w.shape
    return jnp.transpose(w, (2, 3, 1, 0)).reshape(kh * kw, cin, cout)


def build_params(key, in_channels=3, C=C_OUT, n_blocks=N_BLOCKS):
    keys = jax.random.split(key, 1 + 2 * n_blocks)

    # layer0: conv 7x7, BN scale folded into the GEMM weights, K padded to K_PAD.
    w0 = kaiming_conv(keys[0], C, in_channels, 7, 7)
    s0, b0 = bn_affine(C)
    w0_mat = conv_w_to_mat(w0) * s0[None, :]
    w0_mat = jnp.pad(w0_mat, ((0, K_PAD - w0_mat.shape[0]), (0, 0))).astype(jnp.bfloat16)
    shift0 = b0.reshape(1, C)

    # layer1: 3 BasicBlocks, per-tap weights with BN scale folded in.
    w_taps, shifts = [], []
    for b in range(n_blocks):
        w1 = kaiming_conv(keys[1 + 2 * b], C, C, 3, 3)
        w2 = kaiming_conv(keys[2 + 2 * b], C, C, 3, 3)
        sc1, sh1 = bn_affine(C)
        sc2, sh2 = bn_affine(C)
        w_taps.append(jnp.stack([conv_w_to_taps(w1) * sc1[None, None, :],
                                 conv_w_to_taps(w2) * sc2[None, None, :]], axis=0))
        shifts.append(jnp.stack([sh1.reshape(1, C), sh2.reshape(1, C)], axis=0))
    w_all = jnp.stack(w_taps, axis=0).astype(jnp.bfloat16)   # (n_blocks, 2, 9, C, C)
    s_all = jnp.stack(shifts, axis=0)                        # (n_blocks, 2, 1, C)

    return {"w0_mat": w0_mat, "shift0": shift0, "w_all": w_all, "s_all": s_all}


def resnet_forward(x_nchw, params, C=C_OUT, n_blocks=N_BLOCKS):
    x = jnp.transpose(x_nchw, (0, 2, 3, 1)).astype(jnp.float32)   # NHWC
    N = x.shape[0]

    # ---- layer0 (fused kernel A): conv7x7 s2 p3 + BN + ReLU + maxpool 3x3 s2 p1 ----
    patches, Ho, Wo = im2col(x, 7, 7, 2, 3)                       # (N, Ho*Wo, 147)
    patches = jnp.pad(patches, ((0, 0), (0, 0), (0, K_PAD - patches.shape[-1])))
    patches = patches.astype(jnp.bfloat16)
    x11_pad, Hp, Wp = layer0_fused(patches, params["w0_mat"], params["shift0"],
                                   N=N, Ho=Ho, Wo=Wo, C=C)

    # ---- layer1 (fused kernel B): 3 BasicBlocks on the zero-ring padded-flat layout ----
    Wq = Wp + 2
    span = (Hp - 1) * Wq + Wp
    start = Wq + 1
    wp_idx = (jnp.arange(span) + start) % Wq
    mask = (((wp_idx >= 1) & (wp_idx <= Wp)).astype(jnp.float32)[:, None]
            * jnp.ones((1, C), jnp.float32))                      # (span, C)
    x21_pad = layer1_fused(x11_pad, params["w_all"], params["s_all"], mask,
                           N=N, H=Hp, W=Wp, C=C, n_blocks=n_blocks)

    def unpad_nchw(a_pad):
        a = a_pad.reshape(N, Hp + 2, Wp + 2, C)[:, 1:Hp + 1, 1:Wp + 1, :]
        return jnp.transpose(a, (0, 3, 1, 2))

    return unpad_nchw(x11_pad), unpad_nchw(x21_pad)


# --------------------------------- main ---------------------------------------

if __name__ == "__main__":
    key = jax.random.PRNGKey(0)
    pkey, xkey = jax.random.split(key)

    params = build_params(pkey)
    x = jax.random.normal(xkey, (2, 3, 16, 16), jnp.float32)      # NCHW like PyTorch

    fwd = jax.jit(resnet_forward)
    x11, x21 = fwd(x, params)
    jax.block_until_ready((x11, x21))

    assert x11.shape == (2, 64, 4, 4), x11.shape
    assert x21.shape == (2, 64, 4, 4), x21.shape
    assert bool(jnp.all(jnp.isfinite(x11))) and bool(jnp.all(jnp.isfinite(x21)))
    print("KERNEL_OK")
</pallas_src>

<mosaic_0001>
module attributes {stable_mosaic.version = 11 : i64} {
  func.func @_layer0_kernel(%arg0: i32, %arg1: memref<1x64x256xbf16, #tpu.memory_space<vmem>>, %arg2: memref<256x64xbf16, #tpu.memory_space<vmem>>, %arg3: memref<1x64xf32, #tpu.memory_space<vmem>>, %arg4: memref<1x36x64xf32, #tpu.memory_space<vmem>>) attributes {dimension_semantics = [#tpu.dimension_semantics<parallel>], iteration_bounds = array<i64: 2>, scalar_prefetch = 0 : i64, scratch_operands = 0 : i64, tpu.core_type = #tpu.core_type<tc>, window_params = [{transform_indices = @transform_0, window_bounds = array<i64: 1, 64, 256>}, {pipeline_mode = #tpu.pipeline_mode<synchronous>, transform_indices = @transform_1, window_bounds = array<i64: 256, 64>}, {pipeline_mode = #tpu.pipeline_mode<synchronous>, transform_indices = @transform_2, window_bounds = array<i64: 1, 64>}, {transform_indices = @transform_3, window_bounds = array<i64: 1, 36, 64>}]} {
    %c0 = arith.constant 0 : index
    %c0_0 = arith.constant 0 : index
    %c0_1 = arith.constant 0 : index
    %0 = vector.load %arg1[%c0, %c0_0, %c0_1] : memref<1x64x256xbf16, #tpu.memory_space<vmem>>, vector<1x64x256xbf16>
    %1 = vector.shape_cast %0 : vector<1x64x256xbf16> to vector<64x256xbf16>
    %c0_2 = arith.constant 0 : index
    %c0_3 = arith.constant 0 : index
    %2 = vector.load %arg2[%c0_2, %c0_3] : memref<256x64xbf16, #tpu.memory_space<vmem>>, vector<256x64xbf16>
    %cst = arith.constant dense<0.000000e+00> : vector<64x64xf32>
    %3 = tpu.matmul %1, %2, %cst {dimension_numbers = #tpu.dot_dimension_numbers<[1], [0], [0], [1], [0, 0, 1, 1], [], []>} : vector<64x256xbf16>, vector<256x64xbf16>, vector<64x64xf32> -> vector<64x64xf32>
    %c0_4 = arith.constant 0 : index
    %c0_5 = arith.constant 0 : index
    %4 = vector.load %arg3[%c0_4, %c0_5] : memref<1x64xf32, #tpu.memory_space<vmem>>, vector<1x64xf32>
    %5 = vector.broadcast %4 : vector<1x64xf32> to vector<64x64xf32>
    %6 = arith.addf %3, %5 : vector<64x64xf32>
    %cst_6 = arith.constant 0.000000e+00 : f32
    %7 = vector.broadcast %cst_6 : f32 to vector<64x64xf32>
    %8 = arith.maximumf %6, %7 : vector<64x64xf32>
    %cst_7 = arith.constant 0.000000e+00 : f32
    %9 = vector.broadcast %cst_7 : f32 to vector<1x36x64xf32>
    %c0_8 = arith.constant 0 : index
    %c0_9 = arith.constant 0 : index
    %c0_10 = arith.constant 0 : index
    %10 = vector.load %arg4[%c0_8, %c0_9, %c0_10] : memref<1x36x64xf32, #tpu.memory_space<vmem>>, vector<1x36x64xf32>
    tpu.vector_store %arg4[%c0_8, %c0_9, %c0_10], %9 {strides = array<i32>} : memref<1x36x64xf32, #tpu.memory_space<vmem>>, vector<1x36x64xf32>,
    %11 = vector.extract_strided_slice %8 {offsets = [0, 0], sizes = [8, 64], strides = [1, 1]} : vector<64x64xf32> to vector<8x64xf32>
    %12 = vector.extract_strided_slice %8 {offsets = [0, 0], sizes = [8, 64], strides = [1, 1]} : vector<64x64xf32> to vector<8x64xf32>
    %13 = arith.maximumf %11, %12 : vector<8x64xf32>
    %14 = vector.extract_strided_slice %8 {offsets = [8, 0], sizes = [8, 64], strides = [1, 1]} : vector<64x64xf32> to vector<8x64xf32>
    %15 = arith.maximumf %13, %14 : vector<8x64xf32>
    %16 = vector.extract_strided_slice %15 {offsets = [0, 0], sizes = [1, 64], strides = [1, 1]} : vector<8x64xf32> to vector<1x64xf32>
    %17 = vector.extract_strided_slice %15 {offsets = [0, 0], sizes = [1, 64], strides = [1, 1]} : vector<8x64xf32> to vector<1x64xf32>
    %18 = arith.maximumf %16, %17 : vector<1x64xf32>
    %19 = vector.extract_strided_slice %15 {offsets = [1, 0], sizes = [1, 64], strides = [1, 1]} : vector<8x64xf32> to vector<1x64xf32>
    %20 = arith.maximumf %18, %19 : vector<1x64xf32>
    %c0_11 = arith.constant 0 : index
    %c7 = arith.constant 7 : index
    %c0_12 = arith.constant 0 : index
    %21 = vector.load %arg4[%c0_11, %c7, %c0_12] : memref<1x36x64xf32, #tpu.memory_space<vmem>>, vector<1x1x64xf32>
    %22 = vector.shape_cast %21 : vector<1x1x64xf32> to vector<1x64xf32>
    %23 = vector.shape_cast %20 : vector<1x64xf32> to vector<1x1x64xf32>
    tpu.vector_store %arg4[%c0_11, %c7, %c0_12], %23 {strides = array<i32>} : memref<1x36x64xf32, #tpu.memory_space<vmem>>, vector<1x1x64xf32>,
    %24 = vector.extract_strided_slice %15 {offsets = [1, 0], sizes = [1, 64], strides = [1, 1]} : vector<8x64xf32> to vector<1x64xf32>
    %25 = vector.extract_strided_slice %15 {offsets = [2, 0], sizes = [1, 64], strides = [1, 1]} : vector<8x64xf32> to vector<1x64xf32>
    %26 = arith.maximumf %24, %25 : vector<1x64xf32>
    %27 = vector.extract_strided_slice %15 {offsets = [3, 0], sizes = [1, 64], strides = [1, 1]} : vector<8x64xf32> to vector<1x64xf32>
    %28 = arith.maximumf %26, %27 : vector<1x64xf32>
    %c0_13 = arith.constant 0 : index
    %c8 = arith.constant 8 : index
    %c0_14 = arith.constant 0 : index
    %29 = vector.load %arg4[%c0_13, %c8, %c0_14] : memref<1x36x64xf32, #tpu.memory_space<vmem>>, vector<1x1x64xf32>
    %30 = vector.shape_cast %29 : vector<1x1x64xf32> to vector<1x64xf32>
    %31 = vector.shape_cast %28 : vector<1x64xf32> to vector<1x1x64xf32>
    tpu.vector_store %arg4[%c0_13, %c8, %c0_14], %31 {strides = array<i32>} : memref<1x36x64xf32, #tpu.memory_space<vmem>>, vector<1x1x64xf32>,
    %32 = vector.extract_strided_slice %15 {offsets = [3, 0], sizes = [1, 64], strides = [1, 1]} : vector<8x64xf32> to vector<1x64xf32>
    %33 = vector.extract_strided_slice %15 {offsets = [4, 0], sizes = [1, 64], strides = [1, 1]} : vector<8x64xf32> to vector<1x64xf32>
    %34 = arith.maximumf %32, %33 : vector<1x64xf32>
    %35 = vector.extract_strided_slice %15 {offsets = [5, 0], sizes = [1, 64], strides = [1, 1]} : vector<8x64xf32> to vector<1x64xf32>
    %36 = arith.maximumf %34, %35 : vector<1x64xf32>
    %c0_15 = arith.constant 0 : index
    %c9 = arith.constant 9 : index
    %c0_16 = arith.constant 0 : index
    %37 = vector.load %arg4[%c0_15, %c9, %c0_16] : memref<1x36x64xf32, #tpu.memory_space<vmem>>, vector<1x1x64xf32>
    %38 = vector.shape_cast %37 : vector<1x1x64xf32> to vector<1x64xf32>
    %39 = vector.shape_cast %36 : vector<1x64xf32> to vector<1x1x64xf32>
    tpu.vector_store %arg4[%c0_15, %c9, %c0_16], %39 {strides = array<i32>} : memref<1x36x64xf32, #tpu.memory_space<vmem>>, vector<1x1x64xf32>,
    %40 = vector.extract_strided_slice %15 {offsets = [5, 0], sizes = [1, 64], strides = [1, 1]} : vector<8x64xf32> to vector<1x64xf32>
    %41 = vector.extract_strided_slice %15 {offsets = [6, 0], sizes = [1, 64], strides = [1, 1]} : vector<8x64xf32> to vector<1x64xf32>
    %42 = arith.maximumf %40, %41 : vector<1x64xf32>
    %43 = vector.extract_strided_slice %15 {offsets = [7, 0], sizes = [1, 64], strides = [1, 1]} : vector<8x64xf32> to vector<1x64xf32>
    %44 = arith.maximumf %42, %43 : vector<1x64xf32>
    %c0_17 = arith.constant 0 : index
    %c10 = arith.constant 10 : index
    %c0_18 = arith.constant 0 : index
    %45 = vector.load %arg4[%c0_17, %c10, %c0_18] : memref<1x36x64xf32, #tpu.memory_space<vmem>>, vector<1x1x64xf32>
    %46 = vector.shape_cast %45 : vector<1x1x64xf32> to vector<1x64xf32>
    %47 = vector.shape_cast %44 : vector<1x64xf32> to vector<1x1x64xf32>
    tpu.vector_store %arg4[%c0_17, %c10, %c0_18], %47 {strides = array<i32>} : memref<1x36x64xf32, #tpu.memory_space<vmem>>, vector<1x1x64xf32>,
    %48 = vector.extract_strided_slice %8 {offsets = [8, 0], sizes = [8, 64], strides = [1, 1]} : vector<64x64xf32> to vector<8x64xf32>
    %49 = vector.extract_strided_slice %8 {offsets = [16, 0], sizes = [8, 64], strides = [1, 1]} : vector<64x64xf32> to vector<8x64xf32>
    %50 = arith.maximumf %48, %49 : vector<8x64xf32>
    %51 = vector.extract_strided_slice %8 {offsets = [24, 0], sizes = [8, 64], strides = [1, 1]} : vector<64x64xf32> to vector<8x64xf32>
    %52 = arith.maximumf %50, %51 : vector<8x64xf32>
    %53 = vector.extract_strided_slice %52 {offsets = [0, 0], sizes = [1, 64], strides = [1, 1]} : vector<8x64xf32> to vector<1x64xf32>
    %54 = vector.extract_strided_slice %52 {offsets = [0, 0], sizes = [1, 64], strides = [1, 1]} : vector<8x64xf32> to vector<1x64xf32>
    %55 = arith.maximumf %53, %54 : vector<1x64xf32>
    %56 = vector.extract_strided_slice %52 {offsets = [1, 0], sizes = [1, 64], strides = [1, 1]} : vector<8x64xf32> to vector<1x64xf32>
    %57 = arith.maximumf %55, %56 : vector<1x64xf32>
    %c0_19 = arith.constant 0 : index
    %c13 = arith.constant 13 : index
    %c0_20 = arith.constant 0 : index
    %58 = vector.load %arg4[%c0_19, %c13, %c0_20] : memref<1x36x64xf32, #tpu.memory_space<vmem>>, vector<1x1x64xf32>
    %59 = vector.shape_cast %58 : vector<1x1x64xf32> to vector<1x64xf32>
    %60 = vector.shape_cast %57 : vector<1x64xf32> to vector<1x1x64xf32>
    tpu.vector_store %arg4[%c0_19, %c13, %c0_20], %60 {strides = array<i32>} : memref<1x36x64xf32, #tpu.memory_space<vmem>>, vector<1x1x64xf32>,
    %61 = vector.extract_strided_slice %52 {offsets = [1, 0], sizes = [1, 64], strides = [1, 1]} : vector<8x64xf32> to vector<1x64xf32>
    %62 = vector.extract_strided_slice %52 {offsets = [2, 0], sizes = [1, 64], strides = [1, 1]} : vector<8x64xf32> to vector<1x64xf32>
    %63 = arith.maximumf %61, %62 : vector<1x64xf32>
    %64 = vector.extract_strided_slice %52 {offsets = [3, 0], sizes = [1, 64], strides = [1, 1]} : vector<8x64xf32> to vector<1x64xf32>
    %65 = arith.maximumf %63, %64 : vector<1x64xf32>
    %c0_21 = arith.constant 0 : index
    %c14 = arith.constant 14 : index
    %c0_22 = arith.constant 0 : index
    %66 = vector.load %arg4[%c0_21, %c14, %c0_22] : memref<1x36x64xf32, #tpu.memory_space<vmem>>, vector<1x1x64xf32>
    %67 = vector.shape_cast %66 : vector<1x1x64xf32> to vector<1x64xf32>
    %68 = vector.shape_cast %65 : vector<1x64xf32> to vector<1x1x64xf32>
    tpu.vector_store %arg4[%c0_21, %c14, %c0_22], %68 {strides = array<i32>} : memref<1x36x64xf32, #tpu.memory_space<vmem>>, vector<1x1x64xf32>,
    %69 = vector.extract_strided_slice %52 {offsets = [3, 0], sizes = [1, 64], strides = [1, 1]} : vector<8x64xf32> to vector<1x64xf32>
    %70 = vector.extract_strided_slice %52 {offsets = [4, 0], sizes = [1, 64], strides = [1, 1]} : vector<8x64xf32> to vector<1x64xf32>
    %71 = arith.maximumf %69, %70 : vector<1x64xf32>
    %72 = vector.extract_strided_slice %52 {offsets = [5, 0], sizes = [1, 64], strides = [1, 1]} : vector<8x64xf32> to vector<1x64xf32>
    %73 = arith.maximumf %71, %72 : vector<1x64xf32>
    %c0_23 = arith.constant 0 : index
    %c15 = arith.constant 15 : index
    %c0_24 = arith.constant 0 : index
    %74 = vector.load %arg4[%c0_23, %c15, %c0_24] : memref<1x36x64xf32, #tpu.memory_space<vmem>>, vector<1x1x64xf32>
    %75 = vector.shape_cast %74 : vector<1x1x64xf32> to vector<1x64xf32>
    %76 = vector.shape_cast %73 : vector<1x64xf32> to vector<1x1x64xf32>
    tpu.vector_store %arg4[%c0_23, %c15, %c0_24], %76 {strides = array<i32>} : memref<1x36x64xf32, #tpu.memory_space<vmem>>, vector<1x1x64xf32>,
    %77 = vector.extract_strided_slice %52 {offsets = [5, 0], sizes = [1, 64], strides = [1, 1]} : vector<8x64xf32> to vector<1x64xf32>
    %78 = vector.extract_strided_slice %52 {offsets = [6, 0], sizes = [1, 64], strides = [1, 1]} : vector<8x64xf32> to vector<1x64xf32>
    %79 = arith.maximumf %77, %78 : vector<1x64xf32>
    %80 = vector.extract_strided_slice %52 {offsets = [7, 0], sizes = [1, 64], strides = [1, 1]} : vector<8x64xf32> to vector<1x64xf32>
    %81 = arith.maximumf %79, %80 : vector<1x64xf32>
    %c0_25 = arith.constant 0 : index
    %c16 = arith.constant 16 : index
    %c0_26 = arith.constant 0 : index
    %82 = vector.load %arg4[%c0_25, %c16, %c0_26] : memref<1x36x64xf32, #tpu.memory_space<vmem>>, vector<1x1x64xf32>
    %83 = vector.shape_cast %82 : vector<1x1x64xf32> to vector<1x64xf32>
    %84 = vector.shape_cast %81 : vector<1x64xf32> to vector<1x1x64xf32>
    tpu.vector_store %arg4[%c0_25, %c16, %c0_26], %84 {strides = array<i32>} : memref<1x36x64xf32, #tpu.memory_space<vmem>>, vector<1x1x64xf32>,
    %85 = vector.extract_strided_slice %8 {offsets = [24, 0], sizes = [8, 64], strides = [1, 1]} : vector<64x64xf32> to vector<8x64xf32>
    %86 = vector.extract_strided_slice %8 {offsets = [32, 0], sizes = [8, 64], strides = [1, 1]} : vector<64x64xf32> to vector<8x64xf32>
    %87 = arith.maximumf %85, %86 : vector<8x64xf32>
    %88 = vector.extract_strided_slice %8 {offsets = [40, 0], sizes = [8, 64], strides = [1, 1]} : vector<64x64xf32> to vector<8x64xf32>
    %89 = arith.maximumf %87, %88 : vector<8x64xf32>
    %90 = vector.extract_strided_slice %89 {offsets = [0, 0], sizes = [1, 64], strides = [1, 1]} : vector<8x64xf32> to vector<1x64xf32>
    %91 = vector.extract_strided_slice %89 {offsets = [0, 0], sizes = [1, 64], strides = [1, 1]} : vector<8x64xf32> to vector<1x64xf32>
    %92 = arith.maximumf %90, %91 : vector<1x64xf32>
    %93 = vector.extract_strided_slice %89 {offsets = [1, 0], sizes = [1, 64], strides = [1, 1]} : vector<8x64xf32> to vector<1x64xf32>
    %94 = arith.maximumf %92, %93 : vector<1x64xf32>
    %c0_27 = arith.constant 0 : index
    %c19 = arith.constant 19 : index
    %c0_28 = arith.constant 0 : index
    %95 = vector.load %arg4[%c0_27, %c19, %c0_28] : memref<1x36x64xf32, #tpu.memory_space<vmem>>, vector<1x1x64xf32>
    %96 = vector.shape_cast %95 : vector<1x1x64xf32> to vector<1x64xf32>
    %97 = vector.shape_cast %94 : vector<1x64xf32> to vector<1x1x64xf32>
    tpu.vector_store %arg4[%c0_27, %c19, %c0_28], %97 {strides = array<i32>} : memref<1x36x64xf32, #tpu.memory_space<vmem>>, vector<1x1x64xf32>,
    %98 = vector.extract_strided_slice %89 {offsets = [1, 0], sizes = [1, 64], strides = [1, 1]} : vector<8x64xf32> to vector<1x64xf32>
    %99 = vector.extract_strided_slice %89 {offsets = [2, 0], sizes = [1, 64], strides = [1, 1]} : vector<8x64xf32> to vector<1x64xf32>
    %100 = arith.maximumf %98, %99 : vector<1x64xf32>
    %101 = vector.extract_strided_slice %89 {offsets = [3, 0], sizes = [1, 64], strides = [1, 1]} : vector<8x64xf32> to vector<1x64xf32>
    %102 = arith.maximumf %100, %101 : vector<1x64xf32>
    %c0_29 = arith.constant 0 : index
    %c20 = arith.constant 20 : index
    %c0_30 = arith.constant 0 : index
    %103 = vector.load %arg4[%c0_29, %c20, %c0_30] : memref<1x36x64xf32, #tpu.memory_space<vmem>>, vector<1x1x64xf32>
    %104 = vector.shape_cast %103 : vector<1x1x64xf32> to vector<1x64xf32>
    %105 = vector.shape_cast %102 : vector<1x64xf32> to vector<1x1x64xf32>
    tpu.vector_store %arg4[%c0_29, %c20, %c0_30], %105 {strides = array<i32>} : memref<1x36x64xf32, #tpu.memory_space<vmem>>, vector<1x1x64xf32>,
    %106 = vector.extract_strided_slice %89 {offsets = [3, 0], sizes = [1, 64], strides = [1, 1]} : vector<8x64xf32> to vector<1x64xf32>
    %107 = vector.extract_strided_slice %89 {offsets = [4, 0], sizes = [1, 64], strides = [1, 1]} : vector<8x64xf32> to vector<1x64xf32>
    %108 = arith.maximumf %106, %107 : vector<1x64xf32>
    %109 = vector.extract_strided_slice %89 {offsets = [5, 0], sizes = [1, 64], strides = [1, 1]} : vector<8x64xf32> to vector<1x64xf32>
    %110 = arith.maximumf %108, %109 : vector<1x64xf32>
    %c0_31 = arith.constant 0 : index
    %c21 = arith.constant 21 : index
    %c0_32 = arith.constant 0 : index
    %111 = vector.load %arg4[%c0_31, %c21, %c0_32] : memref<1x36x64xf32, #tpu.memory_space<vmem>>, vector<1x1x64xf32>
    %112 = vector.shape_cast %111 : vector<1x1x64xf32> to vector<1x64xf32>
    %113 = vector.shape_cast %110 : vector<1x64xf32> to vector<1x1x64xf32>
    tpu.vector_store %arg4[%c0_31, %c21, %c0_32], %113 {strides = array<i32>} : memref<1x36x64xf32, #tpu.memory_space<vmem>>, vector<1x1x64xf32>,
    %114 = vector.extract_strided_slice %89 {offsets = [5, 0], sizes = [1, 64], strides = [1, 1]} : vector<8x64xf32> to vector<1x64xf32>
    %115 = vector.extract_strided_slice %89 {offsets = [6, 0], sizes = [1, 64], strides = [1, 1]} : vector<8x64xf32> to vector<1x64xf32>
    %116 = arith.maximumf %114, %115 : vector<1x64xf32>
    %117 = vector.extract_strided_slice %89 {offsets = [7, 0], sizes = [1, 64], strides = [1, 1]} : vector<8x64xf32> to vector<1x64xf32>
    %118 = arith.maximumf %116, %117 : vector<1x64xf32>
    %c0_33 = arith.constant 0 : index
    %c22 = arith.constant 22 : index
    %c0_34 = arith.constant 0 : index
    %119 = vector.load %arg4[%c0_33, %c22, %c0_34] : memref<1x36x64xf32, #tpu.memory_space<vmem>>, vector<1x1x64xf32>
    %120 = vector.shape_cast %119 : vector<1x1x64xf32> to vector<1x64xf32>
    %121 = vector.shape_cast %118 : vector<1x64xf32> to vector<1x1x64xf32>
    tpu.vector_store %arg4[%c0_33, %c22, %c0_34], %121 {strides = array<i32>} : memref<1x36x64xf32, #tpu.memory_space<vmem>>, vector<1x1x64xf32>,
    %122 = vector.extract_strided_slice %8 {offsets = [40, 0], sizes = [8, 64], strides = [1, 1]} : vector<64x64xf32> to vector<8x64xf32>
    %123 = vector.extract_strided_slice %8 {offsets = [48, 0], sizes = [8, 64], strides = [1, 1]} : vector<64x64xf32> to vector<8x64xf32>
    %124 = arith.maximumf %122, %123 : vector<8x64xf32>
    %125 = vector.extract_strided_slice %8 {offsets = [56, 0], sizes = [8, 64], strides = [1, 1]} : vector<64x64xf32> to vector<8x64xf32>
    %126 = arith.maximumf %124, %125 : vector<8x64xf32>
    %127 = vector.extract_strided_slice %126 {offsets = [0, 0], sizes = [1, 64], strides = [1, 1]} : vector<8x64xf32> to vector<1x64xf32>
    %128 = vector.extract_strided_slice %126 {offsets = [0, 0], sizes = [1, 64], strides = [1, 1]} : vector<8x64xf32> to vector<1x64xf32>
    %129 = arith.maximumf %127, %128 : vector<1x64xf32>
    %130 = vector.extract_strided_slice %126 {offsets = [1, 0], sizes = [1, 64], strides = [1, 1]} : vector<8x64xf32> to vector<1x64xf32>
    %131 = arith.maximumf %129, %130 : vector<1x64xf32>
    %c0_35 = arith.constant 0 : index
    %c25 = arith.constant 25 : index
    %c0_36 = arith.constant 0 : index
    %132 = vector.load %arg4[%c0_35, %c25, %c0_36] : memref<1x36x64xf32, #tpu.memory_space<vmem>>, vector<1x1x64xf32>
    %133 = vector.shape_cast %132 : vector<1x1x64xf32> to vector<1x64xf32>
    %134 = vector.shape_cast %131 : vector<1x64xf32> to vector<1x1x64xf32>
    tpu.vector_store %arg4[%c0_35, %c25, %c0_36], %134 {strides = array<i32>} : memref<1x36x64xf32, #tpu.memory_space<vmem>>, vector<1x1x64xf32>,
    %135 = vector.extract_strided_slice %126 {offsets = [1, 0], sizes = [1, 64], strides = [1, 1]} : vector<8x64xf32> to vector<1x64xf32>
    %136 = vector.extract_strided_slice %126 {offsets = [2, 0], sizes = [1, 64], strides = [1, 1]} : vector<8x64xf32> to vector<1x64xf32>
    %137 = arith.maximumf %135, %136 : vector<1x64xf32>
    %138 = vector.extract_strided_slice %126 {offsets = [3, 0], sizes = [1, 64], strides = [1, 1]} : vector<8x64xf32> to vector<1x64xf32>
    %139 = arith.maximumf %137, %138 : vector<1x64xf32>
    %c0_37 = arith.constant 0 : index
    %c26 = arith.constant 26 : index
    %c0_38 = arith.constant 0 : index
    %140 = vector.load %arg4[%c0_37, %c26, %c0_38] : memref<1x36x64xf32, #tpu.memory_space<vmem>>, vector<1x1x64xf32>
    %141 = vector.shape_cast %140 : vector<1x1x64xf32> to vector<1x64xf32>
    %142 = vector.shape_cast %139 : vector<1x64xf32> to vector<1x1x64xf32>
    tpu.vector_store %arg4[%c0_37, %c26, %c0_38], %142 {strides = array<i32>} : memref<1x36x64xf32, #tpu.memory_space<vmem>>, vector<1x1x64xf32>,
    %143 = vector.extract_strided_slice %126 {offsets = [3, 0], sizes = [1, 64], strides = [1, 1]} : vector<8x64xf32> to vector<1x64xf32>
    %144 = vector.extract_strided_slice %126 {offsets = [4, 0], sizes = [1, 64], strides = [1, 1]} : vector<8x64xf32> to vector<1x64xf32>
    %145 = arith.maximumf %143, %144 : vector<1x64xf32>
    %146 = vector.extract_strided_slice %126 {offsets = [5, 0], sizes = [1, 64], strides = [1, 1]} : vector<8x64xf32> to vector<1x64xf32>
    %147 = arith.maximumf %145, %146 : vector<1x64xf32>
    %c0_39 = arith.constant 0 : index
    %c27 = arith.constant 27 : index
    %c0_40 = arith.constant 0 : index
    %148 = vector.load %arg4[%c0_39, %c27, %c0_40] : memref<1x36x64xf32, #tpu.memory_space<vmem>>, vector<1x1x64xf32>
    %149 = vector.shape_cast %148 : vector<1x1x64xf32> to vector<1x64xf32>
    %150 = vector.shape_cast %147 : vector<1x64xf32> to vector<1x1x64xf32>
    tpu.vector_store %arg4[%c0_39, %c27, %c0_40], %150 {strides = array<i32>} : memref<1x36x64xf32, #tpu.memory_space<vmem>>, vector<1x1x64xf32>,
    %151 = vector.extract_strided_slice %126 {offsets = [5, 0], sizes = [1, 64], strides = [1, 1]} : vector<8x64xf32> to vector<1x64xf32>
    %152 = vector.extract_strided_slice %126 {offsets = [6, 0], sizes = [1, 64], strides = [1, 1]} : vector<8x64xf32> to vector<1x64xf32>
    %153 = arith.maximumf %151, %152 : vector<1x64xf32>
    %154 = vector.extract_strided_slice %126 {offsets = [7, 0], sizes = [1, 64], strides = [1, 1]} : vector<8x64xf32> to vector<1x64xf32>
    %155 = arith.maximumf %153, %154 : vector<1x64xf32>
    %c0_41 = arith.constant 0 : index
    %c28 = arith.constant 28 : index
    %c0_42 = arith.constant 0 : index
    %156 = vector.load %arg4[%c0_41, %c28, %c0_42] : memref<1x36x64xf32, #tpu.memory_space<vmem>>, vector<1x1x64xf32>
    %157 = vector.shape_cast %156 : vector<1x1x64xf32> to vector<1x64xf32>
    %158 = vector.shape_cast %155 : vector<1x64xf32> to vector<1x1x64xf32>
    tpu.vector_store %arg4[%c0_41, %c28, %c0_42], %158 {strides = array<i32>} : memref<1x36x64xf32, #tpu.memory_space<vmem>>, vector<1x1x64xf32>,
    return
  }
  func.func @transform_0(%arg0: i32) -> (i32, i32, i32) {
    %c0_i32 = arith.constant 0 : i32
    %c0_i32_0 = arith.constant 0 : i32
    %c0_i32_1 = arith.constant 0 : i32
    return %arg0, %c0_i32, %c0_i32_0 : i32, i32, i32
  }
  func.func @transform_1(%arg0: i32) -> (i32, i32) {
    %c0_i32 = arith.constant 0 : i32
    %c0_i32_0 = arith.constant 0 : i32
    %c0_i32_1 = arith.constant 0 : i32
    return %c0_i32, %c0_i32_0 : i32, i32
  }
  func.func @transform_2(%arg0: i32) -> (i32, i32) {
    %c0_i32 = arith.constant 0 : i32
    %c0_i32_0 = arith.constant 0 : i32
    %c0_i32_1 = arith.constant 0 : i32
    return %c0_i32, %c0_i32_0 : i32, i32
  }
  func.func @transform_3(%arg0: i32) -> (i32, i32, i32) {
    %c0_i32 = arith.constant 0 : i32
    %c0_i32_0 = arith.constant 0 : i32
    %c0_i32_1 = arith.constant 0 : i32
    return %arg0, %c0_i32, %c0_i32_0 : i32, i32, i32
  }
}

module attributes {stable_mosaic.version = 11 : i64} {
  func.func @_layer1_kernel(%arg0: i32, %arg1: memref<1x36x64xf32, #tpu.memory_space<vmem>>, %arg2: memref<3x2x9x64x64xbf16, #tpu.memory_space<vmem>>, %arg3: memref<3x2x1x64xf32, #tpu.memory_space<vmem>>, %arg4: memref<22x64xf32, #tpu.memory_space<vmem>>, %arg5: memref<1x36x64xf32, #tpu.memory_space<vmem>>, %arg6: memref<36x64xf32, #tpu.memory_space<vmem>>, %arg7: memref<36x64xf32, #tpu.memory_space<vmem>>) attributes {dimension_semantics = [#tpu.dimension_semantics<parallel>], iteration_bounds = array<i64: 2>, scalar_prefetch = 0 : i64, scratch_operands = 2 : i64, tpu.core_type = #tpu.core_type<tc>, window_params = [{transform_indices = @transform_0, window_bounds = array<i64: 1, 36, 64>}, {pipeline_mode = #tpu.pipeline_mode<synchronous>, transform_indices = @transform_1, window_bounds = array<i64: 3, 2, 9, 64, 64>}, {pipeline_mode = #tpu.pipeline_mode<synchronous>, transform_indices = @transform_2, window_bounds = array<i64: 3, 2, 1, 64>}, {pipeline_mode = #tpu.pipeline_mode<synchronous>, transform_indices = @transform_3, window_bounds = array<i64: 22, 64>}, {transform_indices = @transform_4, window_bounds = array<i64: 1, 36, 64>}]} {
    %c0 = arith.constant 0 : index
    %c0_0 = arith.constant 0 : index
    %c0_1 = arith.constant 0 : index
    %0 = vector.load %arg1[%c0, %c0_0, %c0_1] : memref<1x36x64xf32, #tpu.memory_space<vmem>>, vector<1x36x64xf32>
    %1 = vector.shape_cast %0 : vector<1x36x64xf32> to vector<36x64xf32>
    %c0_2 = arith.constant 0 : index
    %c0_3 = arith.constant 0 : index
    %2 = vector.load %arg6[%c0_2, %c0_3] : memref<36x64xf32, #tpu.memory_space<vmem>>, vector<36x64xf32>
    tpu.vector_store %arg6[%c0_2, %c0_3], %1 {strides = array<i32>} : memref<36x64xf32, #tpu.memory_space<vmem>>, vector<36x64xf32>,
    %cst = arith.constant 0.000000e+00 : f32
    %3 = vector.broadcast %cst : f32 to vector<36x64xf32>
    %c0_4 = arith.constant 0 : index
    %c0_5 = arith.constant 0 : index
    %4 = vector.load %arg7[%c0_4, %c0_5] : memref<36x64xf32, #tpu.memory_space<vmem>>, vector<36x64xf32>
    tpu.vector_store %arg7[%c0_4, %c0_5], %3 {strides = array<i32>} : memref<36x64xf32, #tpu.memory_space<vmem>>, vector<36x64xf32>,
    %c0_6 = arith.constant 0 : index
    %c0_7 = arith.constant 0 : index
    %5 = vector.load %arg4[%c0_6, %c0_7] : memref<22x64xf32, #tpu.memory_space<vmem>>, vector<22x64xf32>
    %c0_8 = arith.constant 0 : index
    %c0_9 = arith.constant 0 : index
    %6 = vector.load %arg6[%c0_8, %c0_9] : memref<36x64xf32, #tpu.memory_space<vmem>>, vector<36x64xf32>
    %cst_10 = arith.constant 0.000000e+00 : f32
    %7 = vector.broadcast %cst_10 : f32 to vector<22x64xf32>
    %8 = vector.extract_strided_slice %6 {offsets = [0, 0], sizes = [22, 64], strides = [1, 1]} : vector<36x64xf32> to vector<22x64xf32>
    %9 = arith.truncf %8 : vector<22x64xf32> to vector<22x64xbf16>
    %c0_11 = arith.constant 0 : index
    %c0_12 = arith.constant 0 : index
    %c0_13 = arith.constant 0 : index
    %c0_14 = arith.constant 0 : index
    %c0_15 = arith.constant 0 : index
    %10 = vector.load %arg2[%c0_11, %c0_12, %c0_13, %c0_14, %c0_15] : memref<3x2x9x64x64xbf16, #tpu.memory_space<vmem>>, vector<1x1x1x64x64xbf16>
    %11 = vector.shape_cast %10 : vector<1x1x1x64x64xbf16> to vector<64x64xbf16>
    %cst_16 = arith.constant dense<0.000000e+00> : vector<22x64xf32>
    %12 = tpu.matmul %9, %11, %cst_16 {dimension_numbers = #tpu.dot_dimension_numbers<[1], [0], [0], [1], [0, 0, 1, 1], [], []>} : vector<22x64xbf16>, vector<64x64xbf16>, vector<22x64xf32> -> vector<22x64xf32>
    %13 = arith.addf %7, %12 : vector<22x64xf32>
    %14 = vector.extract_strided_slice %6 {offsets = [1, 0], sizes = [22, 64], strides = [1, 1]} : vector<36x64xf32> to vector<22x64xf32>
    %15 = arith.truncf %14 : vector<22x64xf32> to vector<22x64xbf16>
    %c0_17 = arith.constant 0 : index
    %c0_18 = arith.constant 0 : index
    %c1 = arith.constant 1 : index
    %c0_19 = arith.constant 0 : index
    %c0_20 = arith.constant 0 : index
    %16 = vector.load %arg2[%c0_17, %c0_18, %c1, %c0_19, %c0_20] : memref<3x2x9x64x64xbf16, #tpu.memory_space<vmem>>, vector<1x1x1x64x64xbf16>
    %17 = vector.shape_cast %16 : vector<1x1x1x64x64xbf16> to vector<64x64xbf16>
    %cst_21 = arith.constant dense<0.000000e+00> : vector<22x64xf32>
    %18 = tpu.matmul %15, %17, %cst_21 {dimension_numbers = #tpu.dot_dimension_numbers<[1], [0], [0], [1], [0, 0, 1, 1], [], []>} : vector<22x64xbf16>, vector<64x64xbf16>, vector<22x64xf32> -> vector<22x64xf32>
    %19 = arith.addf %13, %18 : vector<22x64xf32>
    %20 = vector.extract_strided_slice %6 {offsets = [2, 0], sizes = [22, 64], strides = [1, 1]} : vector<36x64xf32> to vector<22x64xf32>
    %21 = arith.truncf %20 : vector<22x64xf32> to vector<22x64xbf16>
    %c0_22 = arith.constant 0 : index
    %c0_23 = arith.constant 0 : index
    %c2 = arith.constant 2 : index
    %c0_24 = arith.constant 0 : index
    %c0_25 = arith.constant 0 : index
    %22 = vector.load %arg2[%c0_22, %c0_23, %c2, %c0_24, %c0_25] : memref<3x2x9x64x64xbf16, #tpu.memory_space<vmem>>, vector<1x1x1x64x64xbf16>
    %23 = vector.shape_cast %22 : vector<1x1x1x64x64xbf16> to vector<64x64xbf16>
    %cst_26 = arith.constant dense<0.000000e+00> : vector<22x64xf32>
    %24 = tpu.matmul %21, %23, %cst_26 {dimension_numbers = #tpu.dot_dimension_numbers<[1], [0], [0], [1], [0, 0, 1, 1], [], []>} : vector<22x64xbf16>, vector<64x64xbf16>, vector<22x64xf32> -> vector<22x64xf32>
    %25 = arith.addf %19, %24 : vector<22x64xf32>
    %26 = vector.extract_strided_slice %6 {offsets = [6, 0], sizes = [22, 64], strides = [1, 1]} : vector<36x64xf32> to vector<22x64xf32>
    %27 = arith.truncf %26 : vector<22x64xf32> to vector<22x64xbf16>
    %c0_27 = arith.constant 0 : index
    %c0_28 = arith.constant 0 : index
    %c3 = arith.constant 3 : index
    %c0_29 = arith.constant 0 : index
    %c0_30 = arith.constant 0 : index
    %28 = vector.load %arg2[%c0_27, %c0_28, %c3, %c0_29, %c0_30] : memref<3x2x9x64x64xbf16, #tpu.memory_space<vmem>>, vector<1x1x1x64x64xbf16>
    %29 = vector.shape_cast %28 : vector<1x1x1x64x64xbf16> to vector<64x64xbf16>
    %cst_31 = arith.constant dense<0.000000e+00> : vector<22x64xf32>
    %30 = tpu.matmul %27, %29, %cst_31 {dimension_numbers = #tpu.dot_dimension_numbers<[1], [0], [0], [1], [0, 0, 1, 1], [], []>} : vector<22x64xbf16>, vector<64x64xbf16>, vector<22x64xf32> -> vector<22x64xf32>
    %31 = arith.addf %25, %30 : vector<22x64xf32>
    %32 = vector.extract_strided_slice %6 {offsets = [7, 0], sizes = [22, 64], strides = [1, 1]} : vector<36x64xf32> to vector<22x64xf32>
    %33 = arith.truncf %32 : vector<22x64xf32> to vector<22x64xbf16>
    %c0_32 = arith.constant 0 : index
    %c0_33 = arith.constant 0 : index
    %c4 = arith.constant 4 : index
    %c0_34 = arith.constant 0 : index
    %c0_35 = arith.constant 0 : index
    %34 = vector.load %arg2[%c0_32, %c0_33, %c4, %c0_34, %c0_35] : memref<3x2x9x64x64xbf16, #tpu.memory_space<vmem>>, vector<1x1x1x64x64xbf16>
    %35 = vector.shape_cast %34 : vector<1x1x1x64x64xbf16> to vector<64x64xbf16>
    %cst_36 = arith.constant dense<0.000000e+00> : vector<22x64xf32>
    %36 = tpu.matmul %33, %35, %cst_36 {dimension_numbers = #tpu.dot_dimension_numbers<[1], [0], [0], [1], [0, 0, 1, 1], [], []>} : vector<22x64xbf16>, vector<64x64xbf16>, vector<22x64xf32> -> vector<22x64xf32>
    %37 = arith.addf %31, %36 : vector<22x64xf32>
    %38 = vector.extract_strided_slice %6 {offsets = [8, 0], sizes = [22, 64], strides = [1, 1]} : vector<36x64xf32> to vector<22x64xf32>
    %39 = arith.truncf %38 : vector<22x64xf32> to vector<22x64xbf16>
    %c0_37 = arith.constant 0 : index
    %c0_38 = arith.constant 0 : index
    %c5 = arith.constant 5 : index
    %c0_39 = arith.constant 0 : index
    %c0_40 = arith.constant 0 : index
    %40 = vector.load %arg2[%c0_37, %c0_38, %c5, %c0_39, %c0_40] : memref<3x2x9x64x64xbf16, #tpu.memory_space<vmem>>, vector<1x1x1x64x64xbf16>
    %41 = vector.shape_cast %40 : vector<1x1x1x64x64xbf16> to vector<64x64xbf16>
    %cst_41 = arith.constant dense<0.000000e+00> : vector<22x64xf32>
    %42 = tpu.matmul %39, %41, %cst_41 {dimension_numbers = #tpu.dot_dimension_numbers<[1], [0], [0], [1], [0, 0, 1, 1], [], []>} : vector<22x64xbf16>, vector<64x64xbf16>, vector<22x64xf32> -> vector<22x64xf32>
    %43 = arith.addf %37, %42 : vector<22x64xf32>
    %44 = vector.extract_strided_slice %6 {offsets = [12, 0], sizes = [22, 64], strides = [1, 1]} : vector<36x64xf32> to vector<22x64xf32>
    %45 = arith.truncf %44 : vector<22x64xf32> to vector<22x64xbf16>
    %c0_42 = arith.constant 0 : index
    %c0_43 = arith.constant 0 : index
    %c6 = arith.constant 6 : index
    %c0_44 = arith.constant 0 : index
    %c0_45 = arith.constant 0 : index
    %46 = vector.load %arg2[%c0_42, %c0_43, %c6, %c0_44, %c0_45] : memref<3x2x9x64x64xbf16, #tpu.memory_space<vmem>>, vector<1x1x1x64x64xbf16>
    %47 = vector.shape_cast %46 : vector<1x1x1x64x64xbf16> to vector<64x64xbf16>
    %cst_46 = arith.constant dense<0.000000e+00> : vector<22x64xf32>
    %48 = tpu.matmul %45, %47, %cst_46 {dimension_numbers = #tpu.dot_dimension_numbers<[1], [0], [0], [1], [0, 0, 1, 1], [], []>} : vector<22x64xbf16>, vector<64x64xbf16>, vector<22x64xf32> -> vector<22x64xf32>
    %49 = arith.addf %43, %48 : vector<22x64xf32>
    %50 = vector.extract_strided_slice %6 {offsets = [13, 0], sizes = [22, 64], strides = [1, 1]} : vector<36x64xf32> to vector<22x64xf32>
    %51 = arith.truncf %50 : vector<22x64xf32> to vector<22x64xbf16>
    %c0_47 = arith.constant 0 : index
    %c0_48 = arith.constant 0 : index
    %c7 = arith.constant 7 : index
    %c0_49 = arith.constant 0 : index
    %c0_50 = arith.constant 0 : index
    %52 = vector.load %arg2[%c0_47, %c0_48, %c7, %c0_49, %c0_50] : memref<3x2x9x64x64xbf16, #tpu.memory_space<vmem>>, vector<1x1x1x64x64xbf16>
    %53 = vector.shape_cast %52 : vector<1x1x1x64x64xbf16> to vector<64x64xbf16>
    %cst_51 = arith.constant dense<0.000000e+00> : vector<22x64xf32>
    %54 = tpu.matmul %51, %53, %cst_51 {dimension_numbers = #tpu.dot_dimension_numbers<[1], [0], [0], [1], [0, 0, 1, 1], [], []>} : vector<22x64xbf16>, vector<64x64xbf16>, vector<22x64xf32> -> vector<22x64xf32>
    %55 = arith.addf %49, %54 : vector<22x64xf32>
    %56 = vector.extract_strided_slice %6 {offsets = [14, 0], sizes = [22, 64], strides = [1, 1]} : vector<36x64xf32> to vector<22x64xf32>
    %57 = arith.truncf %56 : vector<22x64xf32> to vector<22x64xbf16>
    %c0_52 = arith.constant 0 : index
    %c0_53 = arith.constant 0 : index
    %c8 = arith.constant 8 : index
    %c0_54 = arith.constant 0 : index
    %c0_55 = arith.constant 0 : index
    %58 = vector.load %arg2[%c0_52, %c0_53, %c8, %c0_54, %c0_55] : memref<3x2x9x64x64xbf16, #tpu.memory_space<vmem>>, vector<1x1x1x64x64xbf16>
    %59 = vector.shape_cast %58 : vector<1x1x1x64x64xbf16> to vector<64x64xbf16>
    %cst_56 = arith.constant dense<0.000000e+00> : vector<22x64xf32>
    %60 = tpu.matmul %57, %59, %cst_56 {dimension_numbers = #tpu.dot_dimension_numbers<[1], [0], [0], [1], [0, 0, 1, 1], [], []>} : vector<22x64xbf16>, vector<64x64xbf16>, vector<22x64xf32> -> vector<22x64xf32>
    %61 = arith.addf %55, %60 : vector<22x64xf32>
    %c0_57 = arith.constant 0 : index
    %c0_58 = arith.constant 0 : index
    %c0_59 = arith.constant 0 : index
    %c0_60 = arith.constant 0 : index
    %62 = vector.load %arg3[%c0_57, %c0_58, %c0_59, %c0_60] : memref<3x2x1x64xf32, #tpu.memory_space<vmem>>, vector<1x1x1x64xf32>
    %63 = vector.shape_cast %62 : vector<1x1x1x64xf32> to vector<1x64xf32>
    %64 = vector.broadcast %63 : vector<1x64xf32> to vector<22x64xf32>
    %65 = arith.addf %61, %64 : vector<22x64xf32>
    %cst_61 = arith.constant 0.000000e+00 : f32
    %66 = vector.broadcast %cst_61 : f32 to vector<22x64xf32>
    %67 = arith.maximumf %65, %66 : vector<22x64xf32>
    %68 = arith.mulf %67, %5 : vector<22x64xf32>
    %c7_62 = arith.constant 7 : index
    %c0_63 = arith.constant 0 : index
    %69 = vector.load %arg7[%c7_62, %c0_63] : memref<36x64xf32, #tpu.memory_space<vmem>>, vector<22x64xf32>
    tpu.vector_store %arg7[%c7_62, %c0_63], %68 {strides = array<i32>} : memref<36x64xf32, #tpu.memory_space<vmem>>, vector<22x64xf32>,
    %c0_64 = arith.constant 0 : index
    %c0_65 = arith.constant 0 : index
    %70 = vector.load %arg7[%c0_64, %c0_65] : memref<36x64xf32, #tpu.memory_space<vmem>>, vector<36x64xf32>
    %71 = vector.extract_strided_slice %6 {offsets = [7, 0], sizes = [22, 64], strides = [1, 1]} : vector<36x64xf32> to vector<22x64xf32>
    %cst_66 = arith.constant 0.000000e+00 : f32
    %72 = vector.broadcast %cst_66 : f32 to vector<22x64xf32>
    %73 = vector.extract_strided_slice %70 {offsets = [0, 0], sizes = [22, 64], strides = [1, 1]} : vector<36x64xf32> to vector<22x64xf32>
    %74 = arith.truncf %73 : vector<22x64xf32> to vector<22x64xbf16>
    %c0_67 = arith.constant 0 : index
    %c1_68 = arith.constant 1 : index
    %c0_69 = arith.constant 0 : index
    %c0_70 = arith.constant 0 : index
    %c0_71 = arith.constant 0 : index
    %75 = vector.load %arg2[%c0_67, %c1_68, %c0_69, %c0_70, %c0_71] : memref<3x2x9x64x64xbf16, #tpu.memory_space<vmem>>, vector<1x1x1x64x64xbf16>
    %76 = vector.shape_cast %75 : vector<1x1x1x64x64xbf16> to vector<64x64xbf16>
    %cst_72 = arith.constant dense<0.000000e+00> : vector<22x64xf32>
    %77 = tpu.matmul %74, %76, %cst_72 {dimension_numbers = #tpu.dot_dimension_numbers<[1], [0], [0], [1], [0, 0, 1, 1], [], []>} : vector<22x64xbf16>, vector<64x64xbf16>, vector<22x64xf32> -> vector<22x64xf32>
    %78 = arith.addf %72, %77 : vector<22x64xf32>
    %79 = vector.extract_strided_slice %70 {offsets = [1, 0], sizes = [22, 64], strides = [1, 1]} : vector<36x64xf32> to vector<22x64xf32>
    %80 = arith.truncf %79 : vector<22x64xf32> to vector<22x64xbf16>
    %c0_73 = arith.constant 0 : index
    %c1_74 = arith.constant 1 : index
    %c1_75 = arith.constant 1 : index
    %c0_76 = arith.constant 0 : index
    %c0_77 = arith.constant 0 : index
    %81 = vector.load %arg2[%c0_73, %c1_74, %c1_75, %c0_76, %c0_77] : memref<3x2x9x64x64xbf16, #tpu.memory_space<vmem>>, vector<1x1x1x64x64xbf16>
    %82 = vector.shape_cast %81 : vector<1x1x1x64x64xbf16> to vector<64x64xbf16>
    %cst_78 = arith.constant dense<0.000000e+00> : vector<22x64xf32>
    %83 = tpu.matmul %80, %82, %cst_78 {dimension_numbers = #tpu.dot_dimension_numbers<[1], [0], [0], [1], [0, 0, 1, 1], [], []>} : vector<22x64xbf16>, vector<64x64xbf16>, vector<22x64xf32> -> vector<22x64xf32>
    %84 = arith.addf %78, %83 : vector<22x64xf32>
    %85 = vector.extract_strided_slice %70 {offsets = [2, 0], sizes = [22, 64], strides = [1, 1]} : vector<36x64xf32> to vector<22x64xf32>
    %86 = arith.truncf %85 : vector<22x64xf32> to vector<22x64xbf16>
    %c0_79 = arith.constant 0 : index
    %c1_80 = arith.constant 1 : index
    %c2_81 = arith.constant 2 : index
    %c0_82 = arith.constant 0 : index
    %c0_83 = arith.constant 0 : index
    %87 = vector.load %arg2[%c0_79, %c1_80, %c2_81, %c0_82, %c0_83] : memref<3x2x9x64x64xbf16, #tpu.memory_space<vmem>>, vector<1x1x1x64x64xbf16>
    %88 = vector.shape_cast %87 : vector<1x1x1x64x64xbf16> to vector<64x64xbf16>
    %cst_84 = arith.constant dense<0.000000e+00> : vector<22x64xf32>
    %89 = tpu.matmul %86, %88, %cst_84 {dimension_numbers = #tpu.dot_dimension_numbers<[1], [0], [0], [1], [0, 0, 1, 1], [], []>} : vector<22x64xbf16>, vector<64x64xbf16>, vector<22x64xf32> -> vector<22x64xf32>
    %90 = arith.addf %84, %89 : vector<22x64xf32>
    %91 = vector.extract_strided_slice %70 {offsets = [6, 0], sizes = [22, 64], strides = [1, 1]} : vector<36x64xf32> to vector<22x64xf32>
    %92 = arith.truncf %91 : vector<22x64xf32> to vector<22x64xbf16>
    %c0_85 = arith.constant 0 : index
    %c1_86 = arith.constant 1 : index
    %c3_87 = arith.constant 3 : index
    %c0_88 = arith.constant 0 : index
    %c0_89 = arith.constant 0 : index
    %93 = vector.load %arg2[%c0_85, %c1_86, %c3_87, %c0_88, %c0_89] : memref<3x2x9x64x64xbf16, #tpu.memory_space<vmem>>, vector<1x1x1x64x64xbf16>
    %94 = vector.shape_cast %93 : vector<1x1x1x64x64xbf16> to vector<64x64xbf16>
    %cst_90 = arith.constant dense<0.000000e+00> : vector<22x64xf32>
    %95 = tpu.matmul %92, %94, %cst_90 {dimension_numbers = #tpu.dot_dimension_numbers<[1], [0], [0], [1], [0, 0, 1, 1], [], []>} : vector<22x64xbf16>, vector<64x64xbf16>, vector<22x64xf32> -> vector<22x64xf32>
    %96 = arith.addf %90, %95 : vector<22x64xf32>
    %97 = vector.extract_strided_slice %70 {offsets = [7, 0], sizes = [22, 64], strides = [1, 1]} : vector<36x64xf32> to vector<22x64xf32>
    %98 = arith.truncf %97 : vector<22x64xf32> to vector<22x64xbf16>
    %c0_91 = arith.constant 0 : index
    %c1_92 = arith.constant 1 : index
    %c4_93 = arith.constant 4 : index
    %c0_94 = arith.constant 0 : index
    %c0_95 = arith.constant 0 : index
    %99 = vector.load %arg2[%c0_91, %c1_92, %c4_93, %c0_94, %c0_95] : memref<3x2x9x64x64xbf16, #tpu.memory_space<vmem>>, vector<1x1x1x64x64xbf16>
    %100 = vector.shape_cast %99 : vector<1x1x1x64x64xbf16> to vector<64x64xbf16>
    %cst_96 = arith.constant dense<0.000000e+00> : vector<22x64xf32>
    %101 = tpu.matmul %98, %100, %cst_96 {dimension_numbers = #tpu.dot_dimension_numbers<[1], [0], [0], [1], [0, 0, 1, 1], [], []>} : vector<22x64xbf16>, vector<64x64xbf16>, vector<22x64xf32> -> vector<22x64xf32>
    %102 = arith.addf %96, %101 : vector<22x64xf32>
    %103 = vector.extract_strided_slice %70 {offsets = [8, 0], sizes = [22, 64], strides = [1, 1]} : vector<36x64xf32> to vector<22x64xf32>
    %104 = arith.truncf %103 : vector<22x64xf32> to vector<22x64xbf16>
    %c0_97 = arith.constant 0 : index
    %c1_98 = arith.constant 1 : index
    %c5_99 = arith.constant 5 : index
    %c0_100 = arith.constant 0 : index
    %c0_101 = arith.constant 0 : index
    %105 = vector.load %arg2[%c0_97, %c1_98, %c5_99, %c0_100, %c0_101] : memref<3x2x9x64x64xbf16, #tpu.memory_space<vmem>>, vector<1x1x1x64x64xbf16>
    %106 = vector.shape_cast %105 : vector<1x1x1x64x64xbf16> to vector<64x64xbf16>
    %cst_102 = arith.constant dense<0.000000e+00> : vector<22x64xf32>
    %107 = tpu.matmul %104, %106, %cst_102 {dimension_numbers = #tpu.dot_dimension_numbers<[1], [0], [0], [1], [0, 0, 1, 1], [], []>} : vector<22x64xbf16>, vector<64x64xbf16>, vector<22x64xf32> -> vector<22x64xf32>
    %108 = arith.addf %102, %107 : vector<22x64xf32>
    %109 = vector.extract_strided_slice %70 {offsets = [12, 0], sizes = [22, 64], strides = [1, 1]} : vector<36x64xf32> to vector<22x64xf32>
    %110 = arith.truncf %109 : vector<22x64xf32> to vector<22x64xbf16>
    %c0_103 = arith.constant 0 : index
    %c1_104 = arith.constant 1 : index
    %c6_105 = arith.constant 6 : index
    %c0_106 = arith.constant 0 : index
    %c0_107 = arith.constant 0 : index
    %111 = vector.load %arg2[%c0_103, %c1_104, %c6_105, %c0_106, %c0_107] : memref<3x2x9x64x64xbf16, #tpu.memory_space<vmem>>, vector<1x1x1x64x64xbf16>
    %112 = vector.shape_cast %111 : vector<1x1x1x64x64xbf16> to vector<64x64xbf16>
    %cst_108 = arith.constant dense<0.000000e+00> : vector<22x64xf32>
    %113 = tpu.matmul %110, %112, %cst_108 {dimension_numbers = #tpu.dot_dimension_numbers<[1], [0], [0], [1], [0, 0, 1, 1], [], []>} : vector<22x64xbf16>, vector<64x64xbf16>, vector<22x64xf32> -> vector<22x64xf32>
    %114 = arith.addf %108, %113 : vector<22x64xf32>
    %115 = vector.extract_strided_slice %70 {offsets = [13, 0], sizes = [22, 64], strides = [1, 1]} : vector<36x64xf32> to vector<22x64xf32>
    %116 = arith.truncf %115 : vector<22x64xf32> to vector<22x64xbf16>
    %c0_109 = arith.constant 0 : index
    %c1_110 = arith.constant 1 : index
    %c7_111 = arith.constant 7 : index
    %c0_112 = arith.constant 0 : index
    %c0_113 = arith.constant 0 : index
    %117 = vector.load %arg2[%c0_109, %c1_110, %c7_111, %c0_112, %c0_113] : memref<3x2x9x64x64xbf16, #tpu.memory_space<vmem>>, vector<1x1x1x64x64xbf16>
    %118 = vector.shape_cast %117 : vector<1x1x1x64x64xbf16> to vector<64x64xbf16>
    %cst_114 = arith.constant dense<0.000000e+00> : vector<22x64xf32>
    %119 = tpu.matmul %116, %118, %cst_114 {dimension_numbers = #tpu.dot_dimension_numbers<[1], [0], [0], [1], [0, 0, 1, 1], [], []>} : vector<22x64xbf16>, vector<64x64xbf16>, vector<22x64xf32> -> vector<22x64xf32>
    %120 = arith.addf %114, %119 : vector<22x64xf32>
    %121 = vector.extract_strided_slice %70 {offsets = [14, 0], sizes = [22, 64], strides = [1, 1]} : vector<36x64xf32> to vector<22x64xf32>
    %122 = arith.truncf %121 : vector<22x64xf32> to vector<22x64xbf16>
    %c0_115 = arith.constant 0 : index
    %c1_116 = arith.constant 1 : index
    %c8_117 = arith.constant 8 : index
    %c0_118 = arith.constant 0 : index
    %c0_119 = arith.constant 0 : index
    %123 = vector.load %arg2[%c0_115, %c1_116, %c8_117, %c0_118, %c0_119] : memref<3x2x9x64x64xbf16, #tpu.memory_space<vmem>>, vector<1x1x1x64x64xbf16>
    %124 = vector.shape_cast %123 : vector<1x1x1x64x64xbf16> to vector<64x64xbf16>
    %cst_120 = arith.constant dense<0.000000e+00> : vector<22x64xf32>
    %125 = tpu.matmul %122, %124, %cst_120 {dimension_numbers = #tpu.dot_dimension_numbers<[1], [0], [0], [1], [0, 0, 1, 1], [], []>} : vector<22x64xbf16>, vector<64x64xbf16>, vector<22x64xf32> -> vector<22x64xf32>
    %126 = arith.addf %120, %125 : vector<22x64xf32>
    %c0_121 = arith.constant 0 : index
    %c1_122 = arith.constant 1 : index
    %c0_123 = arith.constant 0 : index
    %c0_124 = arith.constant 0 : index
    %127 = vector.load %arg3[%c0_121, %c1_122, %c0_123, %c0_124] : memref<3x2x1x64xf32, #tpu.memory_space<vmem>>, vector<1x1x1x64xf32>
    %128 = vector.shape_cast %127 : vector<1x1x1x64xf32> to vector<1x64xf32>
    %129 = vector.broadcast %128 : vector<1x64xf32> to vector<22x64xf32>
    %130 = arith.addf %126, %129 : vector<22x64xf32>
    %131 = arith.addf %130, %71 : vector<22x64xf32>
    %cst_125 = arith.constant 0.000000e+00 : f32
    %132 = vector.broadcast %cst_125 : f32 to vector<22x64xf32>
    %133 = arith.maximumf %131, %132 : vector<22x64xf32>
    %134 = arith.mulf %133, %5 : vector<22x64xf32>
    %c7_126 = arith.constant 7 : index
    %c0_127 = arith.constant 0 : index
    %135 = vector.load %arg6[%c7_126, %c0_127] : memref<36x64xf32, #tpu.memory_space<vmem>>, vector<22x64xf32>
    tpu.vector_store %arg6[%c7_126, %c0_127], %134 {strides = array<i32>} : memref<36x64xf32, #tpu.memory_space<vmem>>, vector<22x64xf32>,
    %c0_128 = arith.constant 0 : index
    %c0_129 = arith.constant 0 : index
    %136 = vector.load %arg6[%c0_128, %c0_129] : memref<36x64xf32, #tpu.memory_space<vmem>>, vector<36x64xf32>
    %cst_130 = arith.constant 0.000000e+00 : f32
    %137 = vector.broadcast %cst_130 : f32 to vector<22x64xf32>
    %138 = vector.extract_strided_slice %136 {offsets = [0, 0], sizes = [22, 64], strides = [1, 1]} : vector<36x64xf32> to vector<22x64xf32>
    %139 = arith.truncf %138 : vector<22x64xf32> to vector<22x64xbf16>
    %c1_131 = arith.constant 1 : index
    %c0_132 = arith.constant 0 : index
    %c0_133 = arith.constant 0 : index
    %c0_134 = arith.constant 0 : index
    %c0_135 = arith.constant 0 : index
    %140 = vector.load %arg2[%c1_131, %c0_132, %c0_133, %c0_134, %c0_135] : memref<3x2x9x64x64xbf16, #tpu.memory_space<vmem>>, vector<1x1x1x64x64xbf16>
    %141 = vector.shape_cast %140 : vector<1x1x1x64x64xbf16> to vector<64x64xbf16>
    %cst_136 = arith.constant dense<0.000000e+00> : vector<22x64xf32>
    %142 = tpu.matmul %139, %141, %cst_136 {dimension_numbers = #tpu.dot_dimension_numbers<[1], [0], [0], [1], [0, 0, 1, 1], [], []>} : vector<22x64xbf16>, vector<64x64xbf16>, vector<22x64xf32> -> vector<22x64xf32>
    %143 = arith.addf %137, %142 : vector<22x64xf32>
    %144 = vector.extract_strided_slice %136 {offsets = [1, 0], sizes = [22, 64], strides = [1, 1]} : vector<36x64xf32> to vector<22x64xf32>
    %145 = arith.truncf %144 : vector<22x64xf32> to vector<22x64xbf16>
    %c1_137 = arith.constant 1 : index
    %c0_138 = arith.constant 0 : index
    %c1_139 = arith.constant 1 : index
    %c0_140 = arith.constant 0 : index
    %c0_141 = arith.constant 0 : index
    %146 = vector.load %arg2[%c1_137, %c0_138, %c1_139, %c0_140, %c0_141] : memref<3x2x9x64x64xbf16, #tpu.memory_space<vmem>>, vector<1x1x1x64x64xbf16>
    %147 = vector.shape_cast %146 : vector<1x1x1x64x64xbf16> to vector<64x64xbf16>
    %cst_142 = arith.constant dense<0.000000e+00> : vector<22x64xf32>
    %148 = tpu.matmul %145, %147, %cst_142 {dimension_numbers = #tpu.dot_dimension_numbers<[1], [0], [0], [1], [0, 0, 1, 1], [], []>} : vector<22x64xbf16>, vector<64x64xbf16>, vector<22x64xf32> -> vector<22x64xf32>
    %149 = arith.addf %143, %148 : vector<22x64xf32>
    %150 = vector.extract_strided_slice %136 {offsets = [2, 0], sizes = [22, 64], strides = [1, 1]} : vector<36x64xf32> to vector<22x64xf32>
    %151 = arith.truncf %150 : vector<22x64xf32> to vector<22x64xbf16>
    %c1_143 = arith.constant 1 : index
    %c0_144 = arith.constant 0 : index
    %c2_145 = arith.constant 2 : index
    %c0_146 = arith.constant 0 : index
    %c0_147 = arith.constant 0 : index
    %152 = vector.load %arg2[%c1_143, %c0_144, %c2_145, %c0_146, %c0_147] : memref<3x2x9x64x64xbf16, #tpu.memory_space<vmem>>, vector<1x1x1x64x64xbf16>
    %153 = vector.shape_cast %152 : vector<1x1x1x64x64xbf16> to vector<64x64xbf16>
    %cst_148 = arith.constant dense<0.000000e+00> : vector<22x64xf32>
    %154 = tpu.matmul %151, %153, %cst_148 {dimension_numbers = #tpu.dot_dimension_numbers<[1], [0], [0], [1], [0, 0, 1, 1], [], []>} : vector<22x64xbf16>, vector<64x64xbf16>, vector<22x64xf32> -> vector<22x64xf32>
    %155 = arith.addf %149, %154 : vector<22x64xf32>
    %156 = vector.extract_strided_slice %136 {offsets = [6, 0], sizes = [22, 64], strides = [1, 1]} : vector<36x64xf32> to vector<22x64xf32>
    %157 = arith.truncf %156 : vector<22x64xf32> to vector<22x64xbf16>
    %c1_149 = arith.constant 1 : index
    %c0_150 = arith.constant 0 : index
    %c3_151 = arith.constant 3 : index
    %c0_152 = arith.constant 0 : index
    %c0_153 = arith.constant 0 : index
    %158 = vector.load %arg2[%c1_149, %c0_150, %c3_151, %c0_152, %c0_153] : memref<3x2x9x64x64xbf16, #tpu.memory_space<vmem>>, vector<1x1x1x64x64xbf16>
    %159 = vector.shape_cast %158 : vector<1x1x1x64x64xbf16> to vector<64x64xbf16>
    %cst_154 = arith.constant dense<0.000000e+00> : vector<22x64xf32>
    %160 = tpu.matmul %157, %159, %cst_154 {dimension_numbers = #tpu.dot_dimension_numbers<[1], [0], [0], [1], [0, 0, 1, 1], [], []>} : vector<22x64xbf16>, vector<64x64xbf16>, vector<22x64xf32> -> vector<22x64xf32>
    %161 = arith.addf %155, %160 : vector<22x64xf32>
    %162 = vector.extract_strided_slice %136 {offsets = [7, 0], sizes = [22, 64], strides = [1, 1]} : vector<36x64xf32> to vector<22x64xf32>
    %163 = arith.truncf %162 : vector<22x64xf32> to vector<22x64xbf16>
    %c1_155 = arith.constant 1 : index
    %c0_156 = arith.constant 0 : index
    %c4_157 = arith.constant 4 : index
    %c0_158 = arith.constant 0 : index
    %c0_159 = arith.constant 0 : index
    %164 = vector.load %arg2[%c1_155, %c0_156, %c4_157, %c0_158, %c0_159] : memref<3x2x9x64x64xbf16, #tpu.memory_space<vmem>>, vector<1x1x1x64x64xbf16>
    %165 = vector.shape_cast %164 : vector<1x1x1x64x64xbf16> to vector<64x64xbf16>
    %cst_160 = arith.constant dense<0.000000e+00> : vector<22x64xf32>
    %166 = tpu.matmul %163, %165, %cst_160 {dimension_numbers = #tpu.dot_dimension_numbers<[1], [0], [0], [1], [0, 0, 1, 1], [], []>} : vector<22x64xbf16>, vector<64x64xbf16>, vector<22x64xf32> -> vector<22x64xf32>
    %167 = arith.addf %161, %166 : vector<22x64xf32>
    %168 = vector.extract_strided_slice %136 {offsets = [8, 0], sizes = [22, 64], strides = [1, 1]} : vector<36x64xf32> to vector<22x64xf32>
    %169 = arith.truncf %168 : vector<22x64xf32> to vector<22x64xbf16>
    %c1_161 = arith.constant 1 : index
    %c0_162 = arith.constant 0 : index
    %c5_163 = arith.constant 5 : index
    %c0_164 = arith.constant 0 : index
    %c0_165 = arith.constant 0 : index
    %170 = vector.load %arg2[%c1_161, %c0_162, %c5_163, %c0_164, %c0_165] : memref<3x2x9x64x64xbf16, #tpu.memory_space<vmem>>, vector<1x1x1x64x64xbf16>
    %171 = vector.shape_cast %170 : vector<1x1x1x64x64xbf16> to vector<64x64xbf16>
    %cst_166 = arith.constant dense<0.000000e+00> : vector<22x64xf32>
    %172 = tpu.matmul %169, %171, %cst_166 {dimension_numbers = #tpu.dot_dimension_numbers<[1], [0], [0], [1], [0, 0, 1, 1], [], []>} : vector<22x64xbf16>, vector<64x64xbf16>, vector<22x64xf32> -> vector<22x64xf32>
    %173 = arith.addf %167, %172 : vector<22x64xf32>
    %174 = vector.extract_strided_slice %136 {offsets = [12, 0], sizes = [22, 64], strides = [1, 1]} : vector<36x64xf32> to vector<22x64xf32>
    %175 = arith.truncf %174 : vector<22x64xf32> to vector<22x64xbf16>
    %c1_167 = arith.constant 1 : index
    %c0_168 = arith.constant 0 : index
    %c6_169 = arith.constant 6 : index
    %c0_170 = arith.constant 0 : index
    %c0_171 = arith.constant 0 : index
    %176 = vector.load %arg2[%c1_167, %c0_168, %c6_169, %c0_170, %c0_171] : memref<3x2x9x64x64xbf16, #tpu.memory_space<vmem>>, vector<1x1x1x64x64xbf16>
    %177 = vector.shape_cast %176 : vector<1x1x1x64x64xbf16> to vector<64x64xbf16>
    %cst_172 = arith.constant dense<0.000000e+00> : vector<22x64xf32>
    %178 = tpu.matmul %175, %177, %cst_172 {dimension_numbers = #tpu.dot_dimension_numbers<[1], [0], [0], [1], [0, 0, 1, 1], [], []>} : vector<22x64xbf16>, vector<64x64xbf16>, vector<22x64xf32> -> vector<22x64xf32>
    %179 = arith.addf %173, %178 : vector<22x64xf32>
    %180 = vector.extract_strided_slice %136 {offsets = [13, 0], sizes = [22, 64], strides = [1, 1]} : vector<36x64xf32> to vector<22x64xf32>
    %181 = arith.truncf %180 : vector<22x64xf32> to vector<22x64xbf16>
    %c1_173 = arith.constant 1 : index
    %c0_174 = arith.constant 0 : index
    %c7_175 = arith.constant 7 : index
    %c0_176 = arith.constant 0 : index
    %c0_177 = arith.constant 0 : index
    %182 = vector.load %arg2[%c1_173, %c0_174, %c7_175, %c0_176, %c0_177] : memref<3x2x9x64x64xbf16, #tpu.memory_space<vmem>>, vector<1x1x1x64x64xbf16>
    %183 = vector.shape_cast %182 : vector<1x1x1x64x64xbf16> to vector<64x64xbf16>
    %cst_178 = arith.constant dense<0.000000e+00> : vector<22x64xf32>
    %184 = tpu.matmul %181, %183, %cst_178 {dimension_numbers = #tpu.dot_dimension_numbers<[1], [0], [0], [1], [0, 0, 1, 1], [], []>} : vector<22x64xbf16>, vector<64x64xbf16>, vector<22x64xf32> -> vector<22x64xf32>
    %185 = arith.addf %179, %184 : vector<22x64xf32>
    %186 = vector.extract_strided_slice %136 {offsets = [14, 0], sizes = [22, 64], strides = [1, 1]} : vector<36x64xf32> to vector<22x64xf32>
    %187 = arith.truncf %186 : vector<22x64xf32> to vector<22x64xbf16>
    %c1_179 = arith.constant 1 : index
    %c0_180 = arith.constant 0 : index
    %c8_181 = arith.constant 8 : index
    %c0_182 = arith.constant 0 : index
    %c0_183 = arith.constant 0 : index
    %188 = vector.load %arg2[%c1_179, %c0_180, %c8_181, %c0_182, %c0_183] : memref<3x2x9x64x64xbf16, #tpu.memory_space<vmem>>, vector<1x1x1x64x64xbf16>
    %189 = vector.shape_cast %188 : vector<1x1x1x64x64xbf16> to vector<64x64xbf16>
    %cst_184 = arith.constant dense<0.000000e+00> : vector<22x64xf32>
    %190 = tpu.matmul %187, %189, %cst_184 {dimension_numbers = #tpu.dot_dimension_numbers<[1], [0], [0], [1], [0, 0, 1, 1], [], []>} : vector<22x64xbf16>, vector<64x64xbf16>, vector<22x64xf32> -> vector<22x64xf32>
    %191 = arith.addf %185, %190 : vector<22x64xf32>
    %c1_185 = arith.constant 1 : index
    %c0_186 = arith.constant 0 : index
    %c0_187 = arith.constant 0 : index
    %c0_188 = arith.constant 0 : index
    %192 = vector.load %arg3[%c1_185, %c0_186, %c0_187, %c0_188] : memref<3x2x1x64xf32, #tpu.memory_space<vmem>>, vector<1x1x1x64xf32>
    %193 = vector.shape_cast %192 : vector<1x1x1x64xf32> to vector<1x64xf32>
    %194 = vector.broadcast %193 : vector<1x64xf32> to vector<22x64xf32>
    %195 = arith.addf %191, %194 : vector<22x64xf32>
    %cst_189 = arith.constant 0.000000e+00 : f32
    %196 = vector.broadcast %cst_189 : f32 to vector<22x64xf32>
    %197 = arith.maximumf %195, %196 : vector<22x64xf32>
    %198 = arith.mulf %197, %5 : vector<22x64xf32>
    %c7_190 = arith.constant 7 : index
    %c0_191 = arith.constant 0 : index
    %199 = vector.load %arg7[%c7_190, %c0_191] : memref<36x64xf32, #tpu.memory_space<vmem>>, vector<22x64xf32>
    tpu.vector_store %arg7[%c7_190, %c0_191], %198 {strides = array<i32>} : memref<36x64xf32, #tpu.memory_space<vmem>>, vector<22x64xf32>,
    %c0_192 = arith.constant 0 : index
    %c0_193 = arith.constant 0 : index
    %200 = vector.load %arg7[%c0_192, %c0_193] : memref<36x64xf32, #tpu.memory_space<vmem>>, vector<36x64xf32>
    %201 = vector.extract_strided_slice %136 {offsets = [7, 0], sizes = [22, 64], strides = [1, 1]} : vector<36x64xf32> to vector<22x64xf32>
    %cst_194 = arith.constant 0.000000e+00 : f32
    %202 = vector.broadcast %cst_194 : f32 to vector<22x64xf32>
    %203 = vector.extract_strided_slice %200 {offsets = [0, 0], sizes = [22, 64], strides = [1, 1]} : vector<36x64xf32> to vector<22x64xf32>
    %204 = arith.truncf %203 : vector<22x64xf32> to vector<22x64xbf16>
    %c1_195 = arith.constant 1 : index
    %c1_196 = arith.constant 1 : index
    %c0_197 = arith.constant 0 : index
    %c0_198 = arith.constant 0 : index
    %c0_199 = arith.constant 0 : index
    %205 = vector.load %arg2[%c1_195, %c1_196, %c0_197, %c0_198, %c0_199] : memref<3x2x9x64x64xbf16, #tpu.memory_space<vmem>>, vector<1x1x1x64x64xbf16>
    %206 = vector.shape_cast %205 : vector<1x1x1x64x64xbf16> to vector<64x64xbf16>
    %cst_200 = arith.constant dense<0.000000e+00> : vector<22x64xf32>
    %207 = tpu.matmul %204, %206, %cst_200 {dimension_numbers = #tpu.dot_dimension_numbers<[1], [0], [0], [1], [0, 0, 1, 1], [], []>} : vector<22x64xbf16>, vector<64x64xbf16>, vector<22x64xf32> -> vector<22x64xf32>
    %208 = arith.addf %202, %207 : vector<22x64xf32>
    %209 = vector.extract_strided_slice %200 {offsets = [1, 0], sizes = [22, 64], strides = [1, 1]} : vector<36x64xf32> to vector<22x64xf32>
    %210 = arith.truncf %209 : vector<22x64xf32> to vector<22x64xbf16>
    %c1_201 = arith.constant 1 : index
    %c1_202 = arith.constant 1 : index
    %c1_203 = arith.constant 1 : index
    %c0_204 = arith.constant 0 : index
    %c0_205 = arith.constant 0 : index
    %211 = vector.load %arg2[%c1_201, %c1_202, %c1_203, %c0_204, %c0_205] : memref<3x2x9x64x64xbf16, #tpu.memory_space<vmem>>, vector<1x1x1x64x64xbf16>
    %212 = vector.shape_cast %211 : vector<1x1x1x64x64xbf16> to vector<64x64xbf16>
    %cst_206 = arith.constant dense<0.000000e+00> : vector<22x64xf32>
    %213 = tpu.matmul %210, %212, %cst_206 {dimension_numbers = #tpu.dot_dimension_numbers<[1], [0], [0], [1], [0, 0, 1, 1], [], []>} : vector<22x64xbf16>, vector<64x64xbf16>, vector<22x64xf32> -> vector<22x64xf32>
    %214 = arith.addf %208, %213 : vector<22x64xf32>
    %215 = vector.extract_strided_slice %200 {offsets = [2, 0], sizes = [22, 64], strides = [1, 1]} : vector<36x64xf32> to vector<22x64xf32>
    %216 = arith.truncf %215 : vector<22x64xf32> to vector<22x64xbf16>
    %c1_207 = arith.constant 1 : index
    %c1_208 = arith.constant 1 : index
    %c2_209 = arith.constant 2 : index
    %c0_210 = arith.constant 0 : index
    %c0_211 = arith.constant 0 : index
    %217 = vector.load %arg2[%c1_207, %c1_208, %c2_209, %c0_210, %c0_211] : memref<3x2x9x64x64xbf16, #tpu.memory_space<vmem>>, vector<1x1x1x64x64xbf16>
    %218 = vector.shape_cast %217 : vector<1x1x1x64x64xbf16> to vector<64x64xbf16>
    %cst_212 = arith.constant dense<0.000000e+00> : vector<22x64xf32>
    %219 = tpu.matmul %216, %218, %cst_212 {dimension_numbers = #tpu.dot_dimension_numbers<[1], [0], [0], [1], [0, 0, 1, 1], [], []>} : vector<22x64xbf16>, vector<64x64xbf16>, vector<22x64xf32> -> vector<22x64xf32>
    %220 = arith.addf %214, %219 : vector<22x64xf32>
    %221 = vector.extract_strided_slice %200 {offsets = [6, 0], sizes = [22, 64], strides = [1, 1]} : vector<36x64xf32> to vector<22x64xf32>
    %222 = arith.truncf %221 : vector<22x64xf32> to vector<22x64xbf16>
    %c1_213 = arith.constant 1 : index
    %c1_214 = arith.constant 1 : index
    %c3_215 = arith.constant 3 : index
    %c0_216 = arith.constant 0 : index
    %c0_217 = arith.constant 0 : index
    %223 = vector.load %arg2[%c1_213, %c1_214, %c3_215, %c0_216, %c0_217] : memref<3x2x9x64x64xbf16, #tpu.memory_space<vmem>>, vector<1x1x1x64x64xbf16>
    %224 = vector.shape_cast %223 : vector<1x1x1x64x64xbf16> to vector<64x64xbf16>
    %cst_218 = arith.constant dense<0.000000e+00> : vector<22x64xf32>
    %225 = tpu.matmul %222, %224, %cst_218 {dimension_numbers = #tpu.dot_dimension_numbers<[1], [0], [0], [1], [0, 0, 1, 1], [], []>} : vector<22x64xbf16>, vector<64x64xbf16>, vector<22x64xf32> -> vector<22x64xf32>
    %226 = arith.addf %220, %225 : vector<22x64xf32>
    %227 = vector.extract_strided_slice %200 {offsets = [7, 0], sizes = [22, 64], strides = [1, 1]} : vector<36x64xf32> to vector<22x64xf32>
    %228 = arith.truncf %227 : vector<22x64xf32> to vector<22x64xbf16>
    %c1_219 = arith.constant 1 : index
    %c1_220 = arith.constant 1 : index
    %c4_221 = arith.constant 4 : index
    %c0_222 = arith.constant 0 : index
    %c0_223 = arith.constant 0 : index
    %229 = vector.load %arg2[%c1_219, %c1_220, %c4_221, %c0_222, %c0_223] : memref<3x2x9x64x64xbf16, #tpu.memory_space<vmem>>, vector<1x1x1x64x64xbf16>
    %230 = vector.shape_cast %229 : vector<1x1x1x64x64xbf16> to vector<64x64xbf16>
    %cst_224 = arith.constant dense<0.000000e+00> : vector<22x64xf32>
    %231 = tpu.matmul %228, %230, %cst_224 {dimension_numbers = #tpu.dot_dimension_numbers<[1], [0], [0], [1], [0, 0, 1, 1], [], []>} : vector<22x64xbf16>, vector<64x64xbf16>, vector<22x64xf32> -> vector<22x64xf32>
    %232 = arith.addf %226, %231 : vector<22x64xf32>
    %233 = vector.extract_strided_slice %200 {offsets = [8, 0], sizes = [22, 64], strides = [1, 1]} : vector<36x64xf32> to vector<22x64xf32>
    %234 = arith.truncf %233 : vector<22x64xf32> to vector<22x64xbf16>
    %c1_225 = arith.constant 1 : index
    %c1_226 = arith.constant 1 : index
    %c5_227 = arith.constant 5 : index
    %c0_228 = arith.constant 0 : index
    %c0_229 = arith.constant 0 : index
    %235 = vector.load %arg2[%c1_225, %c1_226, %c5_227, %c0_228, %c0_229] : memref<3x2x9x64x64xbf16, #tpu.memory_space<vmem>>, vector<1x1x1x64x64xbf16>
    %236 = vector.shape_cast %235 : vector<1x1x1x64x64xbf16> to vector<64x64xbf16>
    %cst_230 = arith.constant dense<0.000000e+00> : vector<22x64xf32>
    %237 = tpu.matmul %234, %236, %cst_230 {dimension_numbers = #tpu.dot_dimension_numbers<[1], [0], [0], [1], [0, 0, 1, 1], [], []>} : vector<22x64xbf16>, vector<64x64xbf16>, vector<22x64xf32> -> vector<22x64xf32>
    %238 = arith.addf %232, %237 : vector<22x64xf32>
    %239 = vector.extract_strided_slice %200 {offsets = [12, 0], sizes = [22, 64], strides = [1, 1]} : vector<36x64xf32> to vector<22x64xf32>
    %240 = arith.truncf %239 : vector<22x64xf32> to vector<22x64xbf16>
    %c1_231 = arith.constant 1 : index
    %c1_232 = arith.constant 1 : index
    %c6_233 = arith.constant 6 : index
    %c0_234 = arith.constant 0 : index
    %c0_235 = arith.constant 0 : index
    %241 = vector.load %arg2[%c1_231, %c1_232, %c6_233, %c0_234, %c0_235] : memref<3x2x9x64x64xbf16, #tpu.memory_space<vmem>>, vector<1x1x1x64x64xbf16>
    %242 = vector.shape_cast %241 : vector<1x1x1x64x64xbf16> to vector<64x64xbf16>
    %cst_236 = arith.constant dense<0.000000e+00> : vector<22x64xf32>
    %243 = tpu.matmul %240, %242, %cst_236 {dimension_numbers = #tpu.dot_dimension_numbers<[1], [0], [0], [1], [0, 0, 1, 1], [], []>} : vector<22x64xbf16>, vector<64x64xbf16>, vector<22x64xf32> -> vector<22x64xf32>
    %244 = arith.addf %238, %243 : vector<22x64xf32>
    %245 = vector.extract_strided_slice %200 {offsets = [13, 0], sizes = [22, 64], strides = [1, 1]} : vector<36x64xf32> to vector<22x64xf32>
    %246 = arith.truncf %245 : vector<22x64xf32> to vector<22x64xbf16>
    %c1_237 = arith.constant 1 : index
    %c1_238 = arith.constant 1 : index
    %c7_239 = arith.constant 7 : index
    %c0_240 = arith.constant 0 : index
    %c0_241 = arith.constant 0 : index
    %247 = vector.load %arg2[%c1_237, %c1_238, %c7_239, %c0_240, %c0_241] : memref<3x2x9x64x64xbf16, #tpu.memory_space<vmem>>, vector<1x1x1x64x64xbf16>
    %248 = vector.shape_cast %247 : vector<1x1x1x64x64xbf16> to vector<64x64xbf16>
    %cst_242 = arith.constant dense<0.000000e+00> : vector<22x64xf32>
    %249 = tpu.matmul %246, %248, %cst_242 {dimension_numbers = #tpu.dot_dimension_numbers<[1], [0], [0], [1], [0, 0, 1, 1], [], []>} : vector<22x64xbf16>, vector<64x64xbf16>, vector<22x64xf32> -> vector<22x64xf32>
    %250 = arith.addf %244, %249 : vector<22x64xf32>
    %251 = vector.extract_strided_slice %200 {offsets = [14, 0], sizes = [22, 64], strides = [1, 1]} : vector<36x64xf32> to vector<22x64xf32>
    %252 = arith.truncf %251 : vector<22x64xf32> to vector<22x64xbf16>
    %c1_243 = arith.constant 1 : index
    %c1_244 = arith.constant 1 : index
    %c8_245 = arith.constant 8 : index
    %c0_246 = arith.constant 0 : index
    %c0_247 = arith.constant 0 : index
    %253 = vector.load %arg2[%c1_243, %c1_244, %c8_245, %c0_246, %c0_247] : memref<3x2x9x64x64xbf16, #tpu.memory_space<vmem>>, vector<1x1x1x64x64xbf16>
    %254 = vector.shape_cast %253 : vector<1x1x1x64x64xbf16> to vector<64x64xbf16>
    %cst_248 = arith.constant dense<0.000000e+00> : vector<22x64xf32>
    %255 = tpu.matmul %252, %254, %cst_248 {dimension_numbers = #tpu.dot_dimension_numbers<[1], [0], [0], [1], [0, 0, 1, 1], [], []>} : vector<22x64xbf16>, vector<64x64xbf16>, vector<22x64xf32> -> vector<22x64xf32>
    %256 = arith.addf %250, %255 : vector<22x64xf32>
    %c1_249 = arith.constant 1 : index
    %c1_250 = arith.constant 1 : index
    %c0_251 = arith.constant 0 : index
    %c0_252 = arith.constant 0 : index
    %257 = vector.load %arg3[%c1_249, %c1_250, %c0_251, %c0_252] : memref<3x2x1x64xf32, #tpu.memory_space<vmem>>, vector<1x1x1x64xf32>
    %258 = vector.shape_cast %257 : vector<1x1x1x64xf32> to vector<1x64xf32>
    %259 = vector.broadcast %258 : vector<1x64xf32> to vector<22x64xf32>
    %260 = arith.addf %256, %259 : vector<22x64xf32>
    %261 = arith.addf %260, %201 : vector<22x64xf32>
    %cst_253 = arith.constant 0.000000e+00 : f32
    %262 = vector.broadcast %cst_253 : f32 to vector<22x64xf32>
    %263 = arith.maximumf %261, %262 : vector<22x64xf32>
    %264 = arith.mulf %263, %5 : vector<22x64xf32>
    %c7_254 = arith.constant 7 : index
    %c0_255 = arith.constant 0 : index
    %265 = vector.load %arg6[%c7_254, %c0_255] : memref<36x64xf32, #tpu.memory_space<vmem>>, vector<22x64xf32>
    tpu.vector_store %arg6[%c7_254, %c0_255], %264 {strides = array<i32>} : memref<36x64xf32, #tpu.memory_space<vmem>>, vector<22x64xf32>,
    %c0_256 = arith.constant 0 : index
    %c0_257 = arith.constant 0 : index
    %266 = vector.load %arg6[%c0_256, %c0_257] : memref<36x64xf32, #tpu.memory_space<vmem>>, vector<36x64xf32>
    %cst_258 = arith.constant 0.000000e+00 : f32
    %267 = vector.broadcast %cst_258 : f32 to vector<22x64xf32>
    %268 = vector.extract_strided_slice %266 {offsets = [0, 0], sizes = [22, 64], strides = [1, 1]} : vector<36x64xf32> to vector<22x64xf32>
    %269 = arith.truncf %268 : vector<22x64xf32> to vector<22x64xbf16>
    %c2_259 = arith.constant 2 : index
    %c0_260 = arith.constant 0 : index
    %c0_261 = arith.constant 0 : index
    %c0_262 = arith.constant 0 : index
    %c0_263 = arith.constant 0 : index
    %270 = vector.load %arg2[%c2_259, %c0_260, %c0_261, %c0_262, %c0_263] : memref<3x2x9x64x64xbf16, #tpu.memory_space<vmem>>, vector<1x1x1x64x64xbf16>
    %271 = vector.shape_cast %270 : vector<1x1x1x64x64xbf16> to vector<64x64xbf16>
    %cst_264 = arith.constant dense<0.000000e+00> : vector<22x64xf32>
    %272 = tpu.matmul %269, %271, %cst_264 {dimension_numbers = #tpu.dot_dimension_numbers<[1], [0], [0], [1], [0, 0, 1, 1], [], []>} : vector<22x64xbf16>, vector<64x64xbf16>, vector<22x64xf32> -> vector<22x64xf32>
    %273 = arith.addf %267, %272 : vector<22x64xf32>
    %274 = vector.extract_strided_slice %266 {offsets = [1, 0], sizes = [22, 64], strides = [1, 1]} : vector<36x64xf32> to vector<22x64xf32>
    %275 = arith.truncf %274 : vector<22x64xf32> to vector<22x64xbf16>
    %c2_265 = arith.constant 2 : index
    %c0_266 = arith.constant 0 : index
    %c1_267 = arith.constant 1 : index
    %c0_268 = arith.constant 0 : index
    %c0_269 = arith.constant 0 : index
    %276 = vector.load %arg2[%c2_265, %c0_266, %c1_267, %c0_268, %c0_269] : memref<3x2x9x64x64xbf16, #tpu.memory_space<vmem>>, vector<1x1x1x64x64xbf16>
    %277 = vector.shape_cast %276 : vector<1x1x1x64x64xbf16> to vector<64x64xbf16>
    %cst_270 = arith.constant dense<0.000000e+00> : vector<22x64xf32>
    %278 = tpu.matmul %275, %277, %cst_270 {dimension_numbers = #tpu.dot_dimension_numbers<[1], [0], [0], [1], [0, 0, 1, 1], [], []>} : vector<22x64xbf16>, vector<64x64xbf16>, vector<22x64xf32> -> vector<22x64xf32>
    %279 = arith.addf %273, %278 : vector<22x64xf32>
    %280 = vector.extract_strided_slice %266 {offsets = [2, 0], sizes = [22, 64], strides = [1, 1]} : vector<36x64xf32> to vector<22x64xf32>
    %281 = arith.truncf %280 : vector<22x64xf32> to vector<22x64xbf16>
    %c2_271 = arith.constant 2 : index
    %c0_272 = arith.constant 0 : index
    %c2_273 = arith.constant 2 : index
    %c0_274 = arith.constant 0 : index
    %c0_275 = arith.constant 0 : index
    %282 = vector.load %arg2[%c2_271, %c0_272, %c2_273, %c0_274, %c0_275] : memref<3x2x9x64x64xbf16, #tpu.memory_space<vmem>>, vector<1x1x1x64x64xbf16>
    %283 = vector.shape_cast %282 : vector<1x1x1x64x64xbf16> to vector<64x64xbf16>
    %cst_276 = arith.constant dense<0.000000e+00> : vector<22x64xf32>
    %284 = tpu.matmul %281, %283, %cst_276 {dimension_numbers = #tpu.dot_dimension_numbers<[1], [0], [0], [1], [0, 0, 1, 1], [], []>} : vector<22x64xbf16>, vector<64x64xbf16>, vector<22x64xf32> -> vector<22x64xf32>
    %285 = arith.addf %279, %284 : vector<22x64xf32>
    %286 = vector.extract_strided_slice %266 {offsets = [6, 0], sizes = [22, 64], strides = [1, 1]} : vector<36x64xf32> to vector<22x64xf32>
    %287 = arith.truncf %286 : vector<22x64xf32> to vector<22x64xbf16>
    %c2_277 = arith.constant 2 : index
    %c0_278 = arith.constant 0 : index
    %c3_279 = arith.constant 3 : index
    %c0_280 = arith.constant 0 : index
    %c0_281 = arith.constant 0 : index
    %288 = vector.load %arg2[%c2_277, %c0_278, %c3_279, %c0_280, %c0_281] : memref<3x2x9x64x64xbf16, #tpu.memory_space<vmem>>, vector<1x1x1x64x64xbf16>
    %289 = vector.shape_cast %288 : vector<1x1x1x64x64xbf16> to vector<64x64xbf16>
    %cst_282 = arith.constant dense<0.000000e+00> : vector<22x64xf32>
    %290 = tpu.matmul %287, %289, %cst_282 {dimension_numbers = #tpu.dot_dimension_numbers<[1], [0], [0], [1], [0, 0, 1, 1], [], []>} : vector<22x64xbf16>, vector<64x64xbf16>, vector<22x64xf32> -> vector<22x64xf32>
    %291 = arith.addf %285, %290 : vector<22x64xf32>
    %292 = vector.extract_strided_slice %266 {offsets = [7, 0], sizes = [22, 64], strides = [1, 1]} : vector<36x64xf32> to vector<22x64xf32>
    %293 = arith.truncf %292 : vector<22x64xf32> to vector<22x64xbf16>
    %c2_283 = arith.constant 2 : index
    %c0_284 = arith.constant 0 : index
    %c4_285 = arith.constant 4 : index
    %c0_286 = arith.constant 0 : index
    %c0_287 = arith.constant 0 : index
    %294 = vector.load %arg2[%c2_283, %c0_284, %c4_285, %c0_286, %c0_287] : memref<3x2x9x64x64xbf16, #tpu.memory_space<vmem>>, vector<1x1x1x64x64xbf16>
    %295 = vector.shape_cast %294 : vector<1x1x1x64x64xbf16> to vector<64x64xbf16>
    %cst_288 = arith.constant dense<0.000000e+00> : vector<22x64xf32>
    %296 = tpu.matmul %293, %295, %cst_288 {dimension_numbers = #tpu.dot_dimension_numbers<[1], [0], [0], [1], [0, 0, 1, 1], [], []>} : vector<22x64xbf16>, vector<64x64xbf16>, vector<22x64xf32> -> vector<22x64xf32>
    %297 = arith.addf %291, %296 : vector<22x64xf32>
    %298 = vector.extract_strided_slice %266 {offsets = [8, 0], sizes = [22, 64], strides = [1, 1]} : vector<36x64xf32> to vector<22x64xf32>
    %299 = arith.truncf %298 : vector<22x64xf32> to vector<22x64xbf16>
    %c2_289 = arith.constant 2 : index
    %c0_290 = arith.constant 0 : index
    %c5_291 = arith.constant 5 : index
    %c0_292 = arith.constant 0 : index
    %c0_293 = arith.constant 0 : index
    %300 = vector.load %arg2[%c2_289, %c0_290, %c5_291, %c0_292, %c0_293] : memref<3x2x9x64x64xbf16, #tpu.memory_space<vmem>>, vector<1x1x1x64x64xbf16>
    %301 = vector.shape_cast %300 : vector<1x1x1x64x64xbf16> to vector<64x64xbf16>
    %cst_294 = arith.constant dense<0.000000e+00> : vector<22x64xf32>
    %302 = tpu.matmul %299, %301, %cst_294 {dimension_numbers = #tpu.dot_dimension_numbers<[1], [0], [0], [1], [0, 0, 1, 1], [], []>} : vector<22x64xbf16>, vector<64x64xbf16>, vector<22x64xf32> -> vector<22x64xf32>
    %303 = arith.addf %297, %302 : vector<22x64xf32>
    %304 = vector.extract_strided_slice %266 {offsets = [12, 0], sizes = [22, 64], strides = [1, 1]} : vector<36x64xf32> to vector<22x64xf32>
    %305 = arith.truncf %304 : vector<22x64xf32> to vector<22x64xbf16>
    %c2_295 = arith.constant 2 : index
    %c0_296 = arith.constant 0 : index
    %c6_297 = arith.constant 6 : index
    %c0_298 = arith.constant 0 : index
    %c0_299 = arith.constant 0 : index
    %306 = vector.load %arg2[%c2_295, %c0_296, %c6_297, %c0_298, %c0_299] : memref<3x2x9x64x64xbf16, #tpu.memory_space<vmem>>, vector<1x1x1x64x64xbf16>
    %307 = vector.shape_cast %306 : vector<1x1x1x64x64xbf16> to vector<64x64xbf16>
    %cst_300 = arith.constant dense<0.000000e+00> : vector<22x64xf32>
    %308 = tpu.matmul %305, %307, %cst_300 {dimension_numbers = #tpu.dot_dimension_numbers<[1], [0], [0], [1], [0, 0, 1, 1], [], []>} : vector<22x64xbf16>, vector<64x64xbf16>, vector<22x64xf32> -> vector<22x64xf32>
    %309 = arith.addf %303, %308 : vector<22x64xf32>
    %310 = vector.extract_strided_slice %266 {offsets = [13, 0], sizes = [22, 64], strides = [1, 1]} : vector<36x64xf32> to vector<22x64xf32>
    %311 = arith.truncf %310 : vector<22x64xf32> to vector<22x64xbf16>
    %c2_301 = arith.constant 2 : index
    %c0_302 = arith.constant 0 : index
    %c7_303 = arith.constant 7 : index
    %c0_304 = arith.constant 0 : index
    %c0_305 = arith.constant 0 : index
    %312 = vector.load %arg2[%c2_301, %c0_302, %c7_303, %c0_304, %c0_305] : memref<3x2x9x64x64xbf16, #tpu.memory_space<vmem>>, vector<1x1x1x64x64xbf16>
    %313 = vector.shape_cast %312 : vector<1x1x1x64x64xbf16> to vector<64x64xbf16>
    %cst_306 = arith.constant dense<0.000000e+00> : vector<22x64xf32>
    %314 = tpu.matmul %311, %313, %cst_306 {dimension_numbers = #tpu.dot_dimension_numbers<[1], [0], [0], [1], [0, 0, 1, 1], [], []>} : vector<22x64xbf16>, vector<64x64xbf16>, vector<22x64xf32> -> vector<22x64xf32>
    %315 = arith.addf %309, %314 : vector<22x64xf32>
    %316 = vector.extract_strided_slice %266 {offsets = [14, 0], sizes = [22, 64], strides = [1, 1]} : vector<36x64xf32> to vector<22x64xf32>
    %317 = arith.truncf %316 : vector<22x64xf32> to vector<22x64xbf16>
    %c2_307 = arith.constant 2 : index
    %c0_308 = arith.constant 0 : index
    %c8_309 = arith.constant 8 : index
    %c0_310 = arith.constant 0 : index
    %c0_311 = arith.constant 0 : index
    %318 = vector.load %arg2[%c2_307, %c0_308, %c8_309, %c0_310, %c0_311] : memref<3x2x9x64x64xbf16, #tpu.memory_space<vmem>>, vector<1x1x1x64x64xbf16>
    %319 = vector.shape_cast %318 : vector<1x1x1x64x64xbf16> to vector<64x64xbf16>
    %cst_312 = arith.constant dense<0.000000e+00> : vector<22x64xf32>
    %320 = tpu.matmul %317, %319, %cst_312 {dimension_numbers = #tpu.dot_dimension_numbers<[1], [0], [0], [1], [0, 0, 1, 1], [], []>} : vector<22x64xbf16>, vector<64x64xbf16>, vector<22x64xf32> -> vector<22x64xf32>
    %321 = arith.addf %315, %320 : vector<22x64xf32>
    %c2_313 = arith.constant 2 : index
    %c0_314 = arith.constant 0 : index
    %c0_315 = arith.constant 0 : index
    %c0_316 = arith.constant 0 : index
    %322 = vector.load %arg3[%c2_313, %c0_314, %c0_315, %c0_316] : memref<3x2x1x64xf32, #tpu.memory_space<vmem>>, vector<1x1x1x64xf32>
    %323 = vector.shape_cast %322 : vector<1x1x1x64xf32> to vector<1x64xf32>
    %324 = vector.broadcast %323 : vector<1x64xf32> to vector<22x64xf32>
    %325 = arith.addf %321, %324 : vector<22x64xf32>
    %cst_317 = arith.constant 0.000000e+00 : f32
    %326 = vector.broadcast %cst_317 : f32 to vector<22x64xf32>
    %327 = arith.maximumf %325, %326 : vector<22x64xf32>
    %328 = arith.mulf %327, %5 : vector<22x64xf32>
    %c7_318 = arith.constant 7 : index
    %c0_319 = arith.constant 0 : index
    %329 = vector.load %arg7[%c7_318, %c0_319] : memref<36x64xf32, #tpu.memory_space<vmem>>, vector<22x64xf32>
    tpu.vector_store %arg7[%c7_318, %c0_319], %328 {strides = array<i32>} : memref<36x64xf32, #tpu.memory_space<vmem>>, vector<22x64xf32>,
    %c0_320 = arith.constant 0 : index
    %c0_321 = arith.constant 0 : index
    %330 = vector.load %arg7[%c0_320, %c0_321] : memref<36x64xf32, #tpu.memory_space<vmem>>, vector<36x64xf32>
    %331 = vector.extract_strided_slice %266 {offsets = [7, 0], sizes = [22, 64], strides = [1, 1]} : vector<36x64xf32> to vector<22x64xf32>
    %cst_322 = arith.constant 0.000000e+00 : f32
    %332 = vector.broadcast %cst_322 : f32 to vector<22x64xf32>
    %333 = vector.extract_strided_slice %330 {offsets = [0, 0], sizes = [22, 64], strides = [1, 1]} : vector<36x64xf32> to vector<22x64xf32>
    %334 = arith.truncf %333 : vector<22x64xf32> to vector<22x64xbf16>
    %c2_323 = arith.constant 2 : index
    %c1_324 = arith.constant 1 : index
    %c0_325 = arith.constant 0 : index
    %c0_326 = arith.constant 0 : index
    %c0_327 = arith.constant 0 : index
    %335 = vector.load %arg2[%c2_323, %c1_324, %c0_325, %c0_326, %c0_327] : memref<3x2x9x64x64xbf16, #tpu.memory_space<vmem>>, vector<1x1x1x64x64xbf16>
    %336 = vector.shape_cast %335 : vector<1x1x1x64x64xbf16> to vector<64x64xbf16>
    %cst_328 = arith.constant dense<0.000000e+00> : vector<22x64xf32>
    %337 = tpu.matmul %334, %336, %cst_328 {dimension_numbers = #tpu.dot_dimension_numbers<[1], [0], [0], [1], [0, 0, 1, 1], [], []>} : vector<22x64xbf16>, vector<64x64xbf16>, vector<22x64xf32> -> vector<22x64xf32>
    %338 = arith.addf %332, %337 : vector<22x64xf32>
    %339 = vector.extract_strided_slice %330 {offsets = [1, 0], sizes = [22, 64], strides = [1, 1]} : vector<36x64xf32> to vector<22x64xf32>
    %340 = arith.truncf %339 : vector<22x64xf32> to vector<22x64xbf16>
    %c2_329 = arith.constant 2 : index
    %c1_330 = arith.constant 1 : index
    %c1_331 = arith.constant 1 : index
    %c0_332 = arith.constant 0 : index
    %c0_333 = arith.constant 0 : index
    %341 = vector.load %arg2[%c2_329, %c1_330, %c1_331, %c0_332, %c0_333] : memref<3x2x9x64x64xbf16, #tpu.memory_space<vmem>>, vector<1x1x1x64x64xbf16>
    %342 = vector.shape_cast %341 : vector<1x1x1x64x64xbf16> to vector<64x64xbf16>
    %cst_334 = arith.constant dense<0.000000e+00> : vector<22x64xf32>
    %343 = tpu.matmul %340, %342, %cst_334 {dimension_numbers = #tpu.dot_dimension_numbers<[1], [0], [0], [1], [0, 0, 1, 1], [], []>} : vector<22x64xbf16>, vector<64x64xbf16>, vector<22x64xf32> -> vector<22x64xf32>
    %344 = arith.addf %338, %343 : vector<22x64xf32>
    %345 = vector.extract_strided_slice %330 {offsets = [2, 0], sizes = [22, 64], strides = [1, 1]} : vector<36x64xf32> to vector<22x64xf32>
    %346 = arith.truncf %345 : vector<22x64xf32> to vector<22x64xbf16>
    %c2_335 = arith.constant 2 : index
    %c1_336 = arith.constant 1 : index
    %c2_337 = arith.constant 2 : index
    %c0_338 = arith.constant 0 : index
    %c0_339 = arith.constant 0 : index
    %347 = vector.load %arg2[%c2_335, %c1_336, %c2_337, %c0_338, %c0_339] : memref<3x2x9x64x64xbf16, #tpu.memory_space<vmem>>, vector<1x1x1x64x64xbf16>
    %348 = vector.shape_cast %347 : vector<1x1x1x64x64xbf16> to vector<64x64xbf16>
    %cst_340 = arith.constant dense<0.000000e+00> : vector<22x64xf32>
    %349 = tpu.matmul %346, %348, %cst_340 {dimension_numbers = #tpu.dot_dimension_numbers<[1], [0], [0], [1], [0, 0, 1, 1], [], []>} : vector<22x64xbf16>, vector<64x64xbf16>, vector<22x64xf32> -> vector<22x64xf32>
    %350 = arith.addf %344, %349 : vector<22x64xf32>
    %351 = vector.extract_strided_slice %330 {offsets = [6, 0], sizes = [22, 64], strides = [1, 1]} : vector<36x64xf32> to vector<22x64xf32>
    %352 = arith.truncf %351 : vector<22x64xf32> to vector<22x64xbf16>
    %c2_341 = arith.constant 2 : index
    %c1_342 = arith.constant 1 : index
    %c3_343 = arith.constant 3 : index
    %c0_344 = arith.constant 0 : index
    %c0_345 = arith.constant 0 : index
    %353 = vector.load %arg2[%c2_341, %c1_342, %c3_343, %c0_344, %c0_345] : memref<3x2x9x64x64xbf16, #tpu.memory_space<vmem>>, vector<1x1x1x64x64xbf16>
    %354 = vector.shape_cast %353 : vector<1x1x1x64x64xbf16> to vector<64x64xbf16>
    %cst_346 = arith.constant dense<0.000000e+00> : vector<22x64xf32>
    %355 = tpu.matmul %352, %354, %cst_346 {dimension_numbers = #tpu.dot_dimension_numbers<[1], [0], [0], [1], [0, 0, 1, 1], [], []>} : vector<22x64xbf16>, vector<64x64xbf16>, vector<22x64xf32> -> vector<22x64xf32>
    %356 = arith.addf %350, %355 : vector<22x64xf32>
    %357 = vector.extract_strided_slice %330 {offsets = [7, 0], sizes = [22, 64], strides = [1, 1]} : vector<36x64xf32> to vector<22x64xf32>
    %358 = arith.truncf %357 : vector<22x64xf32> to vector<22x64xbf16>
    %c2_347 = arith.constant 2 : index
    %c1_348 = arith.constant 1 : index
    %c4_349 = arith.constant 4 : index
    %c0_350 = arith.constant 0 : index
    %c0_351 = arith.constant 0 : index
    %359 = vector.load %arg2[%c2_347, %c1_348, %c4_349, %c0_350, %c0_351] : memref<3x2x9x64x64xbf16, #tpu.memory_space<vmem>>, vector<1x1x1x64x64xbf16>
    %360 = vector.shape_cast %359 : vector<1x1x1x64x64xbf16> to vector<64x64xbf16>
    %cst_352 = arith.constant dense<0.000000e+00> : vector<22x64xf32>
    %361 = tpu.matmul %358, %360, %cst_352 {dimension_numbers = #tpu.dot_dimension_numbers<[1], [0], [0], [1], [0, 0, 1, 1], [], []>} : vector<22x64xbf16>, vector<64x64xbf16>, vector<22x64xf32> -> vector<22x64xf32>
    %362 = arith.addf %356, %361 : vector<22x64xf32>
    %363 = vector.extract_strided_slice %330 {offsets = [8, 0], sizes = [22, 64], strides = [1, 1]} : vector<36x64xf32> to vector<22x64xf32>
    %364 = arith.truncf %363 : vector<22x64xf32> to vector<22x64xbf16>
    %c2_353 = arith.constant 2 : index
    %c1_354 = arith.constant 1 : index
    %c5_355 = arith.constant 5 : index
    %c0_356 = arith.constant 0 : index
    %c0_357 = arith.constant 0 : index
    %365 = vector.load %arg2[%c2_353, %c1_354, %c5_355, %c0_356, %c0_357] : memref<3x2x9x64x64xbf16, #tpu.memory_space<vmem>>, vector<1x1x1x64x64xbf16>
    %366 = vector.shape_cast %365 : vector<1x1x1x64x64xbf16> to vector<64x64xbf16>
    %cst_358 = arith.constant dense<0.000000e+00> : vector<22x64xf32>
    %367 = tpu.matmul %364, %366, %cst_358 {dimension_numbers = #tpu.dot_dimension_numbers<[1], [0], [0], [1], [0, 0, 1, 1], [], []>} : vector<22x64xbf16>, vector<64x64xbf16>, vector<22x64xf32> -> vector<22x64xf32>
    %368 = arith.addf %362, %367 : vector<22x64xf32>
    %369 = vector.extract_strided_slice %330 {offsets = [12, 0], sizes = [22, 64], strides = [1, 1]} : vector<36x64xf32> to vector<22x64xf32>
    %370 = arith.truncf %369 : vector<22x64xf32> to vector<22x64xbf16>
    %c2_359 = arith.constant 2 : index
    %c1_360 = arith.constant 1 : index
    %c6_361 = arith.constant 6 : index
    %c0_362 = arith.constant 0 : index
    %c0_363 = arith.constant 0 : index
    %371 = vector.load %arg2[%c2_359, %c1_360, %c6_361, %c0_362, %c0_363] : memref<3x2x9x64x64xbf16, #tpu.memory_space<vmem>>, vector<1x1x1x64x64xbf16>
    %372 = vector.shape_cast %371 : vector<1x1x1x64x64xbf16> to vector<64x64xbf16>
    %cst_364 = arith.constant dense<0.000000e+00> : vector<22x64xf32>
    %373 = tpu.matmul %370, %372, %cst_364 {dimension_numbers = #tpu.dot_dimension_numbers<[1], [0], [0], [1], [0, 0, 1, 1], [], []>} : vector<22x64xbf16>, vector<64x64xbf16>, vector<22x64xf32> -> vector<22x64xf32>
    %374 = arith.addf %368, %373 : vector<22x64xf32>
    %375 = vector.extract_strided_slice %330 {offsets = [13, 0], sizes = [22, 64], strides = [1, 1]} : vector<36x64xf32> to vector<22x64xf32>
    %376 = arith.truncf %375 : vector<22x64xf32> to vector<22x64xbf16>
    %c2_365 = arith.constant 2 : index
    %c1_366 = arith.constant 1 : index
    %c7_367 = arith.constant 7 : index
    %c0_368 = arith.constant 0 : index
    %c0_369 = arith.constant 0 : index
    %377 = vector.load %arg2[%c2_365, %c1_366, %c7_367, %c0_368, %c0_369] : memref<3x2x9x64x64xbf16, #tpu.memory_space<vmem>>, vector<1x1x1x64x64xbf16>
    %378 = vector.shape_cast %377 : vector<1x1x1x64x64xbf16> to vector<64x64xbf16>
    %cst_370 = arith.constant dense<0.000000e+00> : vector<22x64xf32>
    %379 = tpu.matmul %376, %378, %cst_370 {dimension_numbers = #tpu.dot_dimension_numbers<[1], [0], [0], [1], [0, 0, 1, 1], [], []>} : vector<22x64xbf16>, vector<64x64xbf16>, vector<22x64xf32> -> vector<22x64xf32>
    %380 = arith.addf %374, %379 : vector<22x64xf32>
    %381 = vector.extract_strided_slice %330 {offsets = [14, 0], sizes = [22, 64], strides = [1, 1]} : vector<36x64xf32> to vector<22x64xf32>
    %382 = arith.truncf %381 : vector<22x64xf32> to vector<22x64xbf16>
    %c2_371 = arith.constant 2 : index
    %c1_372 = arith.constant 1 : index
    %c8_373 = arith.constant 8 : index
    %c0_374 = arith.constant 0 : index
    %c0_375 = arith.constant 0 : index
    %383 = vector.load %arg2[%c2_371, %c1_372, %c8_373, %c0_374, %c0_375] : memref<3x2x9x64x64xbf16, #tpu.memory_space<vmem>>, vector<1x1x1x64x64xbf16>
    %384 = vector.shape_cast %383 : vector<1x1x1x64x64xbf16> to vector<64x64xbf16>
    %cst_376 = arith.constant dense<0.000000e+00> : vector<22x64xf32>
    %385 = tpu.matmul %382, %384, %cst_376 {dimension_numbers = #tpu.dot_dimension_numbers<[1], [0], [0], [1], [0, 0, 1, 1], [], []>} : vector<22x64xbf16>, vector<64x64xbf16>, vector<22x64xf32> -> vector<22x64xf32>
    %386 = arith.addf %380, %385 : vector<22x64xf32>
    %c2_377 = arith.constant 2 : index
    %c1_378 = arith.constant 1 : index
    %c0_379 = arith.constant 0 : index
    %c0_380 = arith.constant 0 : index
    %387 = vector.load %arg3[%c2_377, %c1_378, %c0_379, %c0_380] : memref<3x2x1x64xf32, #tpu.memory_space<vmem>>, vector<1x1x1x64xf32>
    %388 = vector.shape_cast %387 : vector<1x1x1x64xf32> to vector<1x64xf32>
    %389 = vector.broadcast %388 : vector<1x64xf32> to vector<22x64xf32>
    %390 = arith.addf %386, %389 : vector<22x64xf32>
    %391 = arith.addf %390, %331 : vector<22x64xf32>
    %cst_381 = arith.constant 0.000000e+00 : f32
    %392 = vector.broadcast %cst_381 : f32 to vector<22x64xf32>
    %393 = arith.maximumf %391, %392 : vector<22x64xf32>
    %394 = arith.mulf %393, %5 : vector<22x64xf32>
    %c7_382 = arith.constant 7 : index
    %c0_383 = arith.constant 0 : index
    %395 = vector.load %arg6[%c7_382, %c0_383] : memref<36x64xf32, #tpu.memory_space<vmem>>, vector<22x64xf32>
    tpu.vector_store %arg6[%c7_382, %c0_383], %394 {strides = array<i32>} : memref<36x64xf32, #tpu.memory_space<vmem>>, vector<22x64xf32>,
    %c0_384 = arith.constant 0 : index
    %c0_385 = arith.constant 0 : index
    %396 = vector.load %arg6[%c0_384, %c0_385] : memref<36x64xf32, #tpu.memory_space<vmem>>, vector<36x64xf32>
    %c0_386 = arith.constant 0 : index
    %c0_387 = arith.constant 0 : index
    %c0_388 = arith.constant 0 : index
    %397 = vector.load %arg5[%c0_386, %c0_387, %c0_388] : memref<1x36x64xf32, #tpu.memory_space<vmem>>, vector<1x36x64xf32>
    %398 = vector.shape_cast %397 : vector<1x36x64xf32> to vector<36x64xf32>
    %399 = vector.shape_cast %396 : vector<36x64xf32> to vector<1x36x64xf32>
    tpu.vector_store %arg5[%c0_386, %c0_387, %c0_388], %399 {strides = array<i32>} : memref<1x36x64xf32, #tpu.memory_space<vmem>>, vector<1x36x64xf32>,
    return
  }
  func.func @transform_0(%arg0: i32) -> (i32, i32, i32) {
    %c0_i32 = arith.constant 0 : i32
    %c0_i32_0 = arith.constant 0 : i32
    %c0_i32_1 = arith.constant 0 : i32
    return %arg0, %c0_i32, %c0_i32_0 : i32, i32, i32
  }
  func.func @transform_1(%arg0: i32) -> (i32, i32, i32, i32, i32) {
    %c0_i32 = arith.constant 0 : i32
    %c0_i32_0 = arith.constant 0 : i32
    %c0_i32_1 = arith.constant 0 : i32
    %c0_i32_2 = arith.constant 0 : i32
    %c0_i32_3 = arith.constant 0 : i32
    %c0_i32_4 = arith.constant 0 : i32
    return %c0_i32, %c0_i32_0, %c0_i32_1, %c0_i32_2, %c0_i32_3 : i32, i32, i32, i32, i32
  }
  func.func @transform_2(%arg0: i32) -> (i32, i32, i32, i32) {
    %c0_i32 = arith.constant 0 : i32
    %c0_i32_0 = arith.constant 0 : i32
    %c0_i32_1 = arith.constant 0 : i32
    %c0_i32_2 = arith.constant 0 : i32
    %c0_i32_3 = arith.constant 0 : i32
    return %c0_i32, %c0_i32_0, %c0_i32_1, %c0_i32_2 : i32, i32, i32, i32
  }
  func.func @transform_3(%arg0: i32) -> (i32, i32) {
    %c0_i32 = arith.constant 0 : i32
    %c0_i32_0 = arith.constant 0 : i32
    %c0_i32_1 = arith.constant 0 : i32
    return %c0_i32, %c0_i32_0 : i32, i32
  }
  func.func @transform_4(%arg0: i32) -> (i32, i32, i32) {
    %c0_i32 = arith.constant 0 : i32
    %c0_i32_0 = arith.constant 0 : i32
    %c0_i32_1 = arith.constant 0 : i32
    return %arg0, %c0_i32, %c0_i32_0 : i32, i32, i32
  }
}

</mosaic_0001>

<bundles_post_ra>
// kernel: mul.5
= control target key start
LH: loop header
LB: loop body
LE: loop exit
PB: predicated region body
PF: predicated region fallthrough
CT: control target
= control target key end

     0   :  { %s47_s0 = inlined_call_operand.vmem [shape: f32[22], index: 0, kind: input, shape index: {}]   ;;  %s48_s1 = inlined_call_operand.vmem [shape: f32[22,64], index: 1, kind: output, shape index: {}]  }
   0x1   :  { %v4_v0 = vld [vmem:[%s47_s0] ss:$0 sm:$0xff] }
   0x2   :  { %6 = vbcast.lane.b32.xlu0 %v4_v0, 256  ;;  %19 = vbcast.lane.b32.xlu1 %v4_v0, 272 }
   0x6   :  { %12 = vbcast.lane.b32.xlu0 %v4_v0, 264 }
  0x74   :  { %v7_v1 = vpop.permute.xlu0 %6  ;;  %v20_v2 = vpop.permute.xlu1 %19 }
  0x75   :  { %8 = vst [vmem:[%s48_s1] sm:$0xff] %v7_v1  ;;  %24 = vst [vmem:[%s48_s1 + $0x10] sm:$0xff] %v20_v2 }
  0x78   :  { %v13_v3 = vpop.permute.xlu0 %12 }
  0x79   :  { %23 = vst [vmem:[%s48_s1 + $0x8] sm:$0xff] %v13_v3 }

// kernel: resnet_forward.2
= control target key start
LH: loop header
LB: loop body
LE: loop exit
PB: predicated region body
PF: predicated region fallthrough
CT: control target
= control target key end

     0   :  { %s704_s12 = smov 0   ;;  %s825_s0 = inlined_call_operand.vmem [shape: bf16[2,64,256], index: 0, kind: input, shape index: {}]   ;;  %s826_s1 = inlined_call_operand.vmem [shape: bf16[256,64], index: 1, kind: input, shape index: {}]   ;;  %s827_s2 = inlined_call_operand.vmem [shape: f32[1,64], index: 2, kind: input, shape index: {}]   ;;  %s828_s3 = inlined_call_operand.vmem [shape: f32[2,36,64], index: 3, kind: output, shape index: {}]  }
   0x1 LB: > { %s545_s13 = sadd.s32 4294967295, %s681_s12   ;;  %p549_p0 = scmp.ge.s32.totalorder %s681_s12, 1  ;;  %s681_s12 = sphi %s704_s12, %s13_s12  }
   0x2   : > { %p137_p1 = scmp.lt.s32.totalorder %s681_s12, 3 }
   0x4   : > { %p138_p2 = pnand %p549_p0, %p137_p1 }
   0x5   : > { %p161_p3 = scmp.lt.s32.totalorder (!%p138_p2), %s545_s13, 1 }
   0x6   : > { %141 = sbr.rel (%p138_p2) target bundleno = 272 (0x110), region = 32 }
   0xb   : > { %v647_v0 = vld [vmem:[%s826_s1 + $0x78] sm:$0xff]   ;;  %v649_v2 = vld [vmem:[%s826_s1 + $0x70] sm:$0xff]   ;;  %v651_v4 = vld [vmem:[%s826_s1 + $0x68] sm:$0xff]   ;;  %s830_s13 = smov (!%p161_p3, %s545_s13), 1  ;;  %vm428_vm0 = vcmask 523264   ;;  %vm433_vm1 = vcmask 519168  }
   0xc   : > { %v648_v1 = vld [vmem:[%s826_s1 + $0x38] sm:$0xff]   ;;  %581 = vmatprep.subr.bf16.mxu0 %v647_v0  ;;  %621 = vmatprep.subr.bf16.mxu1 %v647_v0  ;;  %v650_v3 = vld [vmem:[%s826_s1 + $0x30] sm:$0xff]   ;;  %v652_v5 = vld [vmem:[%s826_s1 + $0x28] sm:$0xff]   ;;  %s580_s30 = sshll.u32 %s830_s13, 6  ;;  %s637_s25 = smul.u32 40, %s830_s13  ;;  %v683_v24 = vmov 0.0  }
   0xd   : > { %582 = vmatpush3.bf16.msra.mxu0 %v648_v1  ;;  %629 = vmatpush3.bf16.msra.mxu1 %v648_v1  ;;  %v653_v6 = vld [vmem:[%s826_s1 + $0x60] sm:$0xff]   ;;  %v655_v8 = vld [vmem:[%s826_s1 + $0x58] sm:$0xff]   ;;  %s745_s8 = scalar_lea.vmem %s825_s0, %s580_s30  ;;  %v657_v10 = vld [vmem:[%s826_s1 + $0x50] sm:$0xff]   ;;  %vm440_vm2 = vcmask 516096   ;;  %vm445_vm3 = vcmask 517121   ;;  %vm447_vm4 = vcmask 519171  }
   0xe   : > { %583 = vmatprep.subr.bf16.mxu0 %v649_v2  ;;  %622 = vmatprep.subr.bf16.mxu1 %v649_v2  ;;  %v654_v7 = vld [vmem:[%s826_s1 + $0x20] sm:$0xff]   ;;  %v656_v9 = vld [vmem:[%s826_s1 + $0x18] sm:$0xff]   ;;  %v658_v13 = vld [vmem:[%s826_s1 + $0x10] sm:$0xff]   ;;  %s780_s28 = scalar_lea.vmem %s828_s3, %s637_s25  ;;  %vm449_vm5 = vcmask 521221  }
   0xf   : > { %v665_v11 = vld [vmem:[%s745_s8 + $0x4] ss:$8 sps:$4 sm:$0xff]   ;;  %v663_v18 = vld [vmem:[%s745_s8] ss:$8 sps:$4 sm:$0xff]   ;;  %v669_v20 = vld [vmem:[%s745_s8 + $0x14] ss:$8 sps:$4 sm:$0xff]  }
  0x10   : > { %v668_v12 = vld [vmem:[%s745_s8 + $0x24] ss:$8 sps:$4 sm:$0xff]   ;;  %387 = vmatprep.mubr.bf16.mxu0 %v665_v11  ;;  %v666_v19 = vld [vmem:[%s745_s8 + $0x20] ss:$8 sps:$4 sm:$0xff]   ;;  %v671_v21 = vld [vmem:[%s745_s8 + $0x34] ss:$8 sps:$4 sm:$0xff]  }
  0x11   : > { %584 = vmatpush3.bf16.msra.mxu0 %v650_v3  ;;  %630 = vmatpush3.bf16.msra.mxu1 %v650_v3  ;;  %v659_v14 = vld [vmem:[%s826_s1 + $0x48] sm:$0xff]   ;;  %v661_v16 = vld [vmem:[%s826_s1 + $0x40] sm:$0xff]   ;;  %v673_v22 = vld [vmem:[%s745_s8 + $0x10] ss:$8 sps:$4 sm:$0xff]   ;;  %429 = vst.msk [vmem:[%s780_s28] sm:$0xff] %vm428_vm0, %v683_v24 }
  0x12   : > { %585 = vmatprep.subr.bf16.mxu0 %v651_v4  ;;  %623 = vmatprep.subr.bf16.mxu1 %v651_v4  ;;  %v660_v15 = vld [vmem:[%s826_s1 + $0x8] sm:$0xff]   ;;  %v662_v17 = vld [vmem:[%s826_s1] sm:$0xff]   ;;  %v674_v23 = vld [vmem:[%s745_s8 + $0x30] ss:$8 sps:$4 sm:$0xff]   ;;  %430 = vst.msk [vmem:[%s780_s28 + $0x8] sm:$0xff] %vm428_vm0, %v683_v24 }
  0x13   : > { %403 = vmatprep.mubr.bf16.mxu1 %v668_v12  ;;  %434 = vst.msk [vmem:[%s780_s28 + $0x20] sm:$0xf] %vm433_vm1, %v683_v24  ;;  %v553_v30 = vld [vmem:[%s827_s2] ss:$0 sm:$0xff] }
  0x14   : > { %431 = vst.msk [vmem:[%s780_s28 + $0x10] sm:$0xff] %vm428_vm0, %v683_v24  ;;  %432 = vst.msk [vmem:[%s780_s28 + $0x18] sm:$0xff] %vm428_vm0, %v683_v24 }
  0x15   : > { %586 = vmatpush3.bf16.msra.mxu0 %v652_v5  ;;  %631 = vmatpush3.bf16.msra.mxu1 %v652_v5 }
  0x16   : > { %587 = vmatprep.subr.bf16.mxu0 %v653_v6  ;;  %624 = vmatprep.subr.bf16.mxu1 %v653_v6 }
  0x19   : > { %588 = vmatpush3.bf16.msra.mxu0 %v654_v7  ;;  %632 = vmatpush3.bf16.msra.mxu1 %v654_v7 }
  0x1a   : > { %589 = vmatprep.subr.bf16.mxu0 %v655_v8  ;;  %625 = vmatprep.subr.bf16.mxu1 %v655_v8 }
  0x1d   : > { %590 = vmatpush3.bf16.msra.mxu0 %v656_v9  ;;  %633 = vmatpush3.bf16.msra.mxu1 %v656_v9 }
  0x1e   : > { %591 = vmatprep.subr.bf16.mxu0 %v657_v10  ;;  %626 = vmatprep.subr.bf16.mxu1 %v657_v10 }
  0x21   : > { %592 = vmatpush3.bf16.msra.mxu0 %v658_v13  ;;  %634 = vmatpush3.bf16.msra.mxu1 %v658_v13 }
  0x22   : > { %593 = vmatprep.subr.bf16.mxu0 %v659_v14  ;;  %627 = vmatprep.subr.bf16.mxu1 %v659_v14 }
  0x25   : > { %594 = vmatpush3.bf16.msra.mxu0 %v660_v15  ;;  %635 = vmatpush3.bf16.msra.mxu1 %v660_v15 }
  0x26   : > { %595 = vmatprep.subr.bf16.mxu0 %v661_v16  ;;  %628 = vmatprep.subr.bf16.mxu1 %v661_v16 }
  0x29   : > { %596 = vmatpush3.bf16.msra.mxu0 %v662_v17  ;;  %636 = vmatpush3.bf16.msra.mxu1 %v662_v17 }
  0x2c   : > { %388 = vmatmul.mubr.bf16.vlgmr.msra.gmra.mxu0 %v663_v18  ;;  %404 = vmatmul.mubr.bf16.vlgmr.msra.gmra.mxu1 %v666_v19 }
  0x2d   : > { %395 = vmatprep.mubr.bf16.mxu0 %v669_v20  ;;  %411 = vmatprep.mubr.bf16.mxu1 %v671_v21 }
  0x34   : > { %396 = vmatmul.mubr.bf16.gmra.mxu0 %v673_v22  ;;  %412 = vmatmul.mubr.bf16.gmra.mxu1 %v674_v23 }
  0xec   : > { %v597_v25 = vpop.f32.mrf.mxu0  ;;  %v609_v26 = vpop.f32.mrf.mxu1 }
  0xee   : > { %v598_v27 = vpop.f32.mrf.mxu0  ;;  %v610_v28 = vpop.f32.mrf.mxu1 }
  0xef   : > { %v599_v29 = vadd.f32 %v598_v27, %v597_v25  ;;  %v611_v40 = vadd.f32 %v610_v28, %v609_v26 }
  0xf0   : > { %v600_v31 = vpop.f32.mrf.mxu0  ;;  %v612_v32 = vpop.f32.mrf.mxu1 }
  0xf1   : > { %v390_v35 = vadd.f32 %v599_v29, %v553_v30  ;;  %v406_v56 = vadd.f32 %v611_v40, %v553_v30 }
  0xf2   : > { %v601_v33 = vpop.f32.mrf.mxu0  ;;  %v613_v34 = vpop.f32.mrf.mxu1 }
  0xf3   : > { %v602_v36 = vadd.f32 %v601_v33, %v600_v31  ;;  %v614_v41 = vadd.f32 %v613_v34, %v612_v32  ;;  %v420_v44 = vmax.f32 %v390_v35, 0.0  ;;  %v424_v3 = vmax.f32 %v406_v56, 0.0 }
  0xf4   : > { %v603_v37 = vpop.f32.mrf.mxu0  ;;  %v615_v38 = vpop.f32.mrf.mxu1 }
  0xf5   : > { %v393_v39 = vadd.f32 %v602_v36, %v553_v30  ;;  %v409_v53 = vadd.f32 %v614_v41, %v553_v30 }
  0xf6   : > { %v604_v42 = vpop.f32.mrf.mxu0  ;;  %v616_v43 = vpop.f32.mrf.mxu1 }
  0xf7   : > { %v421_v45 = vmax.f32 %v393_v39, 0.0  ;;  %v605_v46 = vadd.f32 %v604_v42, %v603_v37  ;;  %v617_v47 = vadd.f32 %v616_v43, %v615_v38  ;;  %v425_v0 = vmax.f32 %v409_v53, 0.0 }
  0xf8   : > { %v606_v48 = vpop.f32.mrf.mxu0  ;;  %v618_v49 = vpop.f32.mrf.mxu1 }
  0xf9   : > { %v435_v50 = vmax.f32 %v420_v44, %v421_v45  ;;  %v398_v51 = vadd.f32 %v605_v46, %v553_v30  ;;  %v414_v52 = vadd.f32 %v617_v47, %v553_v30 }
  0xfa   : > { %v607_v54 = vpop.f32.mrf.mxu0  ;;  %v619_v55 = vpop.f32.mrf.mxu1 }
  0xfb   : > { %v437_v57 = vrot.slane %v435_v50, 1  ;;  %v422_v58 = vmax.f32 %v398_v51, 0.0  ;;  %v426_v59 = vmax.f32 %v414_v52, 0.0  ;;  %v608_v60 = vadd.f32 %v607_v54, %v606_v48 }
  0xfc   : > { %v620_v61 = vadd.f32 %v619_v55, %v618_v49  ;;  %v442_v63 = vrot.slane %v435_v50, 2 }
  0xfd   : > { %v439_v62 = vmax.f32 %v435_v50, %v437_v57  ;;  %v401_v1 = vadd.f32 %v608_v60, %v553_v30  ;;  %v451_v5 = vmax.f32 %v421_v45, %v422_v58  ;;  %v477_v6 = vmax.f32 %v425_v0, %v426_v59 }
  0xfe   : > { %v417_v2 = vadd.f32 %v620_v61, %v553_v30 }
  0xff   : > { %441 = vst.msk [vmem:[%s780_s28 + $0x7] sm:$0x1] %vm440_vm2, %v439_v62  ;;  %v444_v4 = vmax.f32 %v439_v62, %v442_v63  ;;  %v423_v7 = vmax.f32 %v401_v1, 0.0 }
 0x100   : > { %v427_v8 = vmax.f32 %v417_v2, 0.0 }
 0x101   : > { %446 = vst.msk [vmem:[%s780_s28 + $0x7] sm:$0x2] %vm445_vm3, %v444_v4  ;;  %v452_v9 = vmax.f32 %v451_v5, %v423_v7  ;;  %v464_v10 = vmax.f32 %v423_v7, %v424_v3 }
 0x102   : > { %448 = vst.msk [vmem:[%s780_s28 + $0x6] sm:$0x8] %vm447_vm4, %v444_v4  ;;  %v478_v11 = vmax.f32 %v477_v6, %v427_v8 }
 0x103   : > { %450 = vst.msk [vmem:[%s780_s28 + $0x5] sm:$0x20] %vm449_vm5, %v444_v4  ;;  %v454_v12 = vrot.slane %v452_v9, 1  ;;  %v465_v13 = vmax.f32 %v464_v10, %v425_v0  ;;  %v458_v15 = vrot.slane %v452_v9, 2 }
 0x104   : > { %v480_v14 = vrot.slane %v478_v11, 1  ;;  %v484_v19 = vrot.slane %v478_v11, 2 }
 0x105   : > { %v456_v16 = vmax.f32 %v452_v9, %v454_v12  ;;  %v467_v17 = vrot.slane %v465_v13, 1  ;;  %v471_v22 = vrot.slane %v465_v13, 2 }
 0x106   : > { %v482_v18 = vmax.f32 %v478_v11, %v480_v14 }
 0x107   : > { %457 = vst.msk [vmem:[%s780_s28 + $0xd] sm:$0x1] %vm440_vm2, %v456_v16  ;;  %v460_v20 = vmax.f32 %v456_v16, %v458_v15  ;;  %v469_v21 = vmax.f32 %v465_v13, %v467_v17 }
 0x108   : > { %483 = vst.msk [vmem:[%s780_s28 + $0x19] sm:$0x1] %vm440_vm2, %v482_v18  ;;  %v486_v23 = vmax.f32 %v482_v18, %v484_v19 }
 0x109   : > { %461 = vst.msk [vmem:[%s780_s28 + $0xd] sm:$0x2] %vm445_vm3, %v460_v20  ;;  %v473_v24 = vmax.f32 %v469_v21, %v471_v22 }
 0x10a   : > { %462 = vst.msk [vmem:[%s780_s28 + $0xc] sm:$0x8] %vm447_vm4, %v460_v20  ;;  %488 = vst.msk [vmem:[%s780_s28 + $0x18] sm:$0x8] %vm447_vm4, %v486_v23 }
 0x10b   : > { %463 = vst.msk [vmem:[%s780_s28 + $0xb] sm:$0x20] %vm449_vm5, %v460_v20  ;;  %489 = vst.msk [vmem:[%s780_s28 + $0x17] sm:$0x20] %vm449_vm5, %v486_v23 }
 0x10c   : > { %470 = vst.msk [vmem:[%s780_s28 + $0x13] sm:$0x1] %vm440_vm2, %v469_v21 }
 0x10d   : > { %487 = vst.msk [vmem:[%s780_s28 + $0x19] sm:$0x2] %vm445_vm3, %v486_v23  ;;  %474 = vst.msk [vmem:[%s780_s28 + $0x13] sm:$0x2] %vm445_vm3, %v473_v24 }
 0x10e   : > { %475 = vst.msk [vmem:[%s780_s28 + $0x12] sm:$0x8] %vm447_vm4, %v473_v24 }
 0x10f   : > { %476 = vst.msk [vmem:[%s780_s28 + $0x11] sm:$0x20] %vm449_vm5, %v473_v24 }
 0x110 PF: > { %s13_s12 = sadd.s32 1, %s681_s12  }
 0x111   : > { %p10_p4 = scmp.ge.s32.totalorder %s13_s12, 4  }
 0x113   :  { %12 = sbr.rel (!%p10_p4) target bundleno = 1 (0x1), region = 62 }

// kernel: resnet_forward.3
= control target key start
LH: loop header
LB: loop body
LE: loop exit
PB: predicated region body
PF: predicated region fallthrough
CT: control target
= control target key end

     0   :  { %s7709_s15 = smov 0   ;;  %s8898_s0 = inlined_call_operand.vmem [shape: f32[2,36,64], index: 0, kind: input, shape index: {}]   ;;  %s8899_s1 = inlined_call_operand.vmem [shape: bf16[3,2,9,64,64], index: 1, kind: input, shape index: {}]   ;;  %s8900_s2 = inlined_call_operand.vmem [shape: f32[3,2,1,64], index: 2, kind: input, shape index: {}]   ;;  %s8901_s3 = inlined_call_operand.vmem [shape: f32[22,64], index: 3, kind: input, shape index: {}]   ;;  %s8902_s4 = inlined_call_operand.vmem [shape: f32[2,36,64], index: 4, kind: output, shape index: {}]  }
   0x1 LB: > { %s5699_s16 = sadd.s32 4294967295, %s7681_s15   ;;  %p5703_p0 = scmp.ge.s32.totalorder %s7681_s15, 1  ;;  %s7681_s15 = sphi %s7709_s15, %s14_s15  }
   0x2   : > { %p162_p1 = scmp.lt.s32.totalorder %s7681_s15, 3 }
   0x4   : > { %p163_p2 = pnand %p5703_p0, %p162_p1 }
   0x5   : > { %p188_p3 = scmp.lt.s32.totalorder (!%p163_p2), %s5699_s16, 1 }
   0x6   : > { %166 = sbr.rel (%p163_p2) target bundleno = 1765 (0x6e5), region = 36 }
   0xb   : > { %v7449_v0 = vld [vmem:[%s8899_s1 + $0x38] sm:$0xff]   ;;  %v7451_v2 = vld [vmem:[%s8899_s1 + $0x30] sm:$0xff]   ;;  %s8904_s16 = smov (!%p188_p3, %s5699_s16), 1  ;;  %v7453_v4 = vld [vmem:[%s8899_s1 + $0x28] sm:$0xff]   ;;  %vm204_vm0 = vcmask 523264   ;;  %vm424_vm2 = vcmask 1046528  }
   0xc   : > { %v7450_v1 = vld [vmem:[%s8899_s1 + $0x18] sm:$0xff]   ;;  %6791 = vmatprep.subr.bf16.mxu0 %v7449_v0  ;;  %v7452_v3 = vld [vmem:[%s8899_s1 + $0x10] sm:$0xff]   ;;  %s7439_s27 = smul.u32 40, %s8904_s16  ;;  %v7454_v5 = vld [vmem:[%s8899_s1 + $0x8] sm:$0xff]   ;;  %vm243_vm1 = vsmask.f32 7424 }
   0xd   : > { %6792 = vmatpush3.bf16.msra.mxu0 %v7449_v0  ;;  %6803 = vmatprep.subr.bf16.mxu1 %v7450_v1  ;;  %v7455_v6 = vld [vmem:[%s8899_s1 + $0x20] sm:$0xff]   ;;  %v7457_v11 = vld [vmem:[%s8899_s1 + $0x58] sm:$0xff]   ;;  %v7460_v18 = vld [vmem:[%s8899_s1 + $0x70] sm:$0xff]   ;;  %vm520_vm3 = vcmask 1044480   ;;  %vm614_vm4 = vsmask.f32 4352 }
   0xe   : > { %6804 = vmatpush3.bf16.msra.mxu1 %v7450_v1  ;;  %6793 = vmatprep.subr.bf16.mxu0 %v7451_v2  ;;  %s7743_s6 = scalar_lea.vmem %s8898_s0, %s7439_s27  ;;  %v7456_v10 = vld [vmem:[%s8899_s1] sm:$0xff]   ;;  %v7458_v12 = vld [vmem:[%s8899_s1 + $0x78] sm:$0xff]   ;;  %v7462_v24 = vld [vmem:[%s8899_s1 + $0x68] sm:$0xff]   ;;  %vm209_vm5 = vcmask 519168   ;;  %vm906_vm6 = vsmask.f32 5376  ;;  %s7848_s24 = scalar_lea.vmem %s8902_s4, %s7439_s27 }
   0xf   : > { %6805 = vmatprep.subr.bf16.mxu1 %v7452_v3  ;;  %v199_v7 = vld [vmem:[%s7743_s6] sm:$0xff]  ;;  %v200_v8 = vld [vmem:[%s7743_s6 + $0x8] sm:$0xff]  ;;  %v201_v9 = vld [vmem:[%s7743_s6 + $0x10] sm:$0xff]  ;;  %vm812_vm7 = vcmask 1045504   ;;  %vm1115_vm8 = vcmask 521216   ;;  %vm2005_vm9 = vcmask 1040384  }
  0x10   : > { %205 = vst.msk [vmem:[#allocation2] sm:$0xff] %vm204_vm0, %v199_v7  ;;  %206 = vst.msk [vmem:[#allocation2 + $0x8] sm:$0xff] %vm204_vm0, %v200_v8  ;;  %v202_v23 = vld [vmem:[%s7743_s6 + $0x18] sm:$0xff]  ;;  %v7459_v32 = vld [vmem:[%s8899_s1 + $0x50] sm:$0xff]  }
  0x11   : > { %6794 = vmatpush3.bf16.msra.mxu0 %v7451_v2  ;;  %207 = vst.msk [vmem:[#allocation2 + $0x10] sm:$0xff] %vm204_vm0, %v201_v9  ;;  %208 = vst.msk [vmem:[#allocation2 + $0x18] sm:$0xff] %vm204_vm0, %v202_v23  ;;  %v7464_v34 = vld [vmem:[%s8899_s1 + $0x60] sm:$0xff]   ;;  %v7461_v38 = vld [vmem:[%s8899_s1 + $0x48] sm:$0xff]  }
  0x12   : > { %6806 = vmatpush3.bf16.msra.mxu1 %v7452_v3  ;;  %6795 = vmatprep.subr.bf16.mxu0 %v7453_v4  ;;  %v7466_v40 = vld [vmem:[%s8899_s1 + $0xb8] sm:$0xff]   ;;  %v7463_v43 = vld [vmem:[%s8899_s1 + $0x40] sm:$0xff]   ;;  %v7468_v50 = vld [vmem:[%s8899_s1 + $0xb0] sm:$0xff]  }
  0x13   : > { %6807 = vmatprep.subr.bf16.mxu1 %v7454_v5  ;;  %v203_v52 = vld [vmem:[%s7743_s6 + $0x20] sm:$0xf]  ;;  %v7465_v54 = vld [vmem:[%s8899_s1 + $0x98] sm:$0xff]   ;;  %v7470_v57 = vld [vmem:[%s8899_s1 + $0xa8] sm:$0xff]  }
  0x14   : > { %210 = vst.msk [vmem:[#allocation2 + $0x20] sm:$0xf] %vm209_vm5, %v203_v52  ;;  %v7467_v58 = vld [vmem:[%s8899_s1 + $0x90] sm:$0xff]   ;;  %v7472_v61 = vld [vmem:[%s8899_s1 + $0xa0] sm:$0xff]   ;;  %v7469_v1 = vld [vmem:[%s8899_s1 + $0x88] sm:$0xff]  }
  0x15   : > { %6796 = vmatpush3.bf16.msra.mxu0 %v7453_v4  ;;  %v7474_v2 = vld [vmem:[%s8899_s1 + $0xf8] sm:$0xff]   ;;  %v7477_v23 = vld [vmem:[%s8899_s1 + $0xc8] sm:$0xff]  }
  0x16   : > { %6808 = vmatpush3.bf16.msra.mxu1 %v7454_v5  ;;  %6797 = vmatprep.subr.bf16.mxu0 %v7455_v6 }
  0x17   : > { %6809 = vmatprep.subr.bf16.mxu1 %v7456_v10  ;;  %v219_v13 = vld [vmem:[#allocation2] sm:$0xff]  ;;  %v220_v14 = vld [vmem:[#allocation2 + $0x8] sm:$0xff] }
  0x18   : > { %v221_v15 = vld [vmem:[#allocation2 + $0x10] sm:$0xff]  ;;  %v224_v16 = vpack.c.bf16 %v220_v14, %v219_v13  ;;  %v7791_v35 = vld [vmem:[#allocation2 + $0x18] sm:$0xff] }
  0x19   : > { %6798 = vmatpush3.bf16.msra.mxu0 %v7455_v6  ;;  %v7763_v17 = vpack.c.bf16 %v221_v15, %v221_v15  ;;  %v509_v36 = vpack.c.bf16 %v7791_v35, %v221_v15  ;;  %v7805_v49 = vpack.c.bf16 %v221_v15, %v220_v14  ;;  %v7471_v6 = vld [vmem:[%s8899_s1 + $0x80] sm:$0xff]  }
  0x1a   : > { %6810 = vmatpush3.bf16.msra.mxu1 %v7456_v10  ;;  %6815 = vmatprep.subr.bf16.mxu0 %v7457_v11  ;;  %v245_v19 = vshrl.u32 %v224_v16, 16  ;;  %v247_v20 = vshll.u32 %v224_v16, 16  ;;  %v425_v27 = vrot.slane %v224_v16, 1  ;;  %v521_v37 = vrot.slane %v224_v16, 3 }
  0x1b   : > { %6827 = vmatprep.subr.bf16.mxu1 %v7458_v12  ;;  %v252_v21 = vshll.u32 %v7763_v17, 16  ;;  %v256_v22 = vshrl.u32 %v7763_v17, 16  ;;  %6811 = vmatprep.mubr.msk.bf16.mxu1 %vm204_vm0, %v224_v16  ;;  %v426_v28 = vrot.slane %v7763_v17, 1  ;;  %v522_v39 = vrot.slane %v509_v36, 3  ;;  %v223_v3 = vld [vmem:[#allocation2 + $0x20] sm:$0xf] }
  0x1c   : > { %v249_v25 = vrot.slane %v247_v20, 1  ;;  %v619_v41 = vshrl.u32 %v509_v36, 16  ;;  %v622_v42 = vshll.u32 %v509_v36, 16  ;;  %v615_v44 = vrot.slane %v245_v19, 3  ;;  %v5638_v4 = vld [vmem:[#allocation2 + $0x20] sm:$0xf] }
  0x1d   : > { %6812 = vmatmul.mubr.msk.bf16.vlgmr.msra.gmra.mxu1 %vm204_vm0, %v7763_v17  ;;  %v254_v26 = vrot.slane %v252_v21, 1  ;;  %v427_v33 = vsel %vm424_vm2, %v425_v27, %v426_v28  ;;  %v523_v45 = vsel %vm520_vm3, %v521_v37, %v522_v39  ;;  %v616_v46 = vrot.slane %v247_v20, 4  ;;  %5643 = vst.msk [vmem:[%s7848_s24 + $0x20] sm:$0xf] %vm209_vm5, %v5638_v4  ;;  %v7473_v16 = vld [vmem:[%s8899_s1 + $0xd8] sm:$0xff]   ;;  %v7475_v20 = vld [vmem:[%s8899_s1 + $0xd0] sm:$0xff]  }
  0x1e   : > { %6828 = vmatpush3.bf16.msra.mxu1 %v7458_v12  ;;  %v250_v29 = vor.u32 %v249_v25, %v245_v19  ;;  %v621_v47 = vrot.slane %v619_v41, 3  ;;  %v624_v48 = vrot.slane %v622_v42, 4  ;;  %6835 = vmatprep.mubr.msk.bf16.mxu1 %vm204_vm0, %v523_v45  ;;  %v907_v51 = vshrl.u32 %v7805_v49, 16  ;;  %v7476_v12 = vld [vmem:[%s8899_s1 + $0xf0] sm:$0xff]   ;;  %v7480_v21 = vld [vmem:[%s8899_s1 + $0xe0] sm:$0xff]   ;;  %v7481_v25 = vld [vmem:[%s8899_s1 + $0x118] sm:$0xff]  }
  0x1f   : > { %6829 = vmatprep.subr.bf16.mxu1 %v7460_v18  ;;  %v258_v30 = vor.u32 %v256_v22, %v254_v26  ;;  %v910_v53 = vshll.u32 %v7805_v49, 16  ;;  %v617_v55 = vor.u32 %v616_v46, %v615_v44  ;;  %v813_v59 = vrot.slane %v7805_v49, 2  ;;  %v7490_v36 = vld [vmem:[%s8899_s1 + $0x120] sm:$0xff]   ;;  %v7491_v37 = vld [vmem:[%s8899_s1 + $0x148] sm:$0xff]  }
  0x20   : > { %v255_v31 = vsel %vm243_vm1, %v250_v29, %v254_v26  ;;  %v625_v56 = vor.u32 %v624_v48, %v621_v47  ;;  %v909_v60 = vrot.slane %v907_v51, 2  ;;  %v1013_v63 = vrot.slane %v7805_v49, 3  ;;  %v7482_v26 = vld [vmem:[%s8899_s1 + $0x110] sm:$0xff]   ;;  %v7484_v29 = vld [vmem:[%s8899_s1 + $0x100] sm:$0xff]  }
  0x21   : > { %6799 = vmatprep.mubr.msk.bf16.mxu0 %vm204_vm0, %v255_v31  ;;  %v912_v62 = vrot.slane %v910_v53, 3  ;;  %v7851_v5 = vpack.c.bf16 %v223_v3, %v7791_v35  ;;  %v7485_v31 = vld [vmem:[%s8899_s1 + $0x138] sm:$0xff]  }
  0x22   : > { %6830 = vmatpush3.bf16.msra.mxu1 %v7460_v18  ;;  %6800 = vmatmul.mubr.msk.bf16.vlgmr.msra.gmra.mxu0 %vm204_vm0, %v258_v30  ;;  %v626_v0 = vsel %vm614_vm4, %v617_v55, %v625_v56  ;;  %v7478_v18 = vld [vmem:[%s8899_s1 + $0xe8] sm:$0xff]   ;;  %v7683_v30 = vmov 0.0  }
  0x23   : > { %6831 = vmatprep.subr.bf16.mxu1 %v7462_v24  ;;  %6816 = vmatpush3.bf16.msra.mxu0 %v7457_v11  ;;  %v814_v7 = vrot.slane %v7851_v5, 2  ;;  %v915_v8 = vshrl.u32 %v7851_v5, 16  ;;  %v918_v9 = vshll.u32 %v7851_v5, 16  ;;  %v1014_v10 = vrot.slane %v7851_v5, 3  ;;  %213 = vst.msk [vmem:[#allocation3 + $0x10] sm:$0xff] %vm204_vm0, %v7683_v30  ;;  %214 = vst.msk [vmem:[#allocation3 + $0x18] sm:$0xff] %vm204_vm0, %v7683_v30 }
  0x24   : > { %6823 = vmatprep.mubr.msk.bf16.mxu0 %vm204_vm0, %v427_v33  ;;  %6817 = vmatprep.subr.bf16.mxu0 %v7459_v32  ;;  %v709_v11 = vpack.c.bf16 %v7791_v35, %v7791_v35  ;;  %v913_v13 = vor.u32 %v912_v62, %v909_v60  ;;  %215 = vst.msk [vmem:[#allocation3 + $0x20] sm:$0xf] %vm209_vm5, %v7683_v30  ;;  %v7487_v33 = vld [vmem:[%s8899_s1 + $0x158] sm:$0xff]   ;;  %v7489_v35 = vld [vmem:[%s8899_s1 + $0x150] sm:$0xff]  }
  0x25   : > { %v917_v14 = vrot.slane %v915_v8, 2  ;;  %v920_v15 = vrot.slane %v918_v9, 3  ;;  %v815_v22 = vsel %vm812_vm7, %v813_v59, %v814_v7  ;;  %v1015_v27 = vsel %vm520_vm3, %v1013_v63, %v1014_v10  ;;  %211 = vst.msk [vmem:[#allocation3] sm:$0xff] %vm204_vm0, %v7683_v30  ;;  %212 = vst.msk [vmem:[#allocation3 + $0x8] sm:$0xff] %vm204_vm0, %v7683_v30 }
  0x26   : > { %6832 = vmatpush3.bf16.msra.mxu1 %v7462_v24  ;;  %v7479_v24 = vld [vmem:[%s8899_s1 + $0xc0] sm:$0xff]  }
  0x27   : > { %6833 = vmatprep.subr.bf16.mxu1 %v7464_v34  ;;  %6818 = vmatpush3.bf16.msra.mxu0 %v7459_v32  ;;  %v921_v17 = vor.u32 %v920_v15, %v917_v14  ;;  %v7486_v32 = vld [vmem:[%s8899_s1 + $0x130] sm:$0xff]  }
  0x28   : > { %6819 = vmatprep.subr.bf16.mxu0 %v7461_v38 }
  0x29   : > { %v922_v19 = vsel %vm906_vm6, %v913_v13, %v921_v17 }
  0x2a   : > { %6834 = vmatpush3.bf16.msra.mxu1 %v7464_v34  ;;  %v7488_v34 = vld [vmem:[%s8899_s1 + $0x128] sm:$0xff]  }
  0x2b   : > { %6851 = vmatprep.subr.bf16.mxu1 %v7466_v40  ;;  %6820 = vmatpush3.bf16.msra.mxu0 %v7461_v38  ;;  %v7939_v38 = vld [vmem:[%s8899_s1 + $0x198] sm:$0xff]  }
  0x2c   : > { %6821 = vmatprep.subr.bf16.mxu0 %v7463_v43 }
  0x2d   : > { %6836 = vmatmul.mubr.msk.bf16.vlgmr.msra.gmra.mxu1 %vm204_vm0, %v522_v39  ;;  %v7493_v39 = vld [vmem:[%s8899_s1 + $0x140] sm:$0xff]  }
  0x2e   : > { %6852 = vmatpush3.bf16.msra.mxu1 %v7466_v40  ;;  %6859 = vmatprep.mubr.msk.bf16.mxu1 %vm204_vm0, %v7805_v49  ;;  %v7948_v40 = vld [vmem:[%s8899_s1 + $0x178] sm:$0xff]  }
  0x2f   : > { %6853 = vmatprep.subr.bf16.mxu1 %v7468_v50  ;;  %6822 = vmatpush3.bf16.msra.mxu0 %v7463_v43 }
  0x30   : > { %6839 = vmatprep.subr.bf16.mxu0 %v7465_v54 }
  0x32   : > { %6854 = vmatpush3.bf16.msra.mxu1 %v7468_v50  ;;  %6824 = vmatmul.mubr.msk.bf16.vlgmr.msra.gmra.mxu0 %vm204_vm0, %v426_v28  ;;  %v7483_v28 = vld [vmem:[%s8899_s1 + $0x108] sm:$0xff]  }
  0x33   : > { %6855 = vmatprep.subr.bf16.mxu1 %v7470_v57  ;;  %6840 = vmatpush3.bf16.msra.mxu0 %v7465_v54 }
  0x34   : > { %6847 = vmatprep.mubr.msk.bf16.mxu0 %vm204_vm0, %v626_v0  ;;  %6841 = vmatprep.subr.bf16.mxu0 %v7467_v58 }
  0x36   : > { %6856 = vmatpush3.bf16.msra.mxu1 %v7470_v57 }
  0x37   : > { %6857 = vmatprep.subr.bf16.mxu1 %v7472_v61  ;;  %6842 = vmatpush3.bf16.msra.mxu0 %v7467_v58 }
  0x38   : > { %6843 = vmatprep.subr.bf16.mxu0 %v7469_v1 }
  0x3a   : > { %6858 = vmatpush3.bf16.msra.mxu1 %v7472_v61 }
  0x3b   : > { %6875 = vmatprep.subr.bf16.mxu1 %v7474_v2  ;;  %6844 = vmatpush3.bf16.msra.mxu0 %v7469_v1 }
  0x3c   : > { %6845 = vmatprep.subr.bf16.mxu0 %v7471_v6 }
  0x3d   : > { %6860 = vmatmul.mubr.msk.bf16.vlgmr.msra.gmra.mxu1 %vm204_vm0, %v709_v11 }
  0x3e   : > { %6876 = vmatpush3.bf16.msra.mxu1 %v7474_v2  ;;  %6883 = vmatprep.mubr.msk.bf16.mxu1 %vm204_vm0, %v922_v19 }
  0x3f   : > { %6877 = vmatprep.subr.bf16.mxu1 %v7476_v12  ;;  %6846 = vmatpush3.bf16.msra.mxu0 %v7471_v6 }
  0x40   : > { %6863 = vmatprep.subr.bf16.mxu0 %v7473_v16 }
  0x42   : > { %6878 = vmatpush3.bf16.msra.mxu1 %v7476_v12  ;;  %6848 = vmatmul.mubr.msk.bf16.vlgmr.msra.gmra.mxu0 %vm204_vm0, %v625_v56 }
  0x43   : > { %6879 = vmatprep.subr.bf16.mxu1 %v7478_v18  ;;  %6864 = vmatpush3.bf16.msra.mxu0 %v7473_v16 }
  0x44   : > { %6871 = vmatprep.mubr.msk.bf16.mxu0 %vm204_vm0, %v815_v22  ;;  %6865 = vmatprep.subr.bf16.mxu0 %v7475_v20 }
  0x46   : > { %6880 = vmatpush3.bf16.msra.mxu1 %v7478_v18 }
  0x47   : > { %6881 = vmatprep.subr.bf16.mxu1 %v7480_v21  ;;  %6866 = vmatpush3.bf16.msra.mxu0 %v7475_v20 }
  0x48   : > { %6867 = vmatprep.subr.bf16.mxu0 %v7477_v23 }
  0x4a   : > { %6882 = vmatpush3.bf16.msra.mxu1 %v7480_v21 }
  0x4b   : > { %6868 = vmatpush3.bf16.msra.mxu0 %v7477_v23  ;;  %6899 = vmatprep.subr.bf16.mxu1 %v7487_v33 }
  0x4c   : > { %6869 = vmatprep.subr.bf16.mxu0 %v7479_v24 }
  0x4d   : > { %6884 = vmatmul.mubr.msk.bf16.vlgmr.msra.gmra.mxu1 %vm204_vm0, %v921_v17 }
  0x4e   : > { %6900 = vmatpush3.bf16.msra.mxu1 %v7487_v33 }
  0x4f   : > { %6870 = vmatpush3.bf16.msra.mxu0 %v7479_v24  ;;  %6901 = vmatprep.subr.bf16.mxu1 %v7489_v35 }
  0x50   : > { %6887 = vmatprep.subr.bf16.mxu0 %v7481_v25 }
  0x52   : > { %6872 = vmatmul.mubr.msk.bf16.vlgmr.msra.gmra.mxu0 %vm204_vm0, %v814_v7  ;;  %6902 = vmatpush3.bf16.msra.mxu1 %v7489_v35  ;;  %v7957_v35 = vld [vmem:[%s8901_s3 + $0x10] sm:$0x3f] }
  0x53   : > { %6888 = vmatpush3.bf16.msra.mxu0 %v7481_v25  ;;  %6895 = vmatprep.mubr.msk.bf16.mxu0 %vm204_vm0, %v1015_v27  ;;  %v5824_v27 = vld [vmem:[%s8900_s2] ss:$0 sm:$0xff] }
  0x54   : > { %6889 = vmatprep.subr.bf16.mxu0 %v7482_v26  ;;  %6903 = vmatprep.subr.bf16.mxu1 %v7491_v37 }
  0x56   : > { %6904 = vmatpush3.bf16.msra.mxu1 %v7491_v37 }
  0x57   : > { %6890 = vmatpush3.bf16.msra.mxu0 %v7482_v26  ;;  %6905 = vmatprep.subr.bf16.mxu1 %v7493_v39 }
  0x58   : > { %6891 = vmatprep.subr.bf16.mxu0 %v7483_v28 }
  0x5a   : > { %6906 = vmatpush3.bf16.msra.mxu1 %v7493_v39 }
  0x5b   : > { %6892 = vmatpush3.bf16.msra.mxu0 %v7483_v28  ;;  %6923 = vmatprep.subr.bf16.mxu1 %v7948_v40 }
  0x5c   : > { %6893 = vmatprep.subr.bf16.mxu0 %v7484_v29 }
  0x5f   : > { %6894 = vmatpush3.bf16.msra.mxu0 %v7484_v29 }
  0x60   : > { %6911 = vmatprep.subr.bf16.mxu0 %v7485_v31 }
  0x62   : > { %6896 = vmatmul.mubr.msk.bf16.vlgmr.msra.gmra.mxu0 %vm204_vm0, %v1014_v10 }
  0x63   : > { %6912 = vmatpush3.bf16.msra.mxu0 %v7485_v31 }
  0x64   : > { %6913 = vmatprep.subr.bf16.mxu0 %v7486_v32 }
  0x67   : > { %6914 = vmatpush3.bf16.msra.mxu0 %v7486_v32 }
  0x68   : > { %6915 = vmatprep.subr.bf16.mxu0 %v7488_v34 }
  0x6b   : > { %6916 = vmatpush3.bf16.msra.mxu0 %v7488_v34 }
  0x6c   : > { %6917 = vmatprep.subr.bf16.mxu0 %v7490_v36 }
  0x6f   : > { %6918 = vmatpush3.bf16.msra.mxu0 %v7490_v36 }
  0x70   : > { %6935 = vmatprep.subr.bf16.mxu0 %v7939_v38 }
  0xdd   : > { %v6813_v41 = vpop.f32.mrf.mxu1 }
  0xdf   : > { %v399_v42 = vpop.f32.mrf.mxu1 }
  0xe1   : > { %v6814_v43 = vpop.f32.mrf.mxu1 }
  0xe2   : > { %v6801_v44 = vpop.f32.mrf.mxu0 }
  0xe3   : > { %v402_v47 = vpop.f32.mrf.mxu1  ;;  %v408_v2 = vadd.f32 %v6813_v41, %v6801_v44 }
  0xe4   : > { %v323_v45 = vpop.f32.mrf.mxu0 }
  0xe5   : > { %v400_v5 = vadd.f32 %v399_v42, %v323_v45  ;;  %v7962_v42 = vld [vmem:[%s8901_s3] sm:$0xff] }
  0xe6   : > { %v6802_v46 = vpop.f32.mrf.mxu0 }
  0xe8   : > { %v326_v51 = vpop.f32.mrf.mxu0 }
  0xe9   : > { %v403_v10 = vadd.f32 %v402_v47, %v326_v51 }
  0xed   : > { %v6837_v48 = vpop.f32.mrf.mxu1 }
  0xef   : > { %v588_v49 = vpop.f32.mrf.mxu1 }
  0xf1   : > { %v6838_v50 = vpop.f32.mrf.mxu1 }
  0xf2   : > { %v6825_v52 = vpop.f32.mrf.mxu0 }
  0xf3   : > { %v591_v55 = vpop.f32.mrf.mxu1  ;;  %v508_v6 = vadd.f32 %v6825_v52, %v408_v2 }
  0xf4   : > { %v492_v53 = vpop.f32.mrf.mxu0 }
  0xf5   : > { %v506_v8 = vadd.f32 %v492_v53, %v400_v5  ;;  %v604_v11 = vadd.f32 %v6837_v48, %v508_v6 }
  0xf6   : > { %v6826_v54 = vpop.f32.mrf.mxu0 }
  0xf7   : > { %v602_v13 = vadd.f32 %v588_v49, %v506_v8  ;;  %v7970_v49 = vld [vmem:[%s8901_s3 + $0x8] sm:$0xff] }
  0xf8   : > { %v495_v59 = vpop.f32.mrf.mxu0 }
  0xf9   : > { %v507_v14 = vadd.f32 %v495_v59, %v403_v10  ;;  %v7494_v59 = vld [vmem:[%s8899_s1 + $0x190] sm:$0xff]  }
  0xfa   : > { %v7497_v10 = vld [vmem:[%s8899_s1 + $0x170] sm:$0xff]  }
  0xfb   : > { %v603_v17 = vadd.f32 %v591_v55, %v507_v14  ;;  %v7500_v14 = vld [vmem:[%s8899_s1 + $0x1d8] sm:$0xff]  }
  0xfd   : > { %v6861_v56 = vpop.f32.mrf.mxu1 }
  0xff   : > { %v783_v57 = vpop.f32.mrf.mxu1 }
 0x101   : > { %v6862_v58 = vpop.f32.mrf.mxu1 }
 0x102   : > { %v6849_v60 = vpop.f32.mrf.mxu0 }
 0x103   : > { %v786_v63 = vpop.f32.mrf.mxu1  ;;  %v707_v15 = vadd.f32 %v6849_v60, %v604_v11  ;;  %v7498_v11 = vld [vmem:[%s8899_s1 + $0x180] sm:$0xff]  }
 0x104   : > { %v691_v61 = vpop.f32.mrf.mxu0 }
 0x105   : > { %v705_v16 = vadd.f32 %v691_v61, %v602_v13  ;;  %v799_v18 = vadd.f32 %v6861_v56, %v707_v15  ;;  %v7499_v13 = vld [vmem:[%s8899_s1 + $0x168] sm:$0xff]  }
 0x106   : > { %v6850_v62 = vpop.f32.mrf.mxu0 }
 0x107   : > { %v797_v19 = vadd.f32 %v783_v57, %v705_v16 }
 0x108   : > { %v694_v4 = vpop.f32.mrf.mxu0 }
 0x109   : > { %v706_v20 = vadd.f32 %v694_v4, %v603_v17  ;;  %v7496_v4 = vld [vmem:[%s8899_s1 + $0x188] sm:$0xff]   ;;  %v7501_v17 = vld [vmem:[%s8899_s1 + $0x160] sm:$0xff]  }
 0x10b   : > { %v798_v24 = vadd.f32 %v786_v63, %v706_v20 }
 0x10d   : > { %v6885_v0 = vpop.f32.mrf.mxu1 }
 0x10f   : > { %v987_v1 = vpop.f32.mrf.mxu1 }
 0x111   : > { %v6886_v3 = vpop.f32.mrf.mxu1 }
 0x112   : > { %v6873_v7 = vpop.f32.mrf.mxu0 }
 0x113   : > { %v896_v21 = vadd.f32 %v6873_v7, %v799_v18  ;;  %v990_v31 = vpop.f32.mrf.mxu1  ;;  %v7502_v18 = vld [vmem:[%s8899_s1 + $0x1d0] sm:$0xff]  }
 0x114   : > { %v880_v9 = vpop.f32.mrf.mxu0 }
 0x115   : > { %v894_v22 = vadd.f32 %v880_v9, %v797_v19  ;;  %v1003_v25 = vadd.f32 %v6885_v0, %v896_v21 }
 0x116   : > { %v6874_v12 = vpop.f32.mrf.mxu0 }
 0x117   : > { %v1001_v28 = vadd.f32 %v987_v1, %v894_v22 }
 0x118   : > { %v883_v23 = vpop.f32.mrf.mxu0 }
 0x119   : > { %v895_v29 = vadd.f32 %v883_v23, %v798_v24  ;;  %v1121_v23 = vld [vmem:[#allocation3 + $0x20] sm:$0xf]  ;;  %v7503_v24 = vld [vmem:[%s8899_s1 + $0x1b8] sm:$0xff]  }
 0x11b   : > { %v1002_v37 = vadd.f32 %v990_v31, %v895_v29  ;;  %v7505_v31 = vld [vmem:[%s8899_s1 + $0x1b0] sm:$0xff]  }
 0x122   : > { %v6897_v26 = vpop.f32.mrf.mxu0 }
 0x123   : > { %v1096_v30 = vadd.f32 %v6897_v26, %v1003_v25  ;;  %v7504_v25 = vld [vmem:[%s8899_s1 + $0x1c8] sm:$0xff]  }
 0x124   : > { %v1080_v32 = vpop.f32.mrf.mxu0 }
 0x125   : > { %v1106_v33 = vadd.f32 %v5824_v27, %v1096_v30  ;;  %v1094_v34 = vadd.f32 %v1080_v32, %v1001_v28  ;;  %v7506_v32 = vld [vmem:[%s8899_s1 + $0x1c0] sm:$0xff]  }
 0x126   : > { %v6898_v36 = vpop.f32.mrf.mxu0 }
 0x127   : > { %v1109_v39 = vmax.f32 %v1106_v33, 0.0  ;;  %v1104_v41 = vadd.f32 %v5824_v27, %v1094_v34 }
 0x128   : > { %v1083_v43 = vpop.f32.mrf.mxu0 }
 0x129   : > { %v1112_v44 = vmul.f32 %v1109_v39, %v7957_v35  ;;  %v1107_v45 = vmax.f32 %v1104_v41, 0.0  ;;  %v1095_v46 = vadd.f32 %v1083_v43, %v1002_v37  ;;  %v7507_v41 = vld [vmem:[%s8899_s1 + $0x1a8] sm:$0xff]   ;;  %v7508_v43 = vld [vmem:[%s8899_s1 + $0x218] sm:$0xff]  }
 0x12b   : > { %1116 = vst.msk [vmem:[#allocation3 + $0x17] sm:$0x3f] %vm1115_vm8, %v1112_v44  ;;  %v1110_v47 = vmul.f32 %v1107_v45, %v7962_v42  ;;  %v1105_v48 = vadd.f32 %v5824_v27, %v1095_v46 }
 0x12d   : > { %1113 = vst.msk [vmem:[#allocation3 + $0x7] sm:$0xff] %vm204_vm0, %v1110_v47  ;;  %v1108_v50 = vmax.f32 %v1105_v48, 0.0 }
 0x12f   : > { %v1111_v51 = vmul.f32 %v1108_v50, %v7970_v49  ;;  %v7509_v50 = vld [vmem:[%s8899_s1 + $0x1a0] sm:$0xff]  }
 0x131   : > { %1114 = vst.msk [vmem:[#allocation3 + $0xf] sm:$0xff] %vm204_vm0, %v1111_v51  ;;  %v7510_v51 = vld [vmem:[%s8899_s1 + $0x210] sm:$0xff]  }
 0x132   : > { %v7975_v52 = vld [vmem:[#allocation3 + $0x18] sm:$0xff] }
 0x133   : > { %v8031_v26 = vpack.c.bf16 %v1121_v23, %v7975_v52  ;;  %v1604_v47 = vpack.c.bf16 %v7975_v52, %v7975_v52 }
 0x134   : > { %v1117_v53 = vld [vmem:[#allocation3] sm:$0xff] }
 0x135   : > { %v1808_v33 = vshrl.u32 %v8031_v26, 16  ;;  %v1811_v34 = vshll.u32 %v8031_v26, 16 }
 0x137   : > { %v1810_v44 = vrot.slane %v1808_v33, 2  ;;  %v1813_v45 = vrot.slane %v1811_v34, 3 }
 0x138   : > { %v1118_v54 = vld [vmem:[#allocation3 + $0x8] sm:$0xff]  ;;  %v1119_v55 = vld [vmem:[#allocation3 + $0x10] sm:$0xff] }
 0x139   : > { %v1122_v56 = vpack.c.bf16 %v1118_v54, %v1117_v53  ;;  %v7977_v57 = vpack.c.bf16 %v1119_v55, %v1119_v55  ;;  %v1406_v58 = vpack.c.bf16 %v7975_v52, %v1119_v55  ;;  %v1814_v48 = vor.u32 %v1813_v45, %v1810_v44  ;;  %v7511_v52 = vld [vmem:[%s8899_s1 + $0x1f8] sm:$0xff]  }
 0x13b   : > { %6919 = vmatprep.mubr.msk.bf16.mxu0 %vm204_vm0, %v1122_v56  ;;  %v1417_v60 = vrot.slane %v1122_v56, 3  ;;  %v1418_v61 = vrot.slane %v1406_v58, 3  ;;  %v1145_v62 = vshll.u32 %v1122_v56, 16  ;;  %v1150_v63 = vshll.u32 %v7977_v57, 16 }
 0x13c   : > { %6920 = vmatmul.mubr.msk.bf16.vlgmr.msra.gmra.mxu0 %vm204_vm0, %v7977_v57  ;;  %v1143_v1 = vshrl.u32 %v1122_v56, 16  ;;  %v1154_v6 = vshrl.u32 %v7977_v57, 16  ;;  %v1322_v7 = vrot.slane %v1122_v56, 1  ;;  %v1323_v8 = vrot.slane %v7977_v57, 1  ;;  %v7513_v57 = vld [vmem:[%s8899_s1 + $0x1f0] sm:$0xff]  }
 0x13d   : > { %6936 = vmatpush3.bf16.msra.mxu0 %v7939_v38  ;;  %v1419_v0 = vsel %vm520_vm3, %v1417_v60, %v1418_v61  ;;  %v1147_v2 = vrot.slane %v1145_v62, 1  ;;  %v1152_v3 = vrot.slane %v1150_v63, 1  ;;  %v1514_v15 = vshrl.u32 %v1406_v58, 16  ;;  %v7515_v60 = vld [vmem:[%s8899_s1 + $0x1e8] sm:$0xff]  }
 0x13e   : > { %6943 = vmatprep.mubr.msk.bf16.mxu0 %vm204_vm0, %v1419_v0  ;;  %6937 = vmatprep.subr.bf16.mxu0 %v7494_v59  ;;  %v1324_v12 = vsel %vm424_vm2, %v1322_v7, %v1323_v8  ;;  %v1517_v16 = vshll.u32 %v1406_v58, 16  ;;  %v1510_v19 = vrot.slane %v1143_v1, 3  ;;  %v1511_v20 = vrot.slane %v1145_v62, 4  ;;  %v7514_v58 = vld [vmem:[%s8899_s1 + $0x200] sm:$0xff]   ;;  %v7517_v62 = vld [vmem:[%s8899_s1 + $0x238] sm:$0xff]  }
 0x13f   : > { %v1148_v5 = vor.u32 %v1147_v2, %v1143_v1  ;;  %v1156_v9 = vor.u32 %v1154_v6, %v1152_v3  ;;  %v1516_v21 = vrot.slane %v1514_v15, 3  ;;  %v1708_v56 = vrot.slane %v8031_v26, 2  ;;  %v7518_v1 = vld [vmem:[%s8899_s1 + $0x230] sm:$0xff]   ;;  %v7523_v7 = vld [vmem:[%s8899_s1 + $0x278] sm:$0xff]  }
 0x140   : > { %v1519_v22 = vrot.slane %v1517_v16, 4  ;;  %v1512_v27 = vor.u32 %v1511_v20, %v1510_v19  ;;  %v1907_v0 = vrot.slane %v8031_v26, 3  ;;  %v7522_v6 = vld [vmem:[%s8899_s1 + $0x250] sm:$0xff]  }
 0x141   : > { %6938 = vmatpush3.bf16.msra.mxu0 %v7494_v59  ;;  %v1153_v38 = vsel %vm243_vm1, %v1148_v5, %v1152_v3  ;;  %v7519_v3 = vld [vmem:[%s8899_s1 + $0x228] sm:$0xff]   ;;  %v7521_v5 = vld [vmem:[%s8899_s1 + $0x258] sm:$0xff]  }
 0x142   : > { %6907 = vmatprep.mubr.msk.bf16.mxu1 %vm204_vm0, %v1153_v38  ;;  %6939 = vmatprep.subr.bf16.mxu0 %v7496_v4  ;;  %v1520_v28 = vor.u32 %v1519_v22, %v1516_v21  ;;  %v7525_v38 = vld [vmem:[%s8899_s1 + $0x270] sm:$0xff]  }
 0x143   : > { %6908 = vmatmul.mubr.msk.bf16.vlgmr.msra.gmra.mxu1 %vm204_vm0, %v1156_v9  ;;  %v7527_v9 = vld [vmem:[%s8899_s1 + $0x268] sm:$0xff]  }
 0x144   : > { %6924 = vmatpush3.bf16.msra.mxu1 %v7948_v40  ;;  %6931 = vmatprep.mubr.msk.bf16.mxu1 %vm204_vm0, %v1324_v12  ;;  %v8013_v40 = vpack.c.bf16 %v1119_v55, %v1118_v54  ;;  %v1521_v36 = vsel %vm614_vm4, %v1512_v27, %v1520_v28  ;;  %v7512_v54 = vld [vmem:[%s8899_s1 + $0x208] sm:$0xff]   ;;  %v7529_v12 = vld [vmem:[%s8899_s1 + $0x260] sm:$0xff]  }
 0x145   : > { %6940 = vmatpush3.bf16.msra.mxu0 %v7496_v4  ;;  %6925 = vmatprep.subr.bf16.mxu1 %v7497_v10  ;;  %v7520_v4 = vld [vmem:[%s8899_s1 + $0x220] sm:$0xff]  }
 0x146   : > { %6941 = vmatprep.subr.bf16.mxu0 %v7498_v11  ;;  %v1800_v29 = vshrl.u32 %v8013_v40, 16  ;;  %v1803_v30 = vshll.u32 %v8013_v40, 16  ;;  %v1707_v55 = vrot.slane %v8013_v40, 2  ;;  %v1906_v63 = vrot.slane %v8013_v40, 3 }
 0x148   : > { %6926 = vmatpush3.bf16.msra.mxu1 %v7497_v10  ;;  %v1802_v37 = vrot.slane %v1800_v29, 2  ;;  %v1805_v39 = vrot.slane %v1803_v30, 3  ;;  %v1709_v59 = vsel %vm812_vm7, %v1707_v55, %v1708_v56  ;;  %v1908_v2 = vsel %vm520_vm3, %v1906_v63, %v1907_v0  ;;  %v7526_v10 = vld [vmem:[%s8899_s1 + $0x240] sm:$0xff]  }
 0x149   : > { %6942 = vmatpush3.bf16.msra.mxu0 %v7498_v11  ;;  %6927 = vmatprep.subr.bf16.mxu1 %v7499_v13  ;;  %v8129_v11 = vld [vmem:[%s8899_s1 + $0x2b8] sm:$0xff]  }
 0x14a   : > { %6959 = vmatprep.subr.bf16.mxu0 %v7500_v14  ;;  %v1806_v46 = vor.u32 %v1805_v39, %v1802_v37 }
 0x14c   : > { %6928 = vmatpush3.bf16.msra.mxu1 %v7499_v13  ;;  %6944 = vmatmul.mubr.msk.bf16.vlgmr.msra.gmra.mxu0 %vm204_vm0, %v1418_v61  ;;  %v1815_v53 = vsel %vm906_vm6, %v1806_v46, %v1814_v48  ;;  %v7516_v61 = vld [vmem:[%s8899_s1 + $0x1e0] sm:$0xff]   ;;  %v8138_v13 = vld [vmem:[%s8899_s1 + $0x298] sm:$0xff]  }
 0x14d   : > { %6960 = vmatpush3.bf16.msra.mxu0 %v7500_v14  ;;  %6967 = vmatprep.mubr.msk.bf16.mxu0 %vm204_vm0, %v8013_v40 }
 0x14e   : > { %6929 = vmatprep.subr.bf16.mxu1 %v7501_v17  ;;  %6961 = vmatprep.subr.bf16.mxu0 %v7502_v18 }
 0x150   : > { %6930 = vmatpush3.bf16.msra.mxu1 %v7501_v17 }
 0x151   : > { %6962 = vmatpush3.bf16.msra.mxu0 %v7502_v18  ;;  %6947 = vmatprep.subr.bf16.mxu1 %v7503_v24 }
 0x152   : > { %6963 = vmatprep.subr.bf16.mxu0 %v7504_v25 }
 0x153   : > { %6932 = vmatmul.mubr.msk.bf16.vlgmr.msra.gmra.mxu1 %vm204_vm0, %v1323_v8  ;;  %v7524_v8 = vld [vmem:[%s8899_s1 + $0x248] sm:$0xff]  }
 0x154   : > { %6948 = vmatpush3.bf16.msra.mxu1 %v7503_v24  ;;  %6955 = vmatprep.mubr.msk.bf16.mxu1 %vm204_vm0, %v1521_v36 }
 0x155   : > { %6964 = vmatpush3.bf16.msra.mxu0 %v7504_v25  ;;  %6949 = vmatprep.subr.bf16.mxu1 %v7505_v31 }
 0x156   : > { %6965 = vmatprep.subr.bf16.mxu0 %v7506_v32 }
 0x158   : > { %6950 = vmatpush3.bf16.msra.mxu1 %v7505_v31 }
 0x159   : > { %6966 = vmatpush3.bf16.msra.mxu0 %v7506_v32  ;;  %6951 = vmatprep.subr.bf16.mxu1 %v7507_v41 }
 0x15a   : > { %6983 = vmatprep.subr.bf16.mxu0 %v7508_v43 }
 0x15c   : > { %6952 = vmatpush3.bf16.msra.mxu1 %v7507_v41  ;;  %6968 = vmatmul.mubr.msk.bf16.vlgmr.msra.gmra.mxu0 %vm204_vm0, %v1604_v47 }
 0x15d   : > { %6984 = vmatpush3.bf16.msra.mxu0 %v7508_v43  ;;  %6991 = vmatprep.mubr.msk.bf16.mxu0 %vm204_vm0, %v1815_v53 }
 0x15e   : > { %6953 = vmatprep.subr.bf16.mxu1 %v7509_v50  ;;  %6985 = vmatprep.subr.bf16.mxu0 %v7510_v51 }
 0x160   : > { %6954 = vmatpush3.bf16.msra.mxu1 %v7509_v50 }
 0x161   : > { %6986 = vmatpush3.bf16.msra.mxu0 %v7510_v51  ;;  %6971 = vmatprep.subr.bf16.mxu1 %v7511_v52 }
 0x162   : > { %6987 = vmatprep.subr.bf16.mxu0 %v7512_v54 }
 0x163   : > { %6956 = vmatmul.mubr.msk.bf16.vlgmr.msra.gmra.mxu1 %vm204_vm0, %v1520_v28 }
 0x164   : > { %6972 = vmatpush3.bf16.msra.mxu1 %v7511_v52  ;;  %6979 = vmatprep.mubr.msk.bf16.mxu1 %vm204_vm0, %v1709_v59 }
 0x165   : > { %6988 = vmatpush3.bf16.msra.mxu0 %v7512_v54  ;;  %6973 = vmatprep.subr.bf16.mxu1 %v7513_v57 }
 0x166   : > { %6989 = vmatprep.subr.bf16.mxu0 %v7514_v58 }
 0x168   : > { %6974 = vmatpush3.bf16.msra.mxu1 %v7513_v57 }
 0x169   : > { %6990 = vmatpush3.bf16.msra.mxu0 %v7514_v58  ;;  %6975 = vmatprep.subr.bf16.mxu1 %v7515_v60 }
 0x16a   : > { %7007 = vmatprep.subr.bf16.mxu0 %v7523_v7 }
 0x16c   : > { %6976 = vmatpush3.bf16.msra.mxu1 %v7515_v60  ;;  %6992 = vmatmul.mubr.msk.bf16.vlgmr.msra.gmra.mxu0 %vm204_vm0, %v1814_v48 }
 0x16d   : > { %6977 = vmatprep.subr.bf16.mxu1 %v7516_v61  ;;  %7008 = vmatpush3.bf16.msra.mxu0 %v7523_v7 }
 0x16e   : > { %7009 = vmatprep.subr.bf16.mxu0 %v7525_v38 }
 0x170   : > { %6978 = vmatpush3.bf16.msra.mxu1 %v7516_v61 }
 0x171   : > { %6995 = vmatprep.subr.bf16.mxu1 %v7517_v62  ;;  %7010 = vmatpush3.bf16.msra.mxu0 %v7525_v38  ;;  %v7667_v38 = vld [vmem:[#allocation2] sm:$0xff] }
 0x172   : > { %7011 = vmatprep.subr.bf16.mxu0 %v7527_v9 }
 0x173   : > { %6980 = vmatmul.mubr.msk.bf16.vlgmr.msra.gmra.mxu1 %vm204_vm0, %v1708_v56 }
 0x174   : > { %6996 = vmatpush3.bf16.msra.mxu1 %v7517_v62  ;;  %7003 = vmatprep.mubr.msk.bf16.mxu1 %vm204_vm0, %v1908_v2 }
 0x175   : > { %6997 = vmatprep.subr.bf16.mxu1 %v7518_v1  ;;  %7012 = vmatpush3.bf16.msra.mxu0 %v7527_v9  ;;  %v2006_v9 = vrot.slane %v7667_v38, 7 }
 0x176   : > { %7013 = vmatprep.subr.bf16.mxu0 %v7529_v12 }
 0x178   : > { %6998 = vmatpush3.bf16.msra.mxu1 %v7518_v1  ;;  %v7665_v1 = vld [vmem:[#allocation2 + $0x10] sm:$0xff] }
 0x179   : > { %6999 = vmatprep.subr.bf16.mxu1 %v7519_v3  ;;  %7014 = vmatpush3.bf16.msra.mxu0 %v7529_v12  ;;  %v2009_v2 = vrot.slane %v7665_v1, 7  ;;  %v7535_v1 = vld [vmem:[%s8899_s1 + $0x288] sm:$0xff]  }
 0x17a   : > { %7031 = vmatprep.subr.bf16.mxu0 %v8138_v13 }
 0x17c   : > { %7000 = vmatpush3.bf16.msra.mxu1 %v7519_v3  ;;  %v7666_v3 = vld [vmem:[#allocation2 + $0x18] sm:$0xff] }
 0x17d   : > { %7001 = vmatprep.subr.bf16.mxu1 %v7520_v4 }
 0x180   : > { %7002 = vmatpush3.bf16.msra.mxu1 %v7520_v4  ;;  %v2011_v4 = vrot.slane %v7666_v3, 7 }
 0x181   : > { %7019 = vmatprep.subr.bf16.mxu1 %v7521_v5 }
 0x183   : > { %7004 = vmatmul.mubr.msk.bf16.vlgmr.msra.gmra.mxu1 %vm204_vm0, %v1907_v0 }
 0x184   : > { %7020 = vmatpush3.bf16.msra.mxu1 %v7521_v5 }
 0x185   : > { %7021 = vmatprep.subr.bf16.mxu1 %v7522_v6 }
 0x188   : > { %7022 = vmatpush3.bf16.msra.mxu1 %v7522_v6 }
 0x189   : > { %7023 = vmatprep.subr.bf16.mxu1 %v7524_v8 }
 0x18c   : > { %7024 = vmatpush3.bf16.msra.mxu1 %v7524_v8  ;;  %v5952_v8 = vld [vmem:[%s8900_s2 + $0x1] ss:$0 sm:$0xff] }
 0x18d   : > { %7025 = vmatprep.subr.bf16.mxu1 %v7526_v10 }
 0x190   : > { %7026 = vmatpush3.bf16.msra.mxu1 %v7526_v10  ;;  %v7668_v10 = vld [vmem:[#allocation2 + $0x8] sm:$0xff] }
 0x191   : > { %7043 = vmatprep.subr.bf16.mxu1 %v8129_v11  ;;  %v2007_v12 = vrot.slane %v7668_v10, 7  ;;  %v2032_v10 = vld [vmem:[#allocation2 + $0x20] sm:$0xf] }
 0x1fc   : > { %v6921_v14 = vpop.f32.mrf.mxu0 }
 0x1fe   : > { %v1297_v15 = vpop.f32.mrf.mxu0 }
 0x200   : > { %v6922_v16 = vpop.f32.mrf.mxu0 }
 0x202   : > { %v1300_v19 = vpop.f32.mrf.mxu0 }
 0x203   : > { %v6909_v40 = vpop.f32.mrf.mxu1 }
 0x204   : > { %v1306_v41 = vadd.f32 %v6921_v14, %v6909_v40  ;;  %v2012_v40 = vsel %vm2005_vm9, %v2009_v2, %v2011_v4 }
 0x205   : > { %v1221_v17 = vpop.f32.mrf.mxu1 }
 0x206   : > { %v1298_v45 = vadd.f32 %v1297_v15, %v1221_v17 }
 0x207   : > { %v6910_v18 = vpop.f32.mrf.mxu1 }
 0x209   : > { %v1224_v23 = vpop.f32.mrf.mxu1 }
 0x20a   : > { %v1301_v51 = vadd.f32 %v1300_v19, %v1224_v23 }
 0x20c   : > { %v6945_v20 = vpop.f32.mrf.mxu0 }
 0x20e   : > { %v1484_v21 = vpop.f32.mrf.mxu0 }
 0x210   : > { %v6946_v22 = vpop.f32.mrf.mxu0 }
 0x212   : > { %v1487_v27 = vpop.f32.mrf.mxu0 }
 0x213   : > { %v6933_v24 = vpop.f32.mrf.mxu1 }
 0x214   : > { %v1405_v46 = vadd.f32 %v6933_v24, %v1306_v41 }
 0x215   : > { %v1389_v25 = vpop.f32.mrf.mxu1 }
 0x216   : > { %v1403_v48 = vadd.f32 %v1389_v25, %v1298_v45  ;;  %v1500_v53 = vadd.f32 %v6945_v20, %v1405_v46  ;;  %v7530_v46 = vld [vmem:[%s8899_s1 + $0x2b0] sm:$0xff]  }
 0x217   : > { %v6934_v26 = vpop.f32.mrf.mxu1 }
 0x218   : > { %v1498_v56 = vadd.f32 %v1484_v21, %v1403_v48  ;;  %v2008_v21 = vsel %vm2005_vm9, %v2006_v9, %v2007_v12 }
 0x219   : > { %v1392_v31 = vpop.f32.mrf.mxu1 }
 0x21a   : > { %v1404_v54 = vadd.f32 %v1392_v31, %v1301_v51 }
 0x21c   : > { %v6969_v28 = vpop.f32.mrf.mxu0  ;;  %v1499_v58 = vadd.f32 %v1487_v27, %v1404_v54 }
 0x21e   : > { %v1678_v29 = vpop.f32.mrf.mxu0 }
 0x220   : > { %v6970_v30 = vpop.f32.mrf.mxu0 }
 0x221   : > { %v2010_v30 = vsel %vm2005_vm9, %v2007_v12, %v2009_v2  ;;  %v7536_v2 = vld [vmem:[%s8899_s1 + $0x2f8] sm:$0xff]  }
 0x222   : > { %v1681_v36 = vpop.f32.mrf.mxu0  ;;  %v7539_v12 = vld [vmem:[%s8899_s1 + $0x2d8] sm:$0xff]  }
 0x223   : > { %v6957_v32 = vpop.f32.mrf.mxu1 }
 0x224   : > { %v1602_v55 = vadd.f32 %v6957_v32, %v1500_v53 }
 0x225   : > { %v1586_v33 = vpop.f32.mrf.mxu1 }
 0x226   : > { %v1600_v57 = vadd.f32 %v1586_v33, %v1498_v56  ;;  %v1694_v59 = vadd.f32 %v6969_v28, %v1602_v55  ;;  %v7532_v56 = vld [vmem:[%s8899_s1 + $0x2a8] sm:$0xff]  }
 0x227   : > { %v6958_v34 = vpop.f32.mrf.mxu1 }
 0x228   : > { %v1692_v62 = vadd.f32 %v1678_v29, %v1600_v57 }
 0x229   : > { %v1589_v44 = vpop.f32.mrf.mxu1 }
 0x22a   : > { %v1601_v60 = vadd.f32 %v1589_v44, %v1499_v58 }
 0x22c   : > { %v6993_v37 = vpop.f32.mrf.mxu0  ;;  %v1693_v5 = vadd.f32 %v1681_v36, %v1601_v60 }
 0x22e   : > { %v1880_v39 = vpop.f32.mrf.mxu0 }
 0x230   : > { %v6994_v43 = vpop.f32.mrf.mxu0 }
 0x232   : > { %v1883_v20 = vpop.f32.mrf.mxu0 }
 0x233   : > { %v6981_v47 = vpop.f32.mrf.mxu1 }
 0x234   : > { %v1790_v61 = vadd.f32 %v6981_v47, %v1694_v59 }
 0x235   : > { %v1774_v50 = vpop.f32.mrf.mxu1 }
 0x236   : > { %v1788_v63 = vadd.f32 %v1774_v50, %v1692_v62  ;;  %v1896_v6 = vadd.f32 %v6993_v37, %v1790_v61  ;;  %v7533_v62 = vld [vmem:[%s8899_s1 + $0x290] sm:$0xff]  }
 0x237   : > { %v6982_v52 = vpop.f32.mrf.mxu1 }
 0x238   : > { %v1894_v16 = vadd.f32 %v1880_v39, %v1788_v63  ;;  %v7534_v63 = vld [vmem:[%s8899_s1 + $0x2a0] sm:$0xff]  }
 0x239   : > { %v1777_v0 = vpop.f32.mrf.mxu1 }
 0x23a   : > { %v1789_v14 = vadd.f32 %v1777_v0, %v1693_v5  ;;  %v7537_v5 = vld [vmem:[%s8899_s1 + $0x280] sm:$0xff]  }
 0x23c   : > { %v1895_v25 = vadd.f32 %v1883_v20, %v1789_v14  ;;  %v7540_v14 = vld [vmem:[%s8899_s1 + $0x2e8] sm:$0xff]   ;;  %v7542_v20 = vld [vmem:[%s8899_s1 + $0x2e0] sm:$0xff]  }
 0x243   : > { %v7005_v7 = vpop.f32.mrf.mxu1 }
 0x244   : > { %v1989_v15 = vadd.f32 %v7005_v7, %v1896_v6  ;;  %v7538_v6 = vld [vmem:[%s8899_s1 + $0x2f0] sm:$0xff]  }
 0x245   : > { %v1973_v17 = vpop.f32.mrf.mxu1 }
 0x246   : > { %v2000_v18 = vadd.f32 %v5952_v8, %v1989_v15  ;;  %v1987_v19 = vadd.f32 %v1973_v17, %v1894_v16 }
 0x247   : > { %v7006_v22 = vpop.f32.mrf.mxu1 }
 0x248   : > { %v2018_v23 = vadd.f32 %v2012_v40, %v2000_v18  ;;  %v1998_v24 = vadd.f32 %v5952_v8, %v1987_v19  ;;  %v7541_v19 = vld [vmem:[%s8899_s1 + $0x2d0] sm:$0xff]  }
 0x249   : > { %v1976_v26 = vpop.f32.mrf.mxu1 }
 0x24a   : > { %v2021_v27 = vmax.f32 %v2018_v23, 0.0  ;;  %v2016_v28 = vadd.f32 %v2008_v21, %v1998_v24  ;;  %v1988_v29 = vadd.f32 %v1976_v26, %v1895_v25  ;;  %v7543_v26 = vld [vmem:[%s8899_s1 + $0x2c8] sm:$0xff]  }
 0x24c   : > { %v2024_v31 = vmul.f32 %v2021_v27, %v7957_v35  ;;  %v2019_v32 = vmax.f32 %v2016_v28, 0.0  ;;  %v1999_v33 = vadd.f32 %v5952_v8, %v1988_v29  ;;  %v7544_v27 = vld [vmem:[%s8899_s1 + $0x338] sm:$0xff]  }
 0x24e   : > { %2027 = vst.msk [vmem:[#allocation2 + $0x17] sm:$0x3f] %vm1115_vm8, %v2024_v31  ;;  %v2022_v34 = vmul.f32 %v2019_v32, %v7962_v42  ;;  %v2017_v36 = vadd.f32 %v2010_v30, %v1999_v33  ;;  %v7545_v33 = vld [vmem:[%s8899_s1 + $0x2c0] sm:$0xff]  }
 0x250   : > { %2025 = vst.msk [vmem:[#allocation2 + $0x7] sm:$0xff] %vm204_vm0, %v2022_v34  ;;  %v2020_v37 = vmax.f32 %v2017_v36, 0.0  ;;  %v7546_v34 = vld [vmem:[%s8899_s1 + $0x330] sm:$0xff]  }
 0x252   : > { %v2023_v39 = vmul.f32 %v2020_v37, %v7970_v49  ;;  %v7547_v37 = vld [vmem:[%s8899_s1 + $0x318] sm:$0xff]  }
 0x254   : > { %2026 = vst.msk [vmem:[#allocation2 + $0xf] sm:$0xff] %vm204_vm0, %v2023_v39  ;;  %v7548_v39 = vld [vmem:[%s8899_s1 + $0x328] sm:$0xff]  }
 0x255   : > { %v8153_v41 = vld [vmem:[#allocation2 + $0x18] sm:$0xff] }
 0x256   : > { %v8222_v15 = vpack.c.bf16 %v2032_v10, %v8153_v41  ;;  %v2515_v31 = vpack.c.bf16 %v8153_v41, %v8153_v41 }
 0x257   : > { %v8155_v43 = vld [vmem:[#allocation2] sm:$0xff] }
 0x258   : > { %v2719_v21 = vshrl.u32 %v8222_v15, 16  ;;  %v2722_v22 = vshll.u32 %v8222_v15, 16 }
 0x25a   : > { %v2721_v28 = vrot.slane %v2719_v21, 2  ;;  %v2724_v29 = vrot.slane %v2722_v22, 3 }
 0x25b   : > { %v8157_v44 = vld [vmem:[#allocation2 + $0x8] sm:$0xff]  ;;  %v8159_v35 = vld [vmem:[#allocation2 + $0x10] sm:$0xff] }
 0x25c   : > { %v2033_v45 = vpack.c.bf16 %v8157_v44, %v8155_v43  ;;  %v8165_v42 = vpack.c.bf16 %v8159_v35, %v8159_v35  ;;  %v2317_v49 = vpack.c.bf16 %v8153_v41, %v8159_v35  ;;  %v2725_v32 = vor.u32 %v2724_v29, %v2721_v28 }
 0x25e   : > { %7027 = vmatprep.mubr.msk.bf16.mxu1 %vm204_vm0, %v2033_v45  ;;  %v2328_v47 = vrot.slane %v2033_v45, 3  ;;  %v2329_v48 = vrot.slane %v2317_v49, 3  ;;  %v2056_v50 = vshll.u32 %v2033_v45, 16  ;;  %v2061_v51 = vshll.u32 %v8165_v42, 16 }
 0x25f   : > { %7028 = vmatmul.mubr.msk.bf16.vlgmr.msra.gmra.mxu1 %vm204_vm0, %v8165_v42  ;;  %v2054_v52 = vshrl.u32 %v2033_v45, 16  ;;  %v2065_v58 = vshrl.u32 %v8165_v42, 16  ;;  %v2233_v59 = vrot.slane %v2033_v45, 1  ;;  %v2234_v60 = vrot.slane %v8165_v42, 1 }
 0x260   : > { %7044 = vmatpush3.bf16.msra.mxu1 %v8129_v11  ;;  %v2330_v53 = vsel %vm520_vm3, %v2328_v47, %v2329_v48  ;;  %v2058_v54 = vrot.slane %v2056_v50, 1  ;;  %v2063_v55 = vrot.slane %v2061_v51, 1  ;;  %v2425_v3 = vshrl.u32 %v2317_v49, 16  ;;  %v7553_v51 = vld [vmem:[%s8899_s1 + $0x358] sm:$0xff]  }
 0x261   : > { %7051 = vmatprep.mubr.msk.bf16.mxu1 %vm204_vm0, %v2330_v53  ;;  %7045 = vmatprep.subr.bf16.mxu1 %v7530_v46  ;;  %v2235_v0 = vsel %vm424_vm2, %v2233_v59, %v2234_v60  ;;  %v2428_v4 = vshll.u32 %v2317_v49, 16  ;;  %v2421_v7 = vrot.slane %v2054_v52, 3  ;;  %v2422_v8 = vrot.slane %v2056_v50, 4  ;;  %v7549_v49 = vld [vmem:[%s8899_s1 + $0x310] sm:$0xff]   ;;  %v7552_v50 = vld [vmem:[%s8899_s1 + $0x300] sm:$0xff]  }
 0x262   : > { %v2059_v57 = vor.u32 %v2058_v54, %v2054_v52  ;;  %v2067_v61 = vor.u32 %v2065_v58, %v2063_v55  ;;  %v2427_v38 = vrot.slane %v2425_v3, 3  ;;  %v2619_v42 = vrot.slane %v8222_v15, 2  ;;  %v7554_v54 = vld [vmem:[%s8899_s1 + $0x350] sm:$0xff]   ;;  %v7557_v58 = vld [vmem:[%s8899_s1 + $0x378] sm:$0xff]  }
 0x263   : > { %v2430_v9 = vrot.slane %v2428_v4, 4  ;;  %v2423_v16 = vor.u32 %v2422_v8, %v2421_v7  ;;  %v2818_v52 = vrot.slane %v8222_v15, 3  ;;  %v7558_v59 = vld [vmem:[%s8899_s1 + $0x370] sm:$0xff]  }
 0x264   : > { %7046 = vmatpush3.bf16.msra.mxu1 %v7530_v46  ;;  %v2064_v11 = vsel %vm243_vm1, %v2059_v57, %v2063_v55  ;;  %v7550_v46 = vld [vmem:[%s8899_s1 + $0x320] sm:$0xff]  }
 0x265   : > { %7015 = vmatprep.mubr.msk.bf16.mxu0 %vm204_vm0, %v2064_v11  ;;  %7047 = vmatprep.subr.bf16.mxu1 %v7532_v56  ;;  %v2431_v40 = vor.u32 %v2430_v9, %v2427_v38  ;;  %v7556_v57 = vld [vmem:[%s8899_s1 + $0x340] sm:$0xff]   ;;  %v7560_v11 = vld [vmem:[%s8899_s1 + $0x368] sm:$0xff]  }
 0x266   : > { %7016 = vmatmul.mubr.msk.bf16.vlgmr.msra.gmra.mxu0 %vm204_vm0, %v2067_v61  ;;  %v7561_v61 = vld [vmem:[%s8899_s1 + $0x390] sm:$0xff]  }
 0x267   : > { %7032 = vmatpush3.bf16.msra.mxu0 %v8138_v13  ;;  %7039 = vmatprep.mubr.msk.bf16.mxu0 %vm204_vm0, %v2235_v0  ;;  %v8204_v13 = vpack.c.bf16 %v8159_v35, %v8157_v44  ;;  %v2432_v23 = vsel %vm614_vm4, %v2423_v16, %v2431_v40  ;;  %v8320_v0 = vld [vmem:[%s8899_s1 + $0x3d8] sm:$0xff]  }
 0x268   : > { %7048 = vmatpush3.bf16.msra.mxu1 %v7532_v56  ;;  %7033 = vmatprep.subr.bf16.mxu0 %v7533_v62  ;;  %v7555_v56 = vld [vmem:[%s8899_s1 + $0x348] sm:$0xff]  }
 0x269   : > { %7049 = vmatprep.subr.bf16.mxu1 %v7534_v63  ;;  %v2711_v17 = vshrl.u32 %v8204_v13, 16  ;;  %v2714_v18 = vshll.u32 %v8204_v13, 16  ;;  %v2618_v45 = vrot.slane %v8204_v13, 2  ;;  %v2817_v53 = vrot.slane %v8204_v13, 3 }
 0x26b   : > { %7034 = vmatpush3.bf16.msra.mxu0 %v7533_v62  ;;  %v2713_v24 = vrot.slane %v2711_v17, 2  ;;  %v2716_v25 = vrot.slane %v2714_v18, 3  ;;  %v2620_v47 = vsel %vm812_vm7, %v2618_v45, %v2619_v42  ;;  %v2819_v55 = vsel %vm520_vm3, %v2817_v53, %v2818_v52  ;;  %v7563_v62 = vld [vmem:[%s8899_s1 + $0x388] sm:$0xff]  }
 0x26c   : > { %7050 = vmatpush3.bf16.msra.mxu1 %v7534_v63  ;;  %7035 = vmatprep.subr.bf16.mxu0 %v7535_v1  ;;  %v7562_v63 = vld [vmem:[%s8899_s1 + $0x360] sm:$0xff]  }
 0x26d   : > { %7067 = vmatprep.subr.bf16.mxu1 %v7536_v2  ;;  %v2717_v30 = vor.u32 %v2716_v25, %v2713_v24 }
 0x26f   : > { %7036 = vmatpush3.bf16.msra.mxu0 %v7535_v1  ;;  %7052 = vmatmul.mubr.msk.bf16.vlgmr.msra.gmra.mxu1 %vm204_vm0, %v2329_v48  ;;  %v2726_v36 = vsel %vm906_vm6, %v2717_v30, %v2725_v32  ;;  %v7551_v48 = vld [vmem:[%s8899_s1 + $0x308] sm:$0xff]   ;;  %v7565_v1 = vld [vmem:[%s8899_s1 + $0x380] sm:$0xff]  }
 0x270   : > { %7068 = vmatpush3.bf16.msra.mxu1 %v7536_v2  ;;  %7075 = vmatprep.mubr.msk.bf16.mxu1 %vm204_vm0, %v8204_v13  ;;  %v8329_v2 = vld [vmem:[%s8899_s1 + $0x3b8] sm:$0xff]  }
 0x271   : > { %7037 = vmatprep.subr.bf16.mxu0 %v7537_v5  ;;  %7069 = vmatprep.subr.bf16.mxu1 %v7538_v6 }
 0x273   : > { %7038 = vmatpush3.bf16.msra.mxu0 %v7537_v5 }
 0x274   : > { %7070 = vmatpush3.bf16.msra.mxu1 %v7538_v6  ;;  %7055 = vmatprep.subr.bf16.mxu0 %v7539_v12 }
 0x275   : > { %7071 = vmatprep.subr.bf16.mxu1 %v7540_v14 }
 0x276   : > { %7040 = vmatmul.mubr.msk.bf16.vlgmr.msra.gmra.mxu0 %vm204_vm0, %v2234_v60  ;;  %v7559_v60 = vld [vmem:[%s8899_s1 + $0x398] sm:$0xff]  }
 0x277   : > { %7056 = vmatpush3.bf16.msra.mxu0 %v7539_v12  ;;  %7063 = vmatprep.mubr.msk.bf16.mxu0 %vm204_vm0, %v2432_v23 }
 0x278   : > { %7072 = vmatpush3.bf16.msra.mxu1 %v7540_v14  ;;  %7057 = vmatprep.subr.bf16.mxu0 %v7541_v19 }
 0x279   : > { %7073 = vmatprep.subr.bf16.mxu1 %v7542_v20 }
 0x27b   : > { %7058 = vmatpush3.bf16.msra.mxu0 %v7541_v19 }
 0x27c   : > { %7074 = vmatpush3.bf16.msra.mxu1 %v7542_v20  ;;  %7059 = vmatprep.subr.bf16.mxu0 %v7543_v26 }
 0x27d   : > { %7091 = vmatprep.subr.bf16.mxu1 %v7544_v27 }
 0x27f   : > { %7060 = vmatpush3.bf16.msra.mxu0 %v7543_v26  ;;  %7076 = vmatmul.mubr.msk.bf16.vlgmr.msra.gmra.mxu1 %vm204_vm0, %v2515_v31 }
 0x280   : > { %7092 = vmatpush3.bf16.msra.mxu1 %v7544_v27  ;;  %7099 = vmatprep.mubr.msk.bf16.mxu1 %vm204_vm0, %v2726_v36 }
 0x281   : > { %7061 = vmatprep.subr.bf16.mxu0 %v7545_v33  ;;  %7093 = vmatprep.subr.bf16.mxu1 %v7546_v34 }
 0x283   : > { %7062 = vmatpush3.bf16.msra.mxu0 %v7545_v33 }
 0x284   : > { %7094 = vmatpush3.bf16.msra.mxu1 %v7546_v34  ;;  %7079 = vmatprep.subr.bf16.mxu0 %v7547_v37 }
 0x285   : > { %7095 = vmatprep.subr.bf16.mxu1 %v7548_v39 }
 0x286   : > { %7064 = vmatmul.mubr.msk.bf16.vlgmr.msra.gmra.mxu0 %vm204_vm0, %v2431_v40 }
 0x287   : > { %7080 = vmatpush3.bf16.msra.mxu0 %v7547_v37  ;;  %7087 = vmatprep.mubr.msk.bf16.mxu0 %vm204_vm0, %v2620_v47 }
 0x288   : > { %7096 = vmatpush3.bf16.msra.mxu1 %v7548_v39  ;;  %7081 = vmatprep.subr.bf16.mxu0 %v7549_v49 }
 0x289   : > { %7097 = vmatprep.subr.bf16.mxu1 %v7550_v46 }
 0x28b   : > { %7082 = vmatpush3.bf16.msra.mxu0 %v7549_v49 }
 0x28c   : > { %7098 = vmatpush3.bf16.msra.mxu1 %v7550_v46  ;;  %7083 = vmatprep.subr.bf16.mxu0 %v7551_v48 }
 0x28d   : > { %7115 = vmatprep.subr.bf16.mxu1 %v7559_v60 }
 0x28f   : > { %7084 = vmatpush3.bf16.msra.mxu0 %v7551_v48  ;;  %7100 = vmatmul.mubr.msk.bf16.vlgmr.msra.gmra.mxu1 %vm204_vm0, %v2725_v32 }
 0x290   : > { %7085 = vmatprep.subr.bf16.mxu0 %v7552_v50  ;;  %7116 = vmatpush3.bf16.msra.mxu1 %v7559_v60 }
 0x291   : > { %7117 = vmatprep.subr.bf16.mxu1 %v7561_v61 }
 0x293   : > { %7086 = vmatpush3.bf16.msra.mxu0 %v7552_v50 }
 0x294   : > { %7103 = vmatprep.subr.bf16.mxu0 %v7553_v51  ;;  %7118 = vmatpush3.bf16.msra.mxu1 %v7561_v61 }
 0x295   : > { %7119 = vmatprep.subr.bf16.mxu1 %v7563_v62 }
 0x296   : > { %7088 = vmatmul.mubr.msk.bf16.vlgmr.msra.gmra.mxu0 %vm204_vm0, %v2619_v42 }
 0x297   : > { %7104 = vmatpush3.bf16.msra.mxu0 %v7553_v51  ;;  %7111 = vmatprep.mubr.msk.bf16.mxu0 %vm204_vm0, %v2819_v55 }
 0x298   : > { %7105 = vmatprep.subr.bf16.mxu0 %v7554_v54  ;;  %7120 = vmatpush3.bf16.msra.mxu1 %v7563_v62 }
 0x299   : > { %7121 = vmatprep.subr.bf16.mxu1 %v7565_v1 }
 0x29b   : > { %7106 = vmatpush3.bf16.msra.mxu0 %v7554_v54 }
 0x29c   : > { %7107 = vmatprep.subr.bf16.mxu0 %v7555_v56  ;;  %7122 = vmatpush3.bf16.msra.mxu1 %v7565_v1 }
 0x29d   : > { %7139 = vmatprep.subr.bf16.mxu1 %v8329_v2 }
 0x29f   : > { %7108 = vmatpush3.bf16.msra.mxu0 %v7555_v56 }
 0x2a0   : > { %7109 = vmatprep.subr.bf16.mxu0 %v7556_v57 }
 0x2a3   : > { %7110 = vmatpush3.bf16.msra.mxu0 %v7556_v57 }
 0x2a4   : > { %7127 = vmatprep.subr.bf16.mxu0 %v7557_v58 }
 0x2a6   : > { %7112 = vmatmul.mubr.msk.bf16.vlgmr.msra.gmra.mxu0 %vm204_vm0, %v2818_v52 }
 0x2a7   : > { %7128 = vmatpush3.bf16.msra.mxu0 %v7557_v58  ;;  %v6080_v58 = vld [vmem:[%s8900_s2 + $0x2] ss:$0 sm:$0xff] }
 0x2a8   : > { %7129 = vmatprep.subr.bf16.mxu0 %v7558_v59 }
 0x2ab   : > { %7130 = vmatpush3.bf16.msra.mxu0 %v7558_v59 }
 0x2ac   : > { %7131 = vmatprep.subr.bf16.mxu0 %v7560_v11 }
 0x2af   : > { %7132 = vmatpush3.bf16.msra.mxu0 %v7560_v11 }
 0x2b0   : > { %7133 = vmatprep.subr.bf16.mxu0 %v7562_v63 }
 0x2b3   : > { %7134 = vmatpush3.bf16.msra.mxu0 %v7562_v63 }
 0x2b4   : > { %7151 = vmatprep.subr.bf16.mxu0 %v8320_v0 }
 0x31f   : > { %v7029_v3 = vpop.f32.mrf.mxu1 }
 0x321   : > { %v2208_v4 = vpop.f32.mrf.mxu1 }
 0x323   : > { %v7030_v13 = vpop.f32.mrf.mxu1 }
 0x325   : > { %v2211_v8 = vpop.f32.mrf.mxu1 }
 0x326   : > { %v7017_v5 = vpop.f32.mrf.mxu0 }
 0x327   : > { %v2217_v27 = vadd.f32 %v7029_v3, %v7017_v5 }
 0x328   : > { %v2132_v6 = vpop.f32.mrf.mxu0 }
 0x329   : > { %v2209_v30 = vadd.f32 %v2208_v4, %v2132_v6 }
 0x32a   : > { %v7018_v7 = vpop.f32.mrf.mxu0 }
 0x32b   : > { %v8338_v7 = vld [vmem:[%s8901_s3 + $0x10] sm:$0x3f] }
 0x32c   : > { %v2135_v12 = vpop.f32.mrf.mxu0 }
 0x32d   : > { %v2212_v36 = vadd.f32 %v2211_v8, %v2135_v12 }
 0x32f   : > { %v7053_v38 = vpop.f32.mrf.mxu1 }
 0x331   : > { %v2395_v9 = vpop.f32.mrf.mxu1 }
 0x333   : > { %v7054_v10 = vpop.f32.mrf.mxu1 }
 0x334   : > { %v8345_v10 = vld [vmem:[%s8901_s3] sm:$0xff] }
 0x335   : > { %v2398_v40 = vpop.f32.mrf.mxu1 }
 0x336   : > { %v7041_v14 = vpop.f32.mrf.mxu0 }
 0x337   : > { %v2316_v31 = vadd.f32 %v7041_v14, %v2217_v27 }
 0x338   : > { %v2300_v15 = vpop.f32.mrf.mxu0 }
 0x339   : > { %v2314_v33 = vadd.f32 %v2300_v15, %v2209_v30  ;;  %v2411_v37 = vadd.f32 %v7053_v38, %v2316_v31 }
 0x33a   : > { %v7042_v16 = vpop.f32.mrf.mxu0 }
 0x33b   : > { %v2409_v49 = vadd.f32 %v2395_v9, %v2314_v33  ;;  %v8352_v16 = vld [vmem:[%s8901_s3 + $0x8] sm:$0xff] }
 0x33c   : > { %v2303_v20 = vpop.f32.mrf.mxu0  ;;  %v7568_v33 = vld [vmem:[%s8899_s1 + $0x3c8] sm:$0xff]  }
 0x33d   : > { %v2315_v45 = vadd.f32 %v2303_v20, %v2212_v36 }
 0x33f   : > { %v7077_v17 = vpop.f32.mrf.mxu1  ;;  %v2410_v47 = vadd.f32 %v2398_v40, %v2315_v45 }
 0x341   : > { %v2589_v18 = vpop.f32.mrf.mxu1 }
 0x343   : > { %v7078_v19 = vpop.f32.mrf.mxu1 }
 0x345   : > { %v2592_v24 = vpop.f32.mrf.mxu1 }
 0x346   : > { %v7065_v21 = vpop.f32.mrf.mxu0 }
 0x347   : > { %v2513_v42 = vadd.f32 %v7065_v21, %v2411_v37 }
 0x348   : > { %v2497_v22 = vpop.f32.mrf.mxu0 }
 0x349   : > { %v2511_v46 = vadd.f32 %v2497_v22, %v2409_v49  ;;  %v2605_v48 = vadd.f32 %v7077_v17, %v2513_v42  ;;  %v7569_v42 = vld [vmem:[%s8899_s1 + $0x3b0] sm:$0xff]   ;;  %v7570_v49 = vld [vmem:[%s8899_s1 + $0x3c0] sm:$0xff]  }
 0x34a   : > { %v7066_v23 = vpop.f32.mrf.mxu0 }
 0x34b   : > { %v2603_v53 = vadd.f32 %v2589_v18, %v2511_v46 }
 0x34c   : > { %v2500_v29 = vpop.f32.mrf.mxu0 }
 0x34d   : > { %v2512_v50 = vadd.f32 %v2500_v29, %v2410_v47  ;;  %v7571_v47 = vld [vmem:[%s8899_s1 + $0x3a8] sm:$0xff]  }
 0x34f   : > { %v7101_v25 = vpop.f32.mrf.mxu1  ;;  %v2604_v55 = vadd.f32 %v2592_v24, %v2512_v50  ;;  %v7566_v24 = vld [vmem:[%s8899_s1 + $0x3d0] sm:$0xff]  }
 0x351   : > { %v2791_v26 = vpop.f32.mrf.mxu1 }
 0x353   : > { %v7102_v28 = vpop.f32.mrf.mxu1 }
 0x355   : > { %v2794_v1 = vpop.f32.mrf.mxu1 }
 0x356   : > { %v7089_v32 = vpop.f32.mrf.mxu0 }
 0x357   : > { %v2701_v51 = vadd.f32 %v7089_v32, %v2605_v48  ;;  %v7572_v48 = vld [vmem:[%s8899_s1 + $0x418] sm:$0xff]  }
 0x358   : > { %v2685_v34 = vpop.f32.mrf.mxu0 }
 0x359   : > { %v2699_v52 = vadd.f32 %v2685_v34, %v2603_v53  ;;  %v2807_v56 = vadd.f32 %v7101_v25, %v2701_v51  ;;  %v7573_v53 = vld [vmem:[%s8899_s1 + $0x3a0] sm:$0xff]  }
 0x35a   : > { %v7090_v39 = vpop.f32.mrf.mxu0 }
 0x35b   : > { %v2805_v11 = vadd.f32 %v2791_v26, %v2699_v52  ;;  %v7574_v52 = vld [vmem:[%s8899_s1 + $0x410] sm:$0xff]  }
 0x35c   : > { %v2688_v54 = vpop.f32.mrf.mxu0 }
 0x35d   : > { %v2700_v59 = vadd.f32 %v2688_v54, %v2604_v55 }
 0x35f   : > { %v2806_v5 = vadd.f32 %v2794_v1, %v2700_v59  ;;  %v7575_v59 = vld [vmem:[%s8899_s1 + $0x3f8] sm:$0xff]  }
 0x366   : > { %v7113_v57 = vpop.f32.mrf.mxu0 }
 0x367   : > { %v2900_v60 = vadd.f32 %v7113_v57, %v2807_v56 }
 0x368   : > { %v2884_v61 = vpop.f32.mrf.mxu0 }
 0x369   : > { %v2911_v62 = vadd.f32 %v6080_v58, %v2900_v60  ;;  %v2898_v63 = vadd.f32 %v2884_v61, %v2805_v11  ;;  %v7576_v60 = vld [vmem:[%s8899_s1 + $0x408] sm:$0xff]  }
 0x36a   : > { %v7114_v3 = vpop.f32.mrf.mxu0 }
 0x36b   : > { %v2914_v4 = vmax.f32 %v2911_v62, 0.0  ;;  %v2909_v13 = vadd.f32 %v6080_v58, %v2898_v63  ;;  %v7577_v3 = vld [vmem:[%s8899_s1 + $0x3f0] sm:$0xff]  }
 0x36c   : > { %v2887_v6 = vpop.f32.mrf.mxu0 }
 0x36d   : > { %v2917_v8 = vmul.f32 %v8338_v7, %v2914_v4  ;;  %v2912_v38 = vmax.f32 %v2909_v13, 0.0  ;;  %v2899_v9 = vadd.f32 %v2887_v6, %v2806_v5  ;;  %v7578_v4 = vld [vmem:[%s8899_s1 + $0x400] sm:$0xff]  }
 0x36f   : > { %2920 = vst.msk [vmem:[#allocation3 + $0x17] sm:$0x3f] %vm1115_vm8, %v2917_v8  ;;  %v2915_v12 = vmul.f32 %v8345_v10, %v2912_v38  ;;  %v2910_v14 = vadd.f32 %v6080_v58, %v2899_v9  ;;  %v2925_v58 = vld [vmem:[#allocation3 + $0x20] sm:$0xf] }
 0x370   : > { %v7579_v9 = vld [vmem:[%s8899_s1 + $0x3e8] sm:$0xff]  }
 0x371   : > { %2918 = vst.msk [vmem:[#allocation3 + $0x7] sm:$0xff] %vm204_vm0, %v2915_v12  ;;  %v2913_v15 = vmax.f32 %v2910_v14, 0.0  ;;  %v7580_v12 = vld [vmem:[%s8899_s1 + $0x458] sm:$0xff]  }
 0x373   : > { %v2916_v40 = vmul.f32 %v8352_v16, %v2913_v15 }
 0x375   : > { %2919 = vst.msk [vmem:[#allocation3 + $0xf] sm:$0xff] %vm204_vm0, %v2916_v40 }
 0x376   : > { %v8356_v17 = vld [vmem:[#allocation3 + $0x18] sm:$0xff] }
 0x377   : > { %v8412_v11 = vpack.c.bf16 %v2925_v58, %v8356_v17 }
 0x378   : > { %v2921_v18 = vld [vmem:[#allocation3] sm:$0xff] }
 0x379   : > { %v3612_v13 = vshrl.u32 %v8412_v11, 16  ;;  %v3615_v5 = vshll.u32 %v8412_v11, 16 }
 0x37b   : > { %v3614_v14 = vrot.slane %v3612_v13, 2  ;;  %v3617_v15 = vrot.slane %v3615_v5, 3 }
 0x37c   : > { %v2922_v19 = vld [vmem:[#allocation3 + $0x8] sm:$0xff]  ;;  %v2923_v20 = vld [vmem:[#allocation3 + $0x10] sm:$0xff] }
 0x37d   : > { %v2926_v21 = vpack.c.bf16 %v2922_v19, %v2921_v18  ;;  %v8358_v22 = vpack.c.bf16 %v2923_v20, %v2923_v20  ;;  %v3210_v23 = vpack.c.bf16 %v8356_v17, %v2923_v20  ;;  %v3408_v18 = vpack.c.bf16 %v8356_v17, %v8356_v17  ;;  %v7583_v17 = vld [vmem:[%s8899_s1 + $0x438] sm:$0xff]  }
 0x37f   : > { %7135 = vmatprep.mubr.msk.bf16.mxu0 %vm204_vm0, %v2926_v21  ;;  %v3221_v25 = vrot.slane %v2926_v21, 3  ;;  %v3222_v26 = vrot.slane %v3210_v23, 3  ;;  %v2949_v27 = vshll.u32 %v2926_v21, 16  ;;  %v2954_v28 = vshll.u32 %v8358_v22, 16 }
 0x380   : > { %7136 = vmatmul.mubr.msk.bf16.vlgmr.msra.gmra.mxu0 %vm204_vm0, %v8358_v22  ;;  %v2947_v30 = vshrl.u32 %v2926_v21, 16  ;;  %v2958_v36 = vshrl.u32 %v8358_v22, 16  ;;  %v3126_v37 = vrot.slane %v2926_v21, 1  ;;  %v3127_v39 = vrot.slane %v8358_v22, 1  ;;  %v7582_v21 = vld [vmem:[%s8899_s1 + $0x450] sm:$0xff]  }
 0x381   : > { %7152 = vmatpush3.bf16.msra.mxu0 %v8320_v0  ;;  %v3223_v29 = vsel %vm520_vm3, %v3221_v25, %v3222_v26  ;;  %v2951_v31 = vrot.slane %v2949_v27, 1  ;;  %v2956_v32 = vrot.slane %v2954_v28, 1  ;;  %v3318_v50 = vshrl.u32 %v3210_v23, 16 }
 0x382   : > { %7159 = vmatprep.mubr.msk.bf16.mxu0 %vm204_vm0, %v3223_v29  ;;  %7153 = vmatprep.subr.bf16.mxu0 %v7566_v24  ;;  %v3128_v46 = vsel %vm424_vm2, %v3126_v37, %v3127_v39  ;;  %v3321_v51 = vshll.u32 %v3210_v23, 16  ;;  %v3314_v54 = vrot.slane %v2947_v30, 3  ;;  %v3315_v55 = vrot.slane %v2949_v27, 4  ;;  %v7584_v23 = vld [vmem:[%s8899_s1 + $0x448] sm:$0xff]   ;;  %v7586_v27 = vld [vmem:[%s8899_s1 + $0x440] sm:$0xff]  }
 0x383   : > { %v2952_v34 = vor.u32 %v2951_v31, %v2947_v30  ;;  %v2960_v45 = vor.u32 %v2958_v36, %v2956_v32  ;;  %v3320_v56 = vrot.slane %v3318_v50, 3  ;;  %v3512_v25 = vrot.slane %v8412_v11, 2  ;;  %v7587_v29 = vld [vmem:[%s8899_s1 + $0x428] sm:$0xff]   ;;  %v7588_v30 = vld [vmem:[%s8899_s1 + $0x420] sm:$0xff]   ;;  %v7589_v31 = vld [vmem:[%s8899_s1 + $0x478] sm:$0xff]  }
 0x384   : > { %v3323_v57 = vrot.slane %v3321_v51, 4  ;;  %v3316_v61 = vor.u32 %v3315_v55, %v3314_v54  ;;  %v7591_v37 = vld [vmem:[%s8899_s1 + $0x468] sm:$0xff]   ;;  %v8510_v50 = vld [vmem:[%s8899_s1 + $0x4f8] sm:$0xff]   ;;  %v7601_v51 = vld [vmem:[%s8899_s1 + $0x4a0] sm:$0xff]  }
 0x385   : > { %7154 = vmatpush3.bf16.msra.mxu0 %v7566_v24  ;;  %v2957_v0 = vsel %vm243_vm1, %v2952_v34, %v2956_v32  ;;  %v7590_v34 = vld [vmem:[%s8899_s1 + $0x470] sm:$0xff]  }
 0x386   : > { %7123 = vmatprep.mubr.msk.bf16.mxu1 %vm204_vm0, %v2957_v0  ;;  %7155 = vmatprep.subr.bf16.mxu0 %v7568_v33  ;;  %v3324_v62 = vor.u32 %v3323_v57, %v3320_v56  ;;  %v7593_v0 = vld [vmem:[%s8899_s1 + $0x498] sm:$0xff]  }
 0x387   : > { %7124 = vmatmul.mubr.msk.bf16.vlgmr.msra.gmra.mxu1 %vm204_vm0, %v2960_v45  ;;  %v7594_v45 = vld [vmem:[%s8899_s1 + $0x490] sm:$0xff]  }
 0x388   : > { %7140 = vmatpush3.bf16.msra.mxu1 %v8329_v2  ;;  %7147 = vmatprep.mubr.msk.bf16.mxu1 %vm204_vm0, %v3128_v46  ;;  %v8394_v2 = vpack.c.bf16 %v2923_v20, %v2922_v19  ;;  %v3325_v6 = vsel %vm614_vm4, %v3316_v61, %v3324_v62  ;;  %v3618_v19 = vor.u32 %v3617_v15, %v3614_v14  ;;  %v7581_v20 = vld [vmem:[%s8899_s1 + $0x3e0] sm:$0xff]   ;;  %v7596_v46 = vld [vmem:[%s8899_s1 + $0x488] sm:$0xff]  }
 0x389   : > { %7156 = vmatpush3.bf16.msra.mxu0 %v7568_v33  ;;  %7141 = vmatprep.subr.bf16.mxu1 %v7569_v42  ;;  %v3711_v33 = vrot.slane %v8412_v11, 3 }
 0x38a   : > { %7157 = vmatprep.subr.bf16.mxu0 %v7570_v49  ;;  %v3604_v63 = vshrl.u32 %v8394_v2, 16  ;;  %v3607_v1 = vshll.u32 %v8394_v2, 16  ;;  %v3511_v24 = vrot.slane %v8394_v2, 2  ;;  %v3710_v32 = vrot.slane %v8394_v2, 3 }
 0x38c   : > { %7142 = vmatpush3.bf16.msra.mxu1 %v7569_v42  ;;  %v3606_v8 = vrot.slane %v3604_v63, 2  ;;  %v3609_v38 = vrot.slane %v3607_v1, 3  ;;  %v3513_v28 = vsel %vm812_vm7, %v3511_v24, %v3512_v25  ;;  %v3712_v36 = vsel %vm520_vm3, %v3710_v32, %v3711_v33  ;;  %v7595_v42 = vld [vmem:[%s8899_s1 + $0x4b8] sm:$0xff]  }
 0x38d   : > { %7158 = vmatpush3.bf16.msra.mxu0 %v7570_v49  ;;  %7143 = vmatprep.subr.bf16.mxu1 %v7571_v47  ;;  %v7597_v49 = vld [vmem:[%s8899_s1 + $0x4b0] sm:$0xff]  }
 0x38e   : > { %7175 = vmatprep.subr.bf16.mxu0 %v7572_v48  ;;  %v3610_v40 = vor.u32 %v3609_v38, %v3606_v8 }
 0x390   : > { %7144 = vmatpush3.bf16.msra.mxu1 %v7571_v47  ;;  %7160 = vmatmul.mubr.msk.bf16.vlgmr.msra.gmra.mxu0 %vm204_vm0, %v3222_v26  ;;  %v3619_v22 = vsel %vm906_vm6, %v3610_v40, %v3618_v19  ;;  %v7585_v26 = vld [vmem:[%s8899_s1 + $0x430] sm:$0xff]   ;;  %v7599_v47 = vld [vmem:[%s8899_s1 + $0x4a8] sm:$0xff]  }
 0x391   : > { %7176 = vmatpush3.bf16.msra.mxu0 %v7572_v48  ;;  %7183 = vmatprep.mubr.msk.bf16.mxu0 %vm204_vm0, %v8394_v2  ;;  %v7598_v48 = vld [vmem:[%s8899_s1 + $0x480] sm:$0xff]   ;;  %v8519_v2 = vld [vmem:[%s8899_s1 + $0x4d8] sm:$0xff]  }
 0x392   : > { %7145 = vmatprep.subr.bf16.mxu1 %v7573_v53  ;;  %7177 = vmatprep.subr.bf16.mxu0 %v7574_v52 }
 0x394   : > { %7146 = vmatpush3.bf16.msra.mxu1 %v7573_v53 }
 0x395   : > { %7178 = vmatpush3.bf16.msra.mxu0 %v7574_v52  ;;  %7163 = vmatprep.subr.bf16.mxu1 %v7575_v59 }
 0x396   : > { %7179 = vmatprep.subr.bf16.mxu0 %v7576_v60 }
 0x397   : > { %7148 = vmatmul.mubr.msk.bf16.vlgmr.msra.gmra.mxu1 %vm204_vm0, %v3127_v39  ;;  %v7592_v39 = vld [vmem:[%s8899_s1 + $0x460] sm:$0xff]  }
 0x398   : > { %7164 = vmatpush3.bf16.msra.mxu1 %v7575_v59  ;;  %7171 = vmatprep.mubr.msk.bf16.mxu1 %vm204_vm0, %v3325_v6 }
 0x399   : > { %7180 = vmatpush3.bf16.msra.mxu0 %v7576_v60  ;;  %7165 = vmatprep.subr.bf16.mxu1 %v7577_v3 }
 0x39a   : > { %7181 = vmatprep.subr.bf16.mxu0 %v7578_v4 }
 0x39c   : > { %7166 = vmatpush3.bf16.msra.mxu1 %v7577_v3 }
 0x39d   : > { %7182 = vmatpush3.bf16.msra.mxu0 %v7578_v4  ;;  %7167 = vmatprep.subr.bf16.mxu1 %v7579_v9 }
 0x39e   : > { %7199 = vmatprep.subr.bf16.mxu0 %v7580_v12 }
 0x3a0   : > { %7168 = vmatpush3.bf16.msra.mxu1 %v7579_v9  ;;  %7184 = vmatmul.mubr.msk.bf16.vlgmr.msra.gmra.mxu0 %vm204_vm0, %v3408_v18 }
 0x3a1   : > { %7200 = vmatpush3.bf16.msra.mxu0 %v7580_v12  ;;  %7207 = vmatprep.mubr.msk.bf16.mxu0 %vm204_vm0, %v3619_v22 }
 0x3a2   : > { %7169 = vmatprep.subr.bf16.mxu1 %v7581_v20  ;;  %7201 = vmatprep.subr.bf16.mxu0 %v7582_v21 }
 0x3a4   : > { %7170 = vmatpush3.bf16.msra.mxu1 %v7581_v20 }
 0x3a5   : > { %7202 = vmatpush3.bf16.msra.mxu0 %v7582_v21  ;;  %7187 = vmatprep.subr.bf16.mxu1 %v7583_v17 }
 0x3a6   : > { %7203 = vmatprep.subr.bf16.mxu0 %v7584_v23 }
 0x3a7   : > { %7172 = vmatmul.mubr.msk.bf16.vlgmr.msra.gmra.mxu1 %vm204_vm0, %v3324_v62 }
 0x3a8   : > { %7188 = vmatpush3.bf16.msra.mxu1 %v7583_v17  ;;  %7195 = vmatprep.mubr.msk.bf16.mxu1 %vm204_vm0, %v3513_v28 }
 0x3a9   : > { %7204 = vmatpush3.bf16.msra.mxu0 %v7584_v23  ;;  %7189 = vmatprep.subr.bf16.mxu1 %v7585_v26 }
 0x3aa   : > { %7205 = vmatprep.subr.bf16.mxu0 %v7586_v27 }
 0x3ac   : > { %7190 = vmatpush3.bf16.msra.mxu1 %v7585_v26 }
 0x3ad   : > { %7206 = vmatpush3.bf16.msra.mxu0 %v7586_v27  ;;  %7191 = vmatprep.subr.bf16.mxu1 %v7587_v29 }
 0x3ae   : > { %7223 = vmatprep.subr.bf16.mxu0 %v7595_v42 }
 0x3b0   : > { %7192 = vmatpush3.bf16.msra.mxu1 %v7587_v29  ;;  %7208 = vmatmul.mubr.msk.bf16.vlgmr.msra.gmra.mxu0 %vm204_vm0, %v3618_v19 }
 0x3b1   : > { %7193 = vmatprep.subr.bf16.mxu1 %v7588_v30  ;;  %7224 = vmatpush3.bf16.msra.mxu0 %v7595_v42 }
 0x3b2   : > { %7225 = vmatprep.subr.bf16.mxu0 %v7597_v49 }
 0x3b4   : > { %7194 = vmatpush3.bf16.msra.mxu1 %v7588_v30 }
 0x3b5   : > { %7211 = vmatprep.subr.bf16.mxu1 %v7589_v31  ;;  %7226 = vmatpush3.bf16.msra.mxu0 %v7597_v49  ;;  %v6208_v49 = vld [vmem:[%s8900_s2 + $0x3] ss:$0 sm:$0xff] }
 0x3b6   : > { %7227 = vmatprep.subr.bf16.mxu0 %v7599_v47 }
 0x3b7   : > { %7196 = vmatmul.mubr.msk.bf16.vlgmr.msra.gmra.mxu1 %vm204_vm0, %v3512_v25 }
 0x3b8   : > { %7212 = vmatpush3.bf16.msra.mxu1 %v7589_v31  ;;  %7219 = vmatprep.mubr.msk.bf16.mxu1 %vm204_vm0, %v3712_v36 }
 0x3b9   : > { %7213 = vmatprep.subr.bf16.mxu1 %v7590_v34  ;;  %7228 = vmatpush3.bf16.msra.mxu0 %v7599_v47 }
 0x3ba   : > { %7229 = vmatprep.subr.bf16.mxu0 %v7601_v51 }
 0x3bc   : > { %7214 = vmatpush3.bf16.msra.mxu1 %v7590_v34 }
 0x3bd   : > { %7215 = vmatprep.subr.bf16.mxu1 %v7591_v37  ;;  %7230 = vmatpush3.bf16.msra.mxu0 %v7601_v51 }
 0x3be   : > { %7247 = vmatprep.subr.bf16.mxu0 %v8519_v2 }
 0x3c0   : > { %7216 = vmatpush3.bf16.msra.mxu1 %v7591_v37 }
 0x3c1   : > { %7217 = vmatprep.subr.bf16.mxu1 %v7592_v39 }
 0x3c4   : > { %7218 = vmatpush3.bf16.msra.mxu1 %v7592_v39 }
 0x3c5   : > { %7235 = vmatprep.subr.bf16.mxu1 %v7593_v0 }
 0x3c7   : > { %7220 = vmatmul.mubr.msk.bf16.vlgmr.msra.gmra.mxu1 %vm204_vm0, %v3711_v33 }
 0x3c8   : > { %7236 = vmatpush3.bf16.msra.mxu1 %v7593_v0 }
 0x3c9   : > { %7237 = vmatprep.subr.bf16.mxu1 %v7594_v45 }
 0x3cc   : > { %7238 = vmatpush3.bf16.msra.mxu1 %v7594_v45 }
 0x3cd   : > { %7239 = vmatprep.subr.bf16.mxu1 %v7596_v46 }
 0x3d0   : > { %7240 = vmatpush3.bf16.msra.mxu1 %v7596_v46  ;;  %v3812_v46 = vrot.slane %v8159_v35, 7 }
 0x3d1   : > { %7241 = vmatprep.subr.bf16.mxu1 %v7598_v48 }
 0x3d4   : > { %7242 = vmatpush3.bf16.msra.mxu1 %v7598_v48 }
 0x3d5   : > { %7259 = vmatprep.subr.bf16.mxu1 %v8510_v50 }
 0x440   : > { %v7137_v53 = vpop.f32.mrf.mxu0 }
 0x442   : > { %v3101_v52 = vpop.f32.mrf.mxu0 }
 0x444   : > { %v7138_v54 = vpop.f32.mrf.mxu0 }
 0x445   : > { %v3810_v54 = vrot.slane %v8157_v44, 7 }
 0x446   : > { %v3104_v58 = vpop.f32.mrf.mxu0 }
 0x447   : > { %v7125_v55 = vpop.f32.mrf.mxu1 }
 0x448   : > { %v3110_v40 = vadd.f32 %v7137_v53, %v7125_v55  ;;  %v3814_v53 = vrot.slane %v8153_v41, 7 }
 0x449   : > { %v3025_v56 = vpop.f32.mrf.mxu1 }
 0x44a   : > { %v3102_v20 = vadd.f32 %v3101_v52, %v3025_v56 }
 0x44b   : > { %v7126_v57 = vpop.f32.mrf.mxu1 }
 0x44d   : > { %v3028_v61 = vpop.f32.mrf.mxu1 }
 0x44e   : > { %v3105_v24 = vadd.f32 %v3104_v58, %v3028_v61  ;;  %v3815_v58 = vsel %vm2005_vm9, %v3812_v46, %v3814_v53  ;;  %v7612_v53 = vld [vmem:[%s8899_s1 + $0x528] sm:$0xff]  }
 0x450   : > { %v7161_v59 = vpop.f32.mrf.mxu0 }
 0x452   : > { %v3288_v60 = vpop.f32.mrf.mxu0 }
 0x454   : > { %v7162_v11 = vpop.f32.mrf.mxu0 }
 0x456   : > { %v3291_v3 = vpop.f32.mrf.mxu0 }
 0x457   : > { %v7149_v62 = vpop.f32.mrf.mxu1 }
 0x458   : > { %v3209_v21 = vadd.f32 %v7149_v62, %v3110_v40  ;;  %v7602_v40 = vld [vmem:[%s8899_s1 + $0x4f0] sm:$0xff]  }
 0x459   : > { %v3193_v63 = vpop.f32.mrf.mxu1 }
 0x45a   : > { %v3207_v17 = vadd.f32 %v3193_v63, %v3102_v20  ;;  %v3304_v25 = vadd.f32 %v7161_v59, %v3209_v21  ;;  %v3809_v59 = vrot.slane %v8155_v43, 7 }
 0x45b   : > { %v7150_v1 = vpop.f32.mrf.mxu1 }
 0x45c   : > { %v3302_v29 = vadd.f32 %v3288_v60, %v3207_v17  ;;  %v3811_v35 = vsel %vm2005_vm9, %v3809_v59, %v3810_v54  ;;  %v7614_v59 = vld [vmem:[%s8899_s1 + $0x520] sm:$0xff]  }
 0x45d   : > { %v3196_v6 = vpop.f32.mrf.mxu1 }
 0x45e   : > { %v3208_v27 = vadd.f32 %v3196_v6, %v3105_v24 }
 0x460   : > { %v7185_v4 = vpop.f32.mrf.mxu0  ;;  %v3303_v31 = vadd.f32 %v3291_v3, %v3208_v27 }
 0x462   : > { %v3482_v13 = vpop.f32.mrf.mxu0 }
 0x464   : > { %v7186_v5 = vpop.f32.mrf.mxu0 }
 0x465   : > { %v3813_v5 = vsel %vm2005_vm9, %v3810_v54, %v3812_v46 }
 0x466   : > { %v3485_v12 = vpop.f32.mrf.mxu0 }
 0x467   : > { %v7173_v8 = vpop.f32.mrf.mxu1 }
 0x468   : > { %v3406_v28 = vadd.f32 %v7173_v8, %v3304_v25  ;;  %v7604_v25 = vld [vmem:[%s8899_s1 + $0x4e8] sm:$0xff]  }
 0x469   : > { %v3390_v38 = vpop.f32.mrf.mxu1 }
 0x46a   : > { %v3404_v30 = vadd.f32 %v3390_v38, %v3302_v29  ;;  %v3498_v32 = vadd.f32 %v7185_v4, %v3406_v28 }
 0x46b   : > { %v7174_v9 = vpop.f32.mrf.mxu1 }
 0x46c   : > { %v3496_v36 = vadd.f32 %v3482_v13, %v3404_v30 }
 0x46d   : > { %v3393_v19 = vpop.f32.mrf.mxu1 }
 0x46e   : > { %v3405_v33 = vadd.f32 %v3393_v19, %v3303_v31  ;;  %v7605_v31 = vld [vmem:[%s8899_s1 + $0x4d0] sm:$0xff]  }
 0x470   : > { %v7209_v14 = vpop.f32.mrf.mxu0  ;;  %v3497_v0 = vadd.f32 %v3485_v12, %v3405_v33 }
 0x472   : > { %v3684_v15 = vpop.f32.mrf.mxu0 }
 0x474   : > { %v7210_v18 = vpop.f32.mrf.mxu0 }
 0x476   : > { %v3687_v57 = vpop.f32.mrf.mxu0 }
 0x477   : > { %v7197_v22 = vpop.f32.mrf.mxu1 }
 0x478   : > { %v3594_v34 = vadd.f32 %v7197_v22, %v3498_v32  ;;  %v7606_v32 = vld [vmem:[%s8899_s1 + $0x4e0] sm:$0xff]  }
 0x479   : > { %v3578_v23 = vpop.f32.mrf.mxu1 }
 0x47a   : > { %v3592_v37 = vadd.f32 %v3578_v23, %v3496_v36  ;;  %v3700_v45 = vadd.f32 %v7209_v14, %v3594_v34  ;;  %v7607_v34 = vld [vmem:[%s8899_s1 + $0x4c8] sm:$0xff]   ;;  %v7608_v36 = vld [vmem:[%s8899_s1 + $0x538] sm:$0xff]  }
 0x47b   : > { %v7198_v26 = vpop.f32.mrf.mxu1 }
 0x47c   : > { %v3698_v51 = vadd.f32 %v3684_v15, %v3592_v37 }
 0x47d   : > { %v3581_v39 = vpop.f32.mrf.mxu1 }
 0x47e   : > { %v3593_v47 = vadd.f32 %v3581_v39, %v3497_v0  ;;  %v7609_v0 = vld [vmem:[%s8899_s1 + $0x4c0] sm:$0xff]  }
 0x480   : > { %v3699_v62 = vadd.f32 %v3687_v57, %v3593_v47 }
 0x487   : > { %v7221_v42 = vpop.f32.mrf.mxu1 }
 0x488   : > { %v3793_v48 = vadd.f32 %v7221_v42, %v3700_v45  ;;  %v7610_v45 = vld [vmem:[%s8899_s1 + $0x530] sm:$0xff]  }
 0x489   : > { %v3777_v52 = vpop.f32.mrf.mxu1 }
 0x48a   : > { %v3804_v55 = vadd.f32 %v6208_v49, %v3793_v48  ;;  %v3791_v56 = vadd.f32 %v3777_v52, %v3698_v51  ;;  %v3835_v48 = vld [vmem:[#allocation2 + $0x20] sm:$0xf]  ;;  %v7611_v51 = vld [vmem:[%s8899_s1 + $0x518] sm:$0xff]  }
 0x48b   : > { %v7222_v60 = vpop.f32.mrf.mxu1 }
 0x48c   : > { %v3821_v11 = vadd.f32 %v3815_v58, %v3804_v55  ;;  %v3802_v61 = vadd.f32 %v6208_v49, %v3791_v56  ;;  %v7613_v58 = vld [vmem:[%s8899_s1 + $0x510] sm:$0xff]  }
 0x48d   : > { %v3780_v63 = vpop.f32.mrf.mxu1 }
 0x48e   : > { %v3824_v1 = vmax.f32 %v3821_v11, 0.0  ;;  %v3819_v3 = vadd.f32 %v3811_v35, %v3802_v61  ;;  %v3792_v41 = vadd.f32 %v3780_v63, %v3699_v62  ;;  %v7615_v63 = vld [vmem:[%s8899_s1 + $0x508] sm:$0xff]  }
 0x490   : > { %v3827_v4 = vmul.f32 %v8338_v7, %v3824_v1  ;;  %v3822_v44 = vmax.f32 %v3819_v3, 0.0  ;;  %v3803_v13 = vadd.f32 %v6208_v49, %v3792_v41  ;;  %v7616_v1 = vld [vmem:[%s8899_s1 + $0x578] sm:$0xff]  }
 0x492   : > { %3830 = vst.msk [vmem:[#allocation2 + $0x17] sm:$0x3f] %vm1115_vm8, %v3827_v4  ;;  %v3825_v43 = vmul.f32 %v8345_v10, %v3822_v44  ;;  %v3820_v6 = vadd.f32 %v3813_v5, %v3803_v13  ;;  %v7617_v5 = vld [vmem:[%s8899_s1 + $0x500] sm:$0xff]  }
 0x494   : > { %3828 = vst.msk [vmem:[#allocation2 + $0x7] sm:$0xff] %vm204_vm0, %v3825_v43  ;;  %v3823_v8 = vmax.f32 %v3820_v6, 0.0  ;;  %v7618_v43 = vld [vmem:[%s8899_s1 + $0x570] sm:$0xff]  }
 0x496   : > { %v3826_v38 = vmul.f32 %v8352_v16, %v3823_v8  ;;  %v7619_v8 = vld [vmem:[%s8899_s1 + $0x558] sm:$0xff]  }
 0x498   : > { %3829 = vst.msk [vmem:[#allocation2 + $0xf] sm:$0xff] %vm204_vm0, %v3826_v38  ;;  %v7620_v38 = vld [vmem:[%s8899_s1 + $0x568] sm:$0xff]  }
 0x499   : > { %v8538_v9 = vld [vmem:[#allocation2 + $0x18] sm:$0xff] }
 0x49a   : > { %v8607_v52 = vpack.c.bf16 %v3835_v48, %v8538_v9  ;;  %v4318_v44 = vpack.c.bf16 %v8538_v9, %v8538_v9 }
 0x49b   : > { %v8540_v12 = vld [vmem:[#allocation2] sm:$0xff] }
 0x49c   : > { %v4522_v60 = vshrl.u32 %v8607_v52, 16  ;;  %v4525_v11 = vshll.u32 %v8607_v52, 16 }
 0x49e   : > { %v4524_v3 = vrot.slane %v4522_v60, 2  ;;  %v4527_v41 = vrot.slane %v4525_v11, 3 }
 0x49f   : > { %v8542_v7 = vld [vmem:[#allocation2 + $0x8] sm:$0xff]  ;;  %v8544_v14 = vld [vmem:[#allocation2 + $0x10] sm:$0xff] }
 0x4a0   : > { %v3836_v15 = vpack.c.bf16 %v8542_v7, %v8540_v12  ;;  %v8550_v10 = vpack.c.bf16 %v8544_v14, %v8544_v14  ;;  %v4120_v16 = vpack.c.bf16 %v8538_v9, %v8544_v14  ;;  %v4528_v13 = vor.u32 %v4527_v41, %v4524_v3 }
 0x4a2   : > { %7243 = vmatprep.mubr.msk.bf16.mxu1 %vm204_vm0, %v3836_v15  ;;  %v4131_v18 = vrot.slane %v3836_v15, 3  ;;  %v4132_v19 = vrot.slane %v4120_v16, 3  ;;  %v3859_v20 = vshll.u32 %v3836_v15, 16  ;;  %v3864_v21 = vshll.u32 %v8550_v10, 16 }
 0x4a3   : > { %7244 = vmatmul.mubr.msk.bf16.vlgmr.msra.gmra.mxu1 %vm204_vm0, %v8550_v10  ;;  %v3857_v17 = vshrl.u32 %v3836_v15, 16  ;;  %v3868_v27 = vshrl.u32 %v8550_v10, 16  ;;  %v4036_v28 = vrot.slane %v3836_v15, 1  ;;  %v4037_v29 = vrot.slane %v8550_v10, 1 }
 0x4a4   : > { %7260 = vmatpush3.bf16.msra.mxu1 %v8510_v50  ;;  %v4133_v22 = vsel %vm520_vm3, %v4131_v18, %v4132_v19  ;;  %v3861_v23 = vrot.slane %v3859_v20, 1  ;;  %v3866_v24 = vrot.slane %v3864_v21, 1  ;;  %v4228_v37 = vshrl.u32 %v4120_v16, 16  ;;  %v7625_v21 = vld [vmem:[%s8899_s1 + $0x598] sm:$0xff]  }
 0x4a5   : > { %7267 = vmatprep.mubr.msk.bf16.mxu1 %vm204_vm0, %v4133_v22  ;;  %7261 = vmatprep.subr.bf16.mxu1 %v7602_v40  ;;  %v4038_v33 = vsel %vm424_vm2, %v4036_v28, %v4037_v29  ;;  %v4231_v39 = vshll.u32 %v4120_v16, 16  ;;  %v4224_v42 = vrot.slane %v3857_v17, 3  ;;  %v4225_v49 = vrot.slane %v3859_v20, 4  ;;  %v7621_v16 = vld [vmem:[%s8899_s1 + $0x550] sm:$0xff]   ;;  %v7624_v20 = vld [vmem:[%s8899_s1 + $0x540] sm:$0xff]  }
 0x4a6   : > { %v3862_v26 = vor.u32 %v3861_v23, %v3857_v17  ;;  %v3870_v30 = vor.u32 %v3868_v27, %v3866_v24  ;;  %v4230_v46 = vrot.slane %v4228_v37, 3  ;;  %v4422_v10 = vrot.slane %v8607_v52, 2  ;;  %v7626_v23 = vld [vmem:[%s8899_s1 + $0x590] sm:$0xff]   ;;  %v7629_v27 = vld [vmem:[%s8899_s1 + $0x5b8] sm:$0xff]  }
 0x4a7   : > { %v4233_v47 = vrot.slane %v4231_v39, 4  ;;  %v4226_v54 = vor.u32 %v4225_v49, %v4224_v42  ;;  %v4621_v17 = vrot.slane %v8607_v52, 3  ;;  %v7630_v28 = vld [vmem:[%s8899_s1 + $0x5b0] sm:$0xff]  }
 0x4a8   : > { %7262 = vmatpush3.bf16.msra.mxu1 %v7602_v40  ;;  %v3867_v50 = vsel %vm243_vm1, %v3862_v26, %v3866_v24  ;;  %v7622_v40 = vld [vmem:[%s8899_s1 + $0x560] sm:$0xff]  }
 0x4a9   : > { %7231 = vmatprep.mubr.msk.bf16.mxu0 %vm204_vm0, %v3867_v50  ;;  %7263 = vmatprep.subr.bf16.mxu1 %v7604_v25  ;;  %v4234_v55 = vor.u32 %v4233_v47, %v4230_v46  ;;  %v7628_v26 = vld [vmem:[%s8899_s1 + $0x580] sm:$0xff]   ;;  %v7632_v50 = vld [vmem:[%s8899_s1 + $0x5a8] sm:$0xff]  }
 0x4aa   : > { %7232 = vmatmul.mubr.msk.bf16.vlgmr.msra.gmra.mxu0 %vm204_vm0, %v3870_v30  ;;  %v7633_v30 = vld [vmem:[%s8899_s1 + $0x5d0] sm:$0xff]  }
 0x4ab   : > { %7248 = vmatpush3.bf16.msra.mxu0 %v8519_v2  ;;  %7255 = vmatprep.mubr.msk.bf16.mxu0 %vm204_vm0, %v4038_v33  ;;  %v8589_v2 = vpack.c.bf16 %v8544_v14, %v8542_v7  ;;  %v4235_v61 = vsel %vm614_vm4, %v4226_v54, %v4234_v55  ;;  %v8705_v33 = vld [vmem:[%s8899_s1 + $0x618] sm:$0xff]  }
 0x4ac   : > { %7264 = vmatpush3.bf16.msra.mxu1 %v7604_v25  ;;  %7249 = vmatprep.subr.bf16.mxu0 %v7605_v31  ;;  %v7627_v25 = vld [vmem:[%s8899_s1 + $0x588] sm:$0xff]  }
 0x4ad   : > { %7265 = vmatprep.subr.bf16.mxu1 %v7606_v32  ;;  %v4514_v56 = vshrl.u32 %v8589_v2, 16  ;;  %v4517_v57 = vshll.u32 %v8589_v2, 16  ;;  %v4421_v15 = vrot.slane %v8589_v2, 2  ;;  %v4620_v22 = vrot.slane %v8589_v2, 3 }
 0x4af   : > { %7250 = vmatpush3.bf16.msra.mxu0 %v7605_v31  ;;  %v4516_v62 = vrot.slane %v4514_v56, 2  ;;  %v4519_v35 = vrot.slane %v4517_v57, 3  ;;  %v4423_v18 = vsel %vm812_vm7, %v4421_v15, %v4422_v10  ;;  %v4622_v24 = vsel %vm520_vm3, %v4620_v22, %v4621_v17  ;;  %v7635_v31 = vld [vmem:[%s8899_s1 + $0x5c8] sm:$0xff]  }
 0x4b0   : > { %7266 = vmatpush3.bf16.msra.mxu1 %v7606_v32  ;;  %7251 = vmatprep.subr.bf16.mxu0 %v7607_v34  ;;  %v7634_v32 = vld [vmem:[%s8899_s1 + $0x5a0] sm:$0xff]  }
 0x4b1   : > { %7283 = vmatprep.subr.bf16.mxu1 %v7608_v36  ;;  %v4520_v4 = vor.u32 %v4519_v35, %v4516_v62 }
 0x4b3   : > { %7252 = vmatpush3.bf16.msra.mxu0 %v7607_v34  ;;  %7268 = vmatmul.mubr.msk.bf16.vlgmr.msra.gmra.mxu1 %vm204_vm0, %v4132_v19  ;;  %v4529_v6 = vsel %vm906_vm6, %v4520_v4, %v4528_v13  ;;  %v7623_v19 = vld [vmem:[%s8899_s1 + $0x548] sm:$0xff]   ;;  %v7637_v34 = vld [vmem:[%s8899_s1 + $0x5c0] sm:$0xff]  }
 0x4b4   : > { %7284 = vmatpush3.bf16.msra.mxu1 %v7608_v36  ;;  %7291 = vmatprep.mubr.msk.bf16.mxu1 %vm204_vm0, %v8589_v2  ;;  %v8714_v36 = vld [vmem:[%s8899_s1 + $0x5f8] sm:$0xff]  }
 0x4b5   : > { %7253 = vmatprep.subr.bf16.mxu0 %v7609_v0  ;;  %7285 = vmatprep.subr.bf16.mxu1 %v7610_v45 }
 0x4b7   : > { %7254 = vmatpush3.bf16.msra.mxu0 %v7609_v0 }
 0x4b8   : > { %7286 = vmatpush3.bf16.msra.mxu1 %v7610_v45  ;;  %7271 = vmatprep.subr.bf16.mxu0 %v7611_v51 }
 0x4b9   : > { %7287 = vmatprep.subr.bf16.mxu1 %v7612_v53 }
 0x4ba   : > { %7256 = vmatmul.mubr.msk.bf16.vlgmr.msra.gmra.mxu0 %vm204_vm0, %v4037_v29  ;;  %v7631_v29 = vld [vmem:[%s8899_s1 + $0x5d8] sm:$0xff]  }
 0x4bb   : > { %7272 = vmatpush3.bf16.msra.mxu0 %v7611_v51  ;;  %7279 = vmatprep.mubr.msk.bf16.mxu0 %vm204_vm0, %v4235_v61 }
 0x4bc   : > { %7288 = vmatpush3.bf16.msra.mxu1 %v7612_v53  ;;  %7273 = vmatprep.subr.bf16.mxu0 %v7613_v58 }
 0x4bd   : > { %7289 = vmatprep.subr.bf16.mxu1 %v7614_v59 }
 0x4bf   : > { %7274 = vmatpush3.bf16.msra.mxu0 %v7613_v58 }
 0x4c0   : > { %7290 = vmatpush3.bf16.msra.mxu1 %v7614_v59  ;;  %7275 = vmatprep.subr.bf16.mxu0 %v7615_v63 }
 0x4c1   : > { %7307 = vmatprep.subr.bf16.mxu1 %v7616_v1 }
 0x4c3   : > { %7276 = vmatpush3.bf16.msra.mxu0 %v7615_v63  ;;  %7292 = vmatmul.mubr.msk.bf16.vlgmr.msra.gmra.mxu1 %vm204_vm0, %v4318_v44 }
 0x4c4   : > { %7308 = vmatpush3.bf16.msra.mxu1 %v7616_v1  ;;  %7315 = vmatprep.mubr.msk.bf16.mxu1 %vm204_vm0, %v4529_v6 }
 0x4c5   : > { %7277 = vmatprep.subr.bf16.mxu0 %v7617_v5  ;;  %7309 = vmatprep.subr.bf16.mxu1 %v7618_v43 }
 0x4c7   : > { %7278 = vmatpush3.bf16.msra.mxu0 %v7617_v5 }
 0x4c8   : > { %7310 = vmatpush3.bf16.msra.mxu1 %v7618_v43  ;;  %7295 = vmatprep.subr.bf16.mxu0 %v7619_v8 }
 0x4c9   : > { %7311 = vmatprep.subr.bf16.mxu1 %v7620_v38 }
 0x4ca   : > { %7280 = vmatmul.mubr.msk.bf16.vlgmr.msra.gmra.mxu0 %vm204_vm0, %v4234_v55 }
 0x4cb   : > { %7296 = vmatpush3.bf16.msra.mxu0 %v7619_v8  ;;  %7303 = vmatprep.mubr.msk.bf16.mxu0 %vm204_vm0, %v4423_v18 }
 0x4cc   : > { %7312 = vmatpush3.bf16.msra.mxu1 %v7620_v38  ;;  %7297 = vmatprep.subr.bf16.mxu0 %v7621_v16 }
 0x4cd   : > { %7313 = vmatprep.subr.bf16.mxu1 %v7622_v40 }
 0x4cf   : > { %7298 = vmatpush3.bf16.msra.mxu0 %v7621_v16 }
 0x4d0   : > { %7314 = vmatpush3.bf16.msra.mxu1 %v7622_v40  ;;  %7299 = vmatprep.subr.bf16.mxu0 %v7623_v19 }
 0x4d1   : > { %7331 = vmatprep.subr.bf16.mxu1 %v7631_v29 }
 0x4d3   : > { %7300 = vmatpush3.bf16.msra.mxu0 %v7623_v19  ;;  %7316 = vmatmul.mubr.msk.bf16.vlgmr.msra.gmra.mxu1 %vm204_vm0, %v4528_v13 }
 0x4d4   : > { %7301 = vmatprep.subr.bf16.mxu0 %v7624_v20  ;;  %7332 = vmatpush3.bf16.msra.mxu1 %v7631_v29 }
 0x4d5   : > { %7333 = vmatprep.subr.bf16.mxu1 %v7633_v30 }
 0x4d7   : > { %7302 = vmatpush3.bf16.msra.mxu0 %v7624_v20 }
 0x4d8   : > { %7319 = vmatprep.subr.bf16.mxu0 %v7625_v21  ;;  %7334 = vmatpush3.bf16.msra.mxu1 %v7633_v30 }
 0x4d9   : > { %7335 = vmatprep.subr.bf16.mxu1 %v7635_v31 }
 0x4da   : > { %7304 = vmatmul.mubr.msk.bf16.vlgmr.msra.gmra.mxu0 %vm204_vm0, %v4422_v10 }
 0x4db   : > { %7320 = vmatpush3.bf16.msra.mxu0 %v7625_v21  ;;  %7327 = vmatprep.mubr.msk.bf16.mxu0 %vm204_vm0, %v4622_v24 }
 0x4dc   : > { %7321 = vmatprep.subr.bf16.mxu0 %v7626_v23  ;;  %7336 = vmatpush3.bf16.msra.mxu1 %v7635_v31 }
 0x4dd   : > { %7337 = vmatprep.subr.bf16.mxu1 %v7637_v34 }
 0x4df   : > { %7322 = vmatpush3.bf16.msra.mxu0 %v7626_v23 }
 0x4e0   : > { %7323 = vmatprep.subr.bf16.mxu0 %v7627_v25  ;;  %7338 = vmatpush3.bf16.msra.mxu1 %v7637_v34 }
 0x4e1   : > { %7355 = vmatprep.subr.bf16.mxu1 %v8714_v36 }
 0x4e3   : > { %7324 = vmatpush3.bf16.msra.mxu0 %v7627_v25 }
 0x4e4   : > { %7325 = vmatprep.subr.bf16.mxu0 %v7628_v26 }
 0x4e7   : > { %7326 = vmatpush3.bf16.msra.mxu0 %v7628_v26 }
 0x4e8   : > { %7343 = vmatprep.subr.bf16.mxu0 %v7629_v27 }
 0x4ea   : > { %7328 = vmatmul.mubr.msk.bf16.vlgmr.msra.gmra.mxu0 %vm204_vm0, %v4621_v17 }
 0x4eb   : > { %7344 = vmatpush3.bf16.msra.mxu0 %v7629_v27  ;;  %v6336_v27 = vld [vmem:[%s8900_s2 + $0x4] ss:$0 sm:$0xff] }
 0x4ec   : > { %7345 = vmatprep.subr.bf16.mxu0 %v7630_v28 }
 0x4ef   : > { %7346 = vmatpush3.bf16.msra.mxu0 %v7630_v28 }
 0x4f0   : > { %7347 = vmatprep.subr.bf16.mxu0 %v7632_v50 }
 0x4f3   : > { %7348 = vmatpush3.bf16.msra.mxu0 %v7632_v50 }
 0x4f4   : > { %7349 = vmatprep.subr.bf16.mxu0 %v7634_v32 }
 0x4f7   : > { %7350 = vmatpush3.bf16.msra.mxu0 %v7634_v32 }
 0x4f8   : > { %7367 = vmatprep.subr.bf16.mxu0 %v8705_v33 }
 0x563   : > { %v7245_v37 = vpop.f32.mrf.mxu1 }
 0x565   : > { %v4011_v39 = vpop.f32.mrf.mxu1 }
 0x567   : > { %v7246_v2 = vpop.f32.mrf.mxu1 }
 0x569   : > { %v4014_v49 = vpop.f32.mrf.mxu1 }
 0x56a   : > { %v7233_v0 = vpop.f32.mrf.mxu0 }
 0x56b   : > { %v4020_v1 = vadd.f32 %v7245_v37, %v7233_v0 }
 0x56c   : > { %v3935_v45 = vpop.f32.mrf.mxu0 }
 0x56d   : > { %v4012_v4 = vadd.f32 %v4011_v39, %v3935_v45 }
 0x56e   : > { %v7234_v42 = vpop.f32.mrf.mxu0 }
 0x56f   : > { %v8723_v42 = vld [vmem:[%s8901_s3 + $0x10] sm:$0x3f] }
 0x570   : > { %v3938_v51 = vpop.f32.mrf.mxu0 }
 0x571   : > { %v4015_v6 = vadd.f32 %v4014_v49, %v3938_v51 }
 0x573   : > { %v7269_v46 = vpop.f32.mrf.mxu1 }
 0x575   : > { %v4198_v47 = vpop.f32.mrf.mxu1 }
 0x577   : > { %v7270_v48 = vpop.f32.mrf.mxu1 }
 0x578   : > { %v8730_v48 = vld [vmem:[%s8901_s3] sm:$0xff] }
 0x579   : > { %v4201_v55 = vpop.f32.mrf.mxu1 }
 0x57a   : > { %v7257_v53 = vpop.f32.mrf.mxu0 }
 0x57b   : > { %v4119_v44 = vadd.f32 %v7257_v53, %v4020_v1 }
 0x57c   : > { %v4103_v52 = vpop.f32.mrf.mxu0 }
 0x57d   : > { %v4117_v5 = vadd.f32 %v4103_v52, %v4012_v4  ;;  %v4214_v8 = vadd.f32 %v7269_v46, %v4119_v44 }
 0x57e   : > { %v7258_v54 = vpop.f32.mrf.mxu0 }
 0x57f   : > { %v4212_v16 = vadd.f32 %v4198_v47, %v4117_v5  ;;  %v8737_v54 = vld [vmem:[%s8901_s3 + $0x8] sm:$0xff] }
 0x580   : > { %v4106_v59 = vpop.f32.mrf.mxu0  ;;  %v7640_v5 = vld [vmem:[%s8899_s1 + $0x608] sm:$0xff]  }
 0x581   : > { %v4118_v15 = vadd.f32 %v4106_v59, %v4015_v6 }
 0x583   : > { %v7293_v56 = vpop.f32.mrf.mxu1  ;;  %v4213_v18 = vadd.f32 %v4201_v55, %v4118_v15 }
 0x585   : > { %v4392_v57 = vpop.f32.mrf.mxu1 }
 0x587   : > { %v7294_v58 = vpop.f32.mrf.mxu1 }
 0x589   : > { %v4395_v62 = vpop.f32.mrf.mxu1 }
 0x58a   : > { %v7281_v60 = vpop.f32.mrf.mxu0 }
 0x58b   : > { %v4316_v10 = vadd.f32 %v7281_v60, %v4214_v8 }
 0x58c   : > { %v4300_v11 = vpop.f32.mrf.mxu0 }
 0x58d   : > { %v4314_v40 = vadd.f32 %v4300_v11, %v4212_v16  ;;  %v4408_v19 = vadd.f32 %v7293_v56, %v4316_v10  ;;  %v7641_v10 = vld [vmem:[%s8899_s1 + $0x5f0] sm:$0xff]   ;;  %v7642_v16 = vld [vmem:[%s8899_s1 + $0x600] sm:$0xff]  }
 0x58e   : > { %v7282_v61 = vpop.f32.mrf.mxu0 }
 0x58f   : > { %v4406_v22 = vadd.f32 %v4392_v57, %v4314_v40 }
 0x590   : > { %v4303_v41 = vpop.f32.mrf.mxu0 }
 0x591   : > { %v4315_v20 = vadd.f32 %v4303_v41, %v4213_v18  ;;  %v7643_v18 = vld [vmem:[%s8899_s1 + $0x5e8] sm:$0xff]  }
 0x593   : > { %v7317_v35 = vpop.f32.mrf.mxu1  ;;  %v4407_v24 = vadd.f32 %v4395_v62, %v4315_v20  ;;  %v7638_v62 = vld [vmem:[%s8899_s1 + $0x610] sm:$0xff]  }
 0x595   : > { %v4594_v63 = vpop.f32.mrf.mxu1 }
 0x597   : > { %v7318_v3 = vpop.f32.mrf.mxu1 }
 0x599   : > { %v4597_v34 = vpop.f32.mrf.mxu1 }
 0x59a   : > { %v7305_v13 = vpop.f32.mrf.mxu0 }
 0x59b   : > { %v4504_v21 = vadd.f32 %v7305_v13, %v4408_v19  ;;  %v7644_v19 = vld [vmem:[%s8899_s1 + $0x658] sm:$0xff]  }
 0x59c   : > { %v4488_v43 = vpop.f32.mrf.mxu0 }
 0x59d   : > { %v4502_v17 = vadd.f32 %v4488_v43, %v4406_v22  ;;  %v4610_v25 = vadd.f32 %v7317_v35, %v4504_v21  ;;  %v7645_v22 = vld [vmem:[%s8899_s1 + $0x5e0] sm:$0xff]  }
 0x59e   : > { %v7306_v38 = vpop.f32.mrf.mxu0 }
 0x59f   : > { %v4608_v50 = vadd.f32 %v4594_v63, %v4502_v17  ;;  %v7646_v17 = vld [vmem:[%s8899_s1 + $0x650] sm:$0xff]  }
 0x5a0   : > { %v4491_v23 = vpop.f32.mrf.mxu0 }
 0x5a1   : > { %v4503_v28 = vadd.f32 %v4491_v23, %v4407_v24  ;;  %v4728_v23 = vld [vmem:[#allocation3 + $0x20] sm:$0xf] }
 0x5a3   : > { %v4609_v0 = vadd.f32 %v4597_v34, %v4503_v28  ;;  %v7647_v28 = vld [vmem:[%s8899_s1 + $0x638] sm:$0xff]  }
 0x5aa   : > { %v7329_v26 = vpop.f32.mrf.mxu0 }
 0x5ab   : > { %v4703_v29 = vadd.f32 %v7329_v26, %v4610_v25 }
 0x5ac   : > { %v4687_v30 = vpop.f32.mrf.mxu0 }
 0x5ad   : > { %v4714_v31 = vadd.f32 %v6336_v27, %v4703_v29  ;;  %v4701_v32 = vadd.f32 %v4687_v30, %v4608_v50  ;;  %v7648_v50 = vld [vmem:[%s8899_s1 + $0x648] sm:$0xff]  }
 0x5ae   : > { %v7330_v37 = vpop.f32.mrf.mxu0 }
 0x5af   : > { %v4717_v39 = vmax.f32 %v4714_v31, 0.0  ;;  %v4712_v2 = vadd.f32 %v6336_v27, %v4701_v32  ;;  %v7649_v37 = vld [vmem:[%s8899_s1 + $0x630] sm:$0xff]  }
 0x5b0   : > { %v4690_v45 = vpop.f32.mrf.mxu0 }
 0x5b1   : > { %v4720_v49 = vmul.f32 %v8723_v42, %v4717_v39  ;;  %v4715_v46 = vmax.f32 %v4712_v2, 0.0  ;;  %v4702_v47 = vadd.f32 %v4690_v45, %v4609_v0  ;;  %v7650_v39 = vld [vmem:[%s8899_s1 + $0x640] sm:$0xff]  }
 0x5b3   : > { %4723 = vst.msk [vmem:[#allocation3 + $0x17] sm:$0x3f] %vm1115_vm8, %v4720_v49  ;;  %v4718_v51 = vmul.f32 %v8730_v48, %v4715_v46  ;;  %v4713_v53 = vadd.f32 %v6336_v27, %v4702_v47  ;;  %v7651_v47 = vld [vmem:[%s8899_s1 + $0x628] sm:$0xff]  }
 0x5b5   : > { %4721 = vst.msk [vmem:[#allocation3 + $0x7] sm:$0xff] %vm204_vm0, %v4718_v51  ;;  %v4716_v52 = vmax.f32 %v4713_v53, 0.0  ;;  %v7652_v51 = vld [vmem:[%s8899_s1 + $0x698] sm:$0xff]  }
 0x5b7   : > { %v4719_v55 = vmul.f32 %v8737_v54, %v4716_v52 }
 0x5b9   : > { %4722 = vst.msk [vmem:[#allocation3 + $0xf] sm:$0xff] %vm204_vm0, %v4719_v55 }
 0x5ba   : > { %v8741_v56 = vld [vmem:[#allocation3 + $0x18] sm:$0xff] }
 0x5bb   : > { %v8794_v29 = vpack.c.bf16 %v4728_v23, %v8741_v56 }
 0x5bc   : > { %v4724_v57 = vld [vmem:[#allocation3] sm:$0xff] }
 0x5bd   : > { %v5415_v2 = vshrl.u32 %v8794_v29, 16  ;;  %v5418_v0 = vshll.u32 %v8794_v29, 16 }
 0x5bf   : > { %v5417_v53 = vrot.slane %v5415_v2, 2  ;;  %v5420_v52 = vrot.slane %v5418_v0, 3 }
 0x5c0   : > { %v4725_v58 = vld [vmem:[#allocation3 + $0x8] sm:$0xff]  ;;  %v4726_v59 = vld [vmem:[#allocation3 + $0x10] sm:$0xff] }
 0x5c1   : > { %v4729_v60 = vpack.c.bf16 %v4725_v58, %v4724_v57  ;;  %v8743_v11 = vpack.c.bf16 %v4726_v59, %v4726_v59  ;;  %v5013_v61 = vpack.c.bf16 %v8741_v56, %v4726_v59  ;;  %v5211_v57 = vpack.c.bf16 %v8741_v56, %v8741_v56  ;;  %v7655_v56 = vld [vmem:[%s8899_s1 + $0x678] sm:$0xff]  }
 0x5c3   : > { %7351 = vmatprep.mubr.msk.bf16.mxu0 %vm204_vm0, %v4729_v60  ;;  %v5024_v35 = vrot.slane %v4729_v60, 3  ;;  %v5025_v63 = vrot.slane %v5013_v61, 3  ;;  %v4752_v1 = vshll.u32 %v4729_v60, 16  ;;  %v4757_v3 = vshll.u32 %v8743_v11, 16 }
 0x5c4   : > { %7352 = vmatmul.mubr.msk.bf16.vlgmr.msra.gmra.mxu0 %vm204_vm0, %v8743_v11  ;;  %v4750_v4 = vshrl.u32 %v4729_v60, 16  ;;  %v4761_v6 = vshrl.u32 %v8743_v11, 16  ;;  %v4929_v8 = vrot.slane %v4729_v60, 1  ;;  %v4930_v38 = vrot.slane %v8743_v11, 1  ;;  %v7654_v60 = vld [vmem:[%s8899_s1 + $0x690] sm:$0xff]  }
 0x5c5   : > { %7368 = vmatpush3.bf16.msra.mxu0 %v8705_v33  ;;  %v5026_v41 = vsel %vm520_vm3, %v5024_v35, %v5025_v63  ;;  %v4754_v44 = vrot.slane %v4752_v1, 1  ;;  %v4759_v13 = vrot.slane %v4757_v3, 1  ;;  %v5121_v20 = vshrl.u32 %v5013_v61, 16 }
 0x5c6   : > { %7375 = vmatprep.mubr.msk.bf16.mxu0 %vm204_vm0, %v5026_v41  ;;  %7369 = vmatprep.subr.bf16.mxu0 %v7638_v62  ;;  %v4931_v40 = vsel %vm424_vm2, %v4929_v8, %v4930_v38  ;;  %v5124_v21 = vshll.u32 %v5013_v61, 16  ;;  %v5117_v24 = vrot.slane %v4750_v4, 3  ;;  %v5118_v25 = vrot.slane %v4752_v1, 4  ;;  %v7656_v61 = vld [vmem:[%s8899_s1 + $0x688] sm:$0xff]   ;;  %v7658_v1 = vld [vmem:[%s8899_s1 + $0x680] sm:$0xff]  }
 0x5c7   : > { %v4755_v43 = vor.u32 %v4754_v44, %v4750_v4  ;;  %v4763_v15 = vor.u32 %v4761_v6, %v4759_v13  ;;  %v5123_v26 = vrot.slane %v5121_v20, 3  ;;  %v5315_v35 = vrot.slane %v8794_v29, 2  ;;  %v7659_v41 = vld [vmem:[%s8899_s1 + $0x668] sm:$0xff]   ;;  %v7660_v4 = vld [vmem:[%s8899_s1 + $0x660] sm:$0xff]   ;;  %v7661_v44 = vld [vmem:[%s8899_s1 + $0x6b8] sm:$0xff]  }
 0x5c8   : > { %v5126_v27 = vrot.slane %v5124_v21, 4  ;;  %v5119_v30 = vor.u32 %v5118_v25, %v5117_v24  ;;  %v7663_v8 = vld [vmem:[%s8899_s1 + $0x6a8] sm:$0xff]  }
 0x5c9   : > { %7370 = vmatpush3.bf16.msra.mxu0 %v7638_v62  ;;  %v4760_v33 = vsel %vm243_vm1, %v4755_v43, %v4759_v13  ;;  %v7662_v43 = vld [vmem:[%s8899_s1 + $0x6b0] sm:$0xff]  }
 0x5ca   : > { %7339 = vmatprep.mubr.msk.bf16.mxu1 %vm204_vm0, %v4760_v33  ;;  %7371 = vmatprep.subr.bf16.mxu0 %v7640_v5  ;;  %v5127_v31 = vor.u32 %v5126_v27, %v5123_v26 }
 0x5cb   : > { %7340 = vmatmul.mubr.msk.bf16.vlgmr.msra.gmra.mxu1 %vm204_vm0, %v4763_v15 }
 0x5cc   : > { %7356 = vmatpush3.bf16.msra.mxu1 %v8714_v36  ;;  %7363 = vmatprep.mubr.msk.bf16.mxu1 %vm204_vm0, %v4931_v40  ;;  %v8779_v36 = vpack.c.bf16 %v4726_v59, %v4725_v58  ;;  %v5128_v45 = vsel %vm614_vm4, %v5119_v30, %v5127_v31  ;;  %v5421_v58 = vor.u32 %v5420_v52, %v5417_v53  ;;  %v7653_v59 = vld [vmem:[%s8899_s1 + $0x620] sm:$0xff]  }
 0x5cd   : > { %7372 = vmatpush3.bf16.msra.mxu0 %v7640_v5  ;;  %7357 = vmatprep.subr.bf16.mxu1 %v7641_v10  ;;  %v5514_v5 = vrot.slane %v8794_v29, 3 }
 0x5ce   : > { %7373 = vmatprep.subr.bf16.mxu0 %v7642_v16  ;;  %v5407_v32 = vshrl.u32 %v8779_v36, 16  ;;  %v5410_v34 = vshll.u32 %v8779_v36, 16  ;;  %v5314_v62 = vrot.slane %v8779_v36, 2  ;;  %v5513_v13 = vrot.slane %v8779_v36, 3 }
 0x5d0   : > { %7358 = vmatpush3.bf16.msra.mxu1 %v7641_v10  ;;  %v5409_v49 = vrot.slane %v5407_v32, 2  ;;  %v5412_v46 = vrot.slane %v5410_v34, 3  ;;  %v5316_v3 = vsel %vm812_vm7, %v5314_v62, %v5315_v35  ;;  %v5515_v6 = vsel %vm520_vm3, %v5513_v13, %v5514_v5 }
 0x5d1   : > { %7374 = vmatpush3.bf16.msra.mxu0 %v7642_v16  ;;  %7359 = vmatprep.subr.bf16.mxu1 %v7643_v18  ;;  %v5615_v13 = vrot.slane %v8544_v14, 7 }
 0x5d2   : > { %7391 = vmatprep.subr.bf16.mxu0 %v7644_v19  ;;  %v5413_v55 = vor.u32 %v5412_v46, %v5409_v49 }
 0x5d4   : > { %7360 = vmatpush3.bf16.msra.mxu1 %v7643_v18  ;;  %7376 = vmatmul.mubr.msk.bf16.vlgmr.msra.gmra.mxu0 %vm204_vm0, %v5025_v63  ;;  %v5422_v11 = vsel %vm906_vm6, %v5413_v55, %v5421_v58  ;;  %v7657_v63 = vld [vmem:[%s8899_s1 + $0x670] sm:$0xff]  }
 0x5d5   : > { %7392 = vmatpush3.bf16.msra.mxu0 %v7644_v19  ;;  %7399 = vmatprep.mubr.msk.bf16.mxu0 %vm204_vm0, %v8779_v36 }
 0x5d6   : > { %7361 = vmatprep.subr.bf16.mxu1 %v7645_v22  ;;  %7393 = vmatprep.subr.bf16.mxu0 %v7646_v17 }
 0x5d8   : > { %7362 = vmatpush3.bf16.msra.mxu1 %v7645_v22 }
 0x5d9   : > { %7394 = vmatpush3.bf16.msra.mxu0 %v7646_v17  ;;  %7379 = vmatprep.subr.bf16.mxu1 %v7647_v28 }
 0x5da   : > { %7395 = vmatprep.subr.bf16.mxu0 %v7648_v50 }
 0x5db   : > { %7364 = vmatmul.mubr.msk.bf16.vlgmr.msra.gmra.mxu1 %vm204_vm0, %v4930_v38  ;;  %v7664_v38 = vld [vmem:[%s8899_s1 + $0x6a0] sm:$0xff]  }
 0x5dc   : > { %7380 = vmatpush3.bf16.msra.mxu1 %v7647_v28  ;;  %7387 = vmatprep.mubr.msk.bf16.mxu1 %vm204_vm0, %v5128_v45 }
 0x5dd   : > { %7396 = vmatpush3.bf16.msra.mxu0 %v7648_v50  ;;  %7381 = vmatprep.subr.bf16.mxu1 %v7649_v37 }
 0x5de   : > { %7397 = vmatprep.subr.bf16.mxu0 %v7650_v39 }
 0x5e0   : > { %7382 = vmatpush3.bf16.msra.mxu1 %v7649_v37 }
 0x5e1   : > { %7398 = vmatpush3.bf16.msra.mxu0 %v7650_v39  ;;  %7383 = vmatprep.subr.bf16.mxu1 %v7651_v47 }
 0x5e2   : > { %7415 = vmatprep.subr.bf16.mxu0 %v7652_v51 }
 0x5e4   : > { %7384 = vmatpush3.bf16.msra.mxu1 %v7651_v47  ;;  %7400 = vmatmul.mubr.msk.bf16.vlgmr.msra.gmra.mxu0 %vm204_vm0, %v5211_v57 }
 0x5e5   : > { %7416 = vmatpush3.bf16.msra.mxu0 %v7652_v51  ;;  %7423 = vmatprep.mubr.msk.bf16.mxu0 %vm204_vm0, %v5422_v11 }
 0x5e6   : > { %7385 = vmatprep.subr.bf16.mxu1 %v7653_v59  ;;  %7417 = vmatprep.subr.bf16.mxu0 %v7654_v60 }
 0x5e8   : > { %7386 = vmatpush3.bf16.msra.mxu1 %v7653_v59 }
 0x5e9   : > { %7418 = vmatpush3.bf16.msra.mxu0 %v7654_v60  ;;  %7403 = vmatprep.subr.bf16.mxu1 %v7655_v56 }
 0x5ea   : > { %7419 = vmatprep.subr.bf16.mxu0 %v7656_v61 }
 0x5eb   : > { %7388 = vmatmul.mubr.msk.bf16.vlgmr.msra.gmra.mxu1 %vm204_vm0, %v5127_v31 }
 0x5ec   : > { %7404 = vmatpush3.bf16.msra.mxu1 %v7655_v56  ;;  %7411 = vmatprep.mubr.msk.bf16.mxu1 %vm204_vm0, %v5316_v3 }
 0x5ed   : > { %7420 = vmatpush3.bf16.msra.mxu0 %v7656_v61  ;;  %7405 = vmatprep.subr.bf16.mxu1 %v7657_v63 }
 0x5ee   : > { %7421 = vmatprep.subr.bf16.mxu0 %v7658_v1 }
 0x5f0   : > { %7406 = vmatpush3.bf16.msra.mxu1 %v7657_v63 }
 0x5f1   : > { %7422 = vmatpush3.bf16.msra.mxu0 %v7658_v1  ;;  %7407 = vmatprep.subr.bf16.mxu1 %v7659_v41 }
 0x5f4   : > { %7408 = vmatpush3.bf16.msra.mxu1 %v7659_v41  ;;  %7424 = vmatmul.mubr.msk.bf16.vlgmr.msra.gmra.mxu0 %vm204_vm0, %v5421_v58 }
 0x5f5   : > { %7409 = vmatprep.subr.bf16.mxu1 %v7660_v4 }
 0x5f8   : > { %7410 = vmatpush3.bf16.msra.mxu1 %v7660_v4 }
 0x5f9   : > { %7427 = vmatprep.subr.bf16.mxu1 %v7661_v44 }
 0x5fb   : > { %7412 = vmatmul.mubr.msk.bf16.vlgmr.msra.gmra.mxu1 %vm204_vm0, %v5315_v35 }
 0x5fc   : > { %7428 = vmatpush3.bf16.msra.mxu1 %v7661_v44  ;;  %7435 = vmatprep.mubr.msk.bf16.mxu1 %vm204_vm0, %v5515_v6  ;;  %v6464_v44 = vld [vmem:[%s8900_s2 + $0x5] ss:$0 sm:$0xff] }
 0x5fd   : > { %7429 = vmatprep.subr.bf16.mxu1 %v7662_v43 }
 0x600   : > { %7430 = vmatpush3.bf16.msra.mxu1 %v7662_v43 }
 0x601   : > { %7431 = vmatprep.subr.bf16.mxu1 %v7663_v8 }
 0x604   : > { %7432 = vmatpush3.bf16.msra.mxu1 %v7663_v8  ;;  %v5617_v8 = vrot.slane %v8538_v9, 7 }
 0x605   : > { %7433 = vmatprep.subr.bf16.mxu1 %v7664_v38 }
 0x608   : > { %7434 = vmatpush3.bf16.msra.mxu1 %v7664_v38 }
 0x60b   : > { %7436 = vmatmul.mubr.msk.bf16.vlgmr.msra.gmra.mxu1 %vm204_vm0, %v5514_v5 }
 0x684   : > { %v7353_v33 = vpop.f32.mrf.mxu0 }
 0x686   : > { %v4904_v15 = vpop.f32.mrf.mxu0 }
 0x688   : > { %v7354_v10 = vpop.f32.mrf.mxu0 }
 0x68a   : > { %v4907_v19 = vpop.f32.mrf.mxu0 }
 0x68b   : > { %v7341_v16 = vpop.f32.mrf.mxu1 }
 0x68c   : > { %v4913_v39 = vadd.f32 %v7353_v33, %v7341_v16  ;;  %v5613_v33 = vrot.slane %v8542_v7, 7 }
 0x68d   : > { %v4828_v40 = vpop.f32.mrf.mxu1 }
 0x68e   : > { %v4905_v45 = vadd.f32 %v4904_v15, %v4828_v40  ;;  %v5618_v40 = vsel %vm2005_vm9, %v5615_v13, %v5617_v8 }
 0x68f   : > { %v7342_v18 = vpop.f32.mrf.mxu1 }
 0x690   : > { %v5612_v18 = vrot.slane %v8540_v12, 7  ;;  %v5616_v12 = vsel %vm2005_vm9, %v5613_v33, %v5615_v13 }
 0x691   : > { %v4831_v22 = vpop.f32.mrf.mxu1 }
 0x692   : > { %v4908_v53 = vadd.f32 %v4907_v19, %v4831_v22  ;;  %v5614_v14 = vsel %vm2005_vm9, %v5612_v18, %v5613_v33 }
 0x694   : > { %v7377_v20 = vpop.f32.mrf.mxu0 }
 0x696   : > { %v5091_v21 = vpop.f32.mrf.mxu0 }
 0x698   : > { %v7378_v36 = vpop.f32.mrf.mxu0 }
 0x69a   : > { %v5094_v25 = vpop.f32.mrf.mxu0 }
 0x69b   : > { %v7365_v17 = vpop.f32.mrf.mxu1 }
 0x69c   : > { %v5012_v49 = vadd.f32 %v7365_v17, %v4913_v39 }
 0x69d   : > { %v4996_v23 = vpop.f32.mrf.mxu1 }
 0x69e   : > { %v5010_v47 = vadd.f32 %v4996_v23, %v4905_v45  ;;  %v5107_v52 = vadd.f32 %v7377_v20, %v5012_v49 }
 0x69f   : > { %v7366_v24 = vpop.f32.mrf.mxu1 }
 0x6a0   : > { %v5105_v59 = vadd.f32 %v5091_v21, %v5010_v47 }
 0x6a1   : > { %v4999_v29 = vpop.f32.mrf.mxu1 }
 0x6a2   : > { %v5011_v57 = vadd.f32 %v4999_v29, %v4908_v53 }
 0x6a4   : > { %v7401_v26 = vpop.f32.mrf.mxu0  ;;  %v5106_v11 = vadd.f32 %v5094_v25, %v5011_v57 }
 0x6a6   : > { %v5285_v27 = vpop.f32.mrf.mxu0 }
 0x6a8   : > { %v7402_v28 = vpop.f32.mrf.mxu0 }
 0x6aa   : > { %v5288_v32 = vpop.f32.mrf.mxu0 }
 0x6ab   : > { %v7389_v50 = vpop.f32.mrf.mxu1 }
 0x6ac   : > { %v5209_v58 = vadd.f32 %v7389_v50, %v5107_v52 }
 0x6ad   : > { %v5193_v30 = vpop.f32.mrf.mxu1 }
 0x6ae   : > { %v5207_v60 = vadd.f32 %v5193_v30, %v5105_v59  ;;  %v5301_v56 = vadd.f32 %v7401_v26, %v5209_v58 }
 0x6af   : > { %v7390_v31 = vpop.f32.mrf.mxu1 }
 0x6b0   : > { %v5299_v35 = vadd.f32 %v5285_v27, %v5207_v60 }
 0x6b1   : > { %v5196_v0 = vpop.f32.mrf.mxu1 }
 0x6b2   : > { %v5208_v61 = vadd.f32 %v5196_v0, %v5106_v11 }
 0x6b4   : > { %v7425_v34 = vpop.f32.mrf.mxu0  ;;  %v5300_v3 = vadd.f32 %v5288_v32, %v5208_v61 }
 0x6b6   : > { %v5487_v37 = vpop.f32.mrf.mxu0 }
 0x6b8   : > { %v7426_v2 = vpop.f32.mrf.mxu0 }
 0x6ba   : > { %v5490_v16 = vpop.f32.mrf.mxu0 }
 0x6bb   : > { %v7413_v46 = vpop.f32.mrf.mxu1 }
 0x6bc   : > { %v5397_v62 = vadd.f32 %v7413_v46, %v5301_v56 }
 0x6bd   : > { %v5381_v51 = vpop.f32.mrf.mxu1 }
 0x6be   : > { %v5395_v63 = vadd.f32 %v5381_v51, %v5299_v35  ;;  %v5503_v41 = vadd.f32 %v7425_v34, %v5397_v62 }
 0x6bf   : > { %v7414_v55 = vpop.f32.mrf.mxu1 }
 0x6c0   : > { %v5501_v6 = vadd.f32 %v5487_v37, %v5395_v63 }
 0x6c1   : > { %v5384_v1 = vpop.f32.mrf.mxu1 }
 0x6c2   : > { %v5396_v5 = vadd.f32 %v5384_v1, %v5300_v3 }
 0x6c4   : > { %v5502_v36 = vadd.f32 %v5490_v16, %v5396_v5 }
 0x6cb   : > { %v7437_v4 = vpop.f32.mrf.mxu1 }
 0x6cc   : > { %v5596_v43 = vadd.f32 %v7437_v4, %v5503_v41 }
 0x6cd   : > { %v5580_v38 = vpop.f32.mrf.mxu1 }
 0x6ce   : > { %v5607_v15 = vadd.f32 %v6464_v44, %v5596_v43  ;;  %v5594_v10 = vadd.f32 %v5580_v38, %v5501_v6 }
 0x6cf   : > { %v7438_v19 = vpop.f32.mrf.mxu1 }
 0x6d0   : > { %v5624_v20 = vadd.f32 %v5618_v40, %v5607_v15  ;;  %v5605_v21 = vadd.f32 %v6464_v44, %v5594_v10 }
 0x6d1   : > { %v5583_v22 = vpop.f32.mrf.mxu1 }
 0x6d2   : > { %v5627_v17 = vmax.f32 %v5624_v20, 0.0  ;;  %v5622_v9 = vadd.f32 %v5614_v14, %v5605_v21  ;;  %v5595_v23 = vadd.f32 %v5583_v22, %v5502_v36 }
 0x6d4   : > { %v5630_v7 = vmul.f32 %v8723_v42, %v5627_v17  ;;  %v5625_v24 = vmax.f32 %v5622_v9, 0.0  ;;  %v5606_v25 = vadd.f32 %v6464_v44, %v5595_v23 }
 0x6d6   : > { %5633 = vst.msk [vmem:[#allocation2 + $0x17] sm:$0x3f] %vm1115_vm8, %v5630_v7  ;;  %v5628_v26 = vmul.f32 %v8730_v48, %v5625_v24  ;;  %v5623_v27 = vadd.f32 %v5616_v12, %v5606_v25 }
 0x6d8   : > { %5631 = vst.msk [vmem:[#allocation2 + $0x7] sm:$0xff] %vm204_vm0, %v5628_v26  ;;  %v5626_v28 = vmax.f32 %v5623_v27, 0.0 }
 0x6da   : > { %v5629_v29 = vmul.f32 %v8737_v54, %v5626_v28 }
 0x6dc   : > { %5632 = vst.msk [vmem:[#allocation2 + $0xf] sm:$0xff] %vm204_vm0, %v5629_v29 }
 0x6dd   : > { %v5637_v50 = vld [vmem:[#allocation2 + $0x18] sm:$0xff] }
 0x6de   : > { %5642 = vst.msk [vmem:[%s7848_s24 + $0x18] sm:$0xff] %vm204_vm0, %v5637_v50 }
 0x6df   : > { %v5634_v42 = vld [vmem:[#allocation2] sm:$0xff] }
 0x6e0   : > { %5639 = vst.msk [vmem:[%s7848_s24] sm:$0xff] %vm204_vm0, %v5634_v42 }
 0x6e3   : > { %v5635_v30 = vld [vmem:[#allocation2 + $0x8] sm:$0xff]  ;;  %v5636_v31 = vld [vmem:[#allocation2 + $0x10] sm:$0xff] }
 0x6e4   : > { %5640 = vst.msk [vmem:[%s7848_s24 + $0x8] sm:$0xff] %vm204_vm0, %v5635_v30  ;;  %5641 = vst.msk [vmem:[%s7848_s24 + $0x10] sm:$0xff] %vm204_vm0, %v5636_v31 }
 0x6e5 PF: > { %s14_s15 = sadd.s32 1, %s7681_s15  }
 0x6e6   : > { %p11_p4 = scmp.ge.s32.totalorder %s14_s15, 4  }
 0x6e8   :  { %13 = sbr.rel (!%p11_p4) target bundleno = 1 (0x1), region = 124 }

</bundles_post_ra>
